<compile_context>
chip_gen: v7x
topology: tpu7x:2x2x1
jax: 0.10.0
libtpu: 0.0.40
codegen_flags: <defaults>
</compile_context>

<pallas_src>
import jax
import jax.numpy as jnp
from jax import lax
from jax.experimental import pallas as pl
from jax.experimental.pallas import tpu as pltpu


def _round_up(x, m):
    return (x + m - 1) // m * m


# ----------------------------------------------------------------------------- kernel
def _bigru_kernel(emb_ref, lens_ref, wih_fb_ref, bi_fb_ref,
                  whh_f_ref, bhn_f_ref, whh_b_ref, bhn_b_ref,
                  out_ref, hid_ref,
                  gi_f_ref, gi_b_ref):
    """One batch tile.
      emb_ref : (T, Bt, H)  bf16   embedded inputs
      lens_ref: (Bt, 1)     int32  sequence lengths
      wih_fb  : (H, 6H)     bf16   [fwd r|z|n , bwd r|z|n] input weights
      bi_fb   : (1, 6H)     f32    folded biases (r,z: bih+bhh ; n: bih only)
      whh_*   : (H, 3H)     bf16   recurrent weights per direction
      bhn_*   : (1, H)      f32    bhh_n per direction (kept separate: multiplied by r)
      out_ref : (T, Bt, H)  f32    summed bidirectional outputs (zero at padded steps)
      hid_ref : (2, Bt, H)  f32    final hidden per direction
      gi_*    : (T, Bt, 3H) f32    VMEM scratch: hoisted input projections
    """
    T, Bt, H = out_ref.shape
    H3 = 3 * H
    unroll = min(T, 8)

    wih_fb = wih_fb_ref[...]
    bi_fb = bi_fb_ref[...]
    whh_f = whh_f_ref[...]
    whh_b = whh_b_ref[...]
    bhn_f = bhn_f_ref[...]
    bhn_b = bhn_b_ref[...]
    lens = lens_ref[...]                       # (Bt, 1) int32

    # ---- hoisted input projection (no recurrence): one fused dot per timestep ----
    def proj_body(t, carry):
        x = emb_ref[t]                                                    # (Bt, H) bf16
        g = jnp.dot(x, wih_fb, preferred_element_type=jnp.float32) + bi_fb  # (Bt, 6H) f32
        gi_f_ref[t] = g[:, :H3]
        gi_b_ref[t] = g[:, H3:]
        return carry

    lax.fori_loop(0, T, proj_body, 0, unroll=unroll)

    # ---- gate-fused GRU step: single h @ Whh dot on the serial path ----
    def gru_step(gi_t, h, whh, bhn):
        gh = jnp.dot(h.astype(jnp.bfloat16), whh,
                     preferred_element_type=jnp.float32)                  # (Bt, 3H) f32
        r = jax.nn.sigmoid(gi_t[:, :H] + gh[:, :H])
        z = jax.nn.sigmoid(gi_t[:, H:2 * H] + gh[:, H:2 * H])
        n = jnp.tanh(gi_t[:, 2 * H:] + r * (gh[:, 2 * H:] + bhn))
        return (1.0 - z) * n + z * h

    # ---- forward direction (t = 0 .. T-1) ----
    def fwd_body(t, h):
        m = (t < lens).astype(jnp.float32)                                # (Bt, 1)
        h_new = gru_step(gi_f_ref[t], h, whh_f, bhn_f)
        h = m * h_new + (1.0 - m) * h                                     # freeze at pads
        out_ref[t] = m * h                                                # pads -> exact 0
        return h

    h_f = lax.fori_loop(0, T, fwd_body, jnp.zeros((Bt, H), jnp.float32), unroll=unroll)
    hid_ref[0] = h_f

    # ---- backward direction (t = T-1 .. 0) ----
    def bwd_body(i, h):
        t = T - 1 - i
        m = (t < lens).astype(jnp.float32)
        h_new = gru_step(gi_b_ref[t], h, whh_b, bhn_b)
        h = m * h_new + (1.0 - m) * h
        out_ref[t] = out_ref[t] + m * h                                   # sum directions
        return h

    h_b = lax.fori_loop(0, T, bwd_body, jnp.zeros((Bt, H), jnp.float32), unroll=unroll)
    hid_ref[1] = h_b


# ----------------------------------------------------------------------------- wrapper
def _fuse_params(params):
    """Gate-fuse weights (bf16 MXU inputs) and fold r/z biases (f32)."""
    def cat3(w):                                   # (3,H,H) gate order r,z,n -> (H,3H)
        return jnp.concatenate([w[0], w[1], w[2]], axis=1)

    def bi(d):                                     # folded x-side bias, (1,3H)
        bih, bhh = params[f"bih_{d}"], params[f"bhh_{d}"]
        return jnp.concatenate([bih[0] + bhh[0], bih[1] + bhh[1], bih[2]], axis=1)

    wih_fb = jnp.concatenate([cat3(params["wih_f"]), cat3(params["wih_b"])],
                             axis=1).astype(jnp.bfloat16)                 # (H, 6H)
    bi_fb = jnp.concatenate([bi("f"), bi("b")], axis=1).astype(jnp.float32)  # (1, 6H)
    whh_f = cat3(params["whh_f"]).astype(jnp.bfloat16)                    # (H, 3H)
    whh_b = cat3(params["whh_b"]).astype(jnp.bfloat16)
    bhn_f = params["bhh_f"][2].astype(jnp.float32)                        # (1, H)
    bhn_b = params["bhh_b"][2].astype(jnp.float32)
    return wih_fb, bi_fb, whh_f, bhn_f, whh_b, bhn_b


def encoder_rnn_forward(input_seq, input_lengths, params):
    """input_seq: (T, B) int32 token ids. input_lengths: (B,) int32.
    Returns (outputs (T,B,H) f32, hidden (2,B,H) f32)."""
    emb_table = params["embedding"]                 # (V, H)
    T, B = input_seq.shape
    H = emb_table.shape[1]
    H3, H6 = 3 * H, 6 * H

    # Batch tiling: pad B to a multiple of 8 sublanes; cap the tile so double-buffered
    # blocks + scratch comfortably fit the (v7x) scoped-VMEM budget; grid is "parallel".
    B_tile = min(64, _round_up(B, 8))
    B_pad = _round_up(B, B_tile)
    padb = B_pad - B

    tokens = jnp.pad(input_seq.astype(jnp.int32), ((0, 0), (0, padb)))
    lens2d = jnp.pad(input_lengths.astype(jnp.int32), (0, padb)).reshape(B_pad, 1)

    # Embedding gather stays in plain JAX (data-dependent gather).
    embedded = jnp.take(emb_table, tokens, axis=0).astype(jnp.bfloat16)   # (T, B_pad, H)

    wih_fb, bi_fb, whh_f, bhn_f, whh_b, bhn_b = _fuse_params(params)

    grid = (B_pad // B_tile,)
    rep2 = lambda i: (0, 0)                         # weights replicated across batch tiles
    in_specs = [
        pl.BlockSpec((T, B_tile, H), lambda i: (0, i, 0)),    # embedded
        pl.BlockSpec((B_tile, 1), lambda i: (i, 0)),          # lengths
        pl.BlockSpec((H, H6), rep2),                          # wih_fb
        pl.BlockSpec((1, H6), rep2),                          # bi_fb
        pl.BlockSpec((H, H3), rep2),                          # whh_f
        pl.BlockSpec((1, H), rep2),                           # bhn_f
        pl.BlockSpec((H, H3), rep2),                          # whh_b
        pl.BlockSpec((1, H), rep2),                           # bhn_b
    ]
    out_specs = (
        pl.BlockSpec((T, B_tile, H), lambda i: (0, i, 0)),    # outputs
        pl.BlockSpec((2, B_tile, H), lambda i: (0, i, 0)),    # hidden
    )
    out_shape = (jax.ShapeDtypeStruct((T, B_pad, H), jnp.float32),
                 jax.ShapeDtypeStruct((2, B_pad, H), jnp.float32))
    scratch_shapes = [pltpu.VMEM((T, B_tile, H3), jnp.float32),   # gi fwd
                      pltpu.VMEM((T, B_tile, H3), jnp.float32)]   # gi bwd

    # VMEM budget estimate (double-buffered blocks + scratch), clamped to a v7x-safe 32 MiB.
    est = (2 * T * B_tile * H * 2            # embedded block, bf16, 2 buffers
           + 2 * T * B_tile * H * 4          # output block, f32, 2 buffers
           + 2 * 2 * B_tile * H * 4          # hidden block
           + 2 * T * B_tile * H3 * 4         # gi scratch (both directions)
           + 2 * (H * H6 + 2 * H * H3) * 2   # bf16 weights, 2 buffers
           + 2 * (H6 + 2 * H) * 4            # biases
           + (1 << 16))
    vmem_limit = int(min(max(2 * est, 8 << 20), 32 << 20))

    out, hidden = pl.pallas_call(
        _bigru_kernel,
        grid=grid,
        in_specs=in_specs,
        out_specs=out_specs,
        out_shape=out_shape,
        scratch_shapes=scratch_shapes,
        compiler_params=pltpu.CompilerParams(
            dimension_semantics=("parallel",),
            vmem_limit_bytes=vmem_limit),
    )(embedded, lens2d, wih_fb, bi_fb, whh_f, bhn_f, whh_b, bhn_b)

    return out[:, :B, :], hidden[:, :B, :]


# ----------------------------------------------------------------------------- reference
def _gru_cell(x, h, wih, whh, bih, bhh):
    """PyTorch GRU cell (f32). x,h: (B,H). wih,whh: (3,H,H) gate order r,z,n. b*: (3,1,H)."""
    gi_r = jnp.dot(x, wih[0]) + bih[0]
    gi_z = jnp.dot(x, wih[1]) + bih[1]
    gi_n = jnp.dot(x, wih[2]) + bih[2]
    gh_r = jnp.dot(h, whh[0]) + bhh[0]
    gh_z = jnp.dot(h, whh[1]) + bhh[1]
    gh_n = jnp.dot(h, whh[2]) + bhh[2]
    r = jax.nn.sigmoid(gi_r + gh_r)
    z = jax.nn.sigmoid(gi_z + gh_z)
    n = jnp.tanh(gi_n + r * gh_n)
    return (1.0 - z) * n + z * h


def _reference_forward(input_seq, input_lengths, params):
    """Pure-JAX f32 reference (same math as the PyTorch module) for a sanity check."""
    emb_table = params["embedding"]
    T, B = input_seq.shape
    embedded = jnp.take(emb_table, input_seq, axis=0).astype(jnp.float32)
    mask = (jnp.arange(T)[:, None] < input_lengths[None, :]).astype(jnp.float32)[..., None]

    def run(direction):
        wih = params[f"wih_{direction}"]
        whh = params[f"whh_{direction}"]
        bih = params[f"bih_{direction}"]
        bhh = params[f"bhh_{direction}"]
        ts = range(T) if direction == "f" else range(T - 1, -1, -1)
        h = jnp.zeros((B, emb_table.shape[1]), jnp.float32)
        outs = [None] * T
        for t in ts:
            h_new = _gru_cell(embedded[t], h, wih, whh, bih, bhh)
            h = mask[t] * h_new + (1.0 - mask[t]) * h
            outs[t] = mask[t] * h
        return jnp.stack(outs, 0), h

    of, hf = run("f")
    ob, hb = run("b")
    return of + ob, jnp.stack([hf, hb], 0)


def _init_params(key, vocab, hidden):
    """Deterministic synthetic init (PyTorch-style uniform(-1/sqrt(H), 1/sqrt(H)))."""
    ks = jax.random.split(key, 9)
    bound = 1.0 / jnp.sqrt(jnp.float32(hidden))
    u = lambda k, shape: jax.random.uniform(k, shape, jnp.float32, -bound, bound)
    return {
        "embedding": jax.random.normal(ks[0], (vocab, hidden), jnp.float32) * 0.1,
        "wih_f": u(ks[1], (3, hidden, hidden)),
        "whh_f": u(ks[2], (3, hidden, hidden)),
        "bih_f": u(ks[3], (3, 1, hidden)),
        "bhh_f": u(ks[4], (3, 1, hidden)),
        "wih_b": u(ks[5], (3, hidden, hidden)),
        "whh_b": u(ks[6], (3, hidden, hidden)),
        "bih_b": u(ks[7], (3, 1, hidden)),
        "bhh_b": u(ks[8], (3, 1, hidden)),
    }


if __name__ == "__main__":
    key = jax.random.PRNGKey(0)
    VOCAB, HIDDEN, T, B = 50, 32, 8, 4

    k_param, k_tok = jax.random.split(key)
    params = _init_params(k_param, VOCAB, HIDDEN)

    # Lengths sorted descending, as pack_padded_sequence (enforce_sorted=True) expects.
    input_lengths = jnp.array([8, 6, 5, 3], dtype=jnp.int32)
    tokens = jax.random.randint(k_tok, (T, B), 1, VOCAB, dtype=jnp.int32)
    pad_mask = (jnp.arange(T, dtype=jnp.int32)[:, None] < input_lengths[None, :])
    input_seq = jnp.where(pad_mask, tokens, 0)   # pad token id = 0 at padded positions

    outputs, hidden = jax.block_until_ready(
        encoder_rnn_forward(input_seq, input_lengths, params))

    ref_out, ref_hid = _reference_forward(input_seq, input_lengths, params)

    assert outputs.shape == (T, B, HIDDEN) and hidden.shape == (2, B, HIDDEN)
    assert bool(jnp.all(jnp.isfinite(outputs))) and bool(jnp.all(jnp.isfinite(hidden)))
    # bf16 MXU inputs with f32 accumulation -> small tolerance vs the f32 reference.
    assert bool(jnp.allclose(outputs, ref_out, atol=3e-2, rtol=3e-2))
    assert bool(jnp.allclose(hidden, ref_hid, atol=3e-2, rtol=3e-2))
    # Padded positions must be exactly zero (pad_packed_sequence semantics).
    assert bool(jnp.all(jnp.where(pad_mask[..., None], 0.0, outputs) == 0.0))

    print("KERNEL_OK")
</pallas_src>

<mosaic_0001>
module attributes {stable_mosaic.version = 11 : i64} {
  func.func @_bigru_kernel(%arg0: i32, %arg1: memref<8x8x32xbf16, #tpu.memory_space<vmem>>, %arg2: memref<8x1xi32, #tpu.memory_space<vmem>>, %arg3: memref<32x192xbf16, #tpu.memory_space<vmem>>, %arg4: memref<1x192xf32, #tpu.memory_space<vmem>>, %arg5: memref<32x96xbf16, #tpu.memory_space<vmem>>, %arg6: memref<1x32xf32, #tpu.memory_space<vmem>>, %arg7: memref<32x96xbf16, #tpu.memory_space<vmem>>, %arg8: memref<1x32xf32, #tpu.memory_space<vmem>>, %arg9: memref<8x8x32xf32, #tpu.memory_space<vmem>>, %arg10: memref<2x8x32xf32, #tpu.memory_space<vmem>>, %arg11: memref<8x8x96xf32, #tpu.memory_space<vmem>>, %arg12: memref<8x8x96xf32, #tpu.memory_space<vmem>>) attributes {dimension_semantics = [#tpu.dimension_semantics<parallel>], iteration_bounds = array<i64: 1>, scalar_prefetch = 0 : i64, scratch_operands = 2 : i64, tpu.core_type = #tpu.core_type<tc>, window_params = [{transform_indices = @transform_0, window_bounds = array<i64: 8, 8, 32>}, {transform_indices = @transform_1, window_bounds = array<i64: 8, 1>}, {pipeline_mode = #tpu.pipeline_mode<synchronous>, transform_indices = @transform_2, window_bounds = array<i64: 32, 192>}, {pipeline_mode = #tpu.pipeline_mode<synchronous>, transform_indices = @transform_3, window_bounds = array<i64: 1, 192>}, {pipeline_mode = #tpu.pipeline_mode<synchronous>, transform_indices = @transform_4, window_bounds = array<i64: 32, 96>}, {pipeline_mode = #tpu.pipeline_mode<synchronous>, transform_indices = @transform_5, window_bounds = array<i64: 1, 32>}, {pipeline_mode = #tpu.pipeline_mode<synchronous>, transform_indices = @transform_6, window_bounds = array<i64: 32, 96>}, {pipeline_mode = #tpu.pipeline_mode<synchronous>, transform_indices = @transform_7, window_bounds = array<i64: 1, 32>}, {transform_indices = @transform_8, window_bounds = array<i64: 8, 8, 32>}, {transform_indices = @transform_9, window_bounds = array<i64: 2, 8, 32>}]} {
    %c0 = arith.constant 0 : index
    %c0_0 = arith.constant 0 : index
    %0 = vector.load %arg3[%c0, %c0_0] : memref<32x192xbf16, #tpu.memory_space<vmem>>, vector<32x192xbf16>
    %c0_1 = arith.constant 0 : index
    %c0_2 = arith.constant 0 : index
    %1 = vector.load %arg4[%c0_1, %c0_2] : memref<1x192xf32, #tpu.memory_space<vmem>>, vector<1x192xf32>
    %c0_3 = arith.constant 0 : index
    %c0_4 = arith.constant 0 : index
    %2 = vector.load %arg5[%c0_3, %c0_4] : memref<32x96xbf16, #tpu.memory_space<vmem>>, vector<32x96xbf16>
    %c0_5 = arith.constant 0 : index
    %c0_6 = arith.constant 0 : index
    %3 = vector.load %arg7[%c0_5, %c0_6] : memref<32x96xbf16, #tpu.memory_space<vmem>>, vector<32x96xbf16>
    %c0_7 = arith.constant 0 : index
    %c0_8 = arith.constant 0 : index
    %4 = vector.load %arg6[%c0_7, %c0_8] : memref<1x32xf32, #tpu.memory_space<vmem>>, vector<1x32xf32>
    %c0_9 = arith.constant 0 : index
    %c0_10 = arith.constant 0 : index
    %5 = vector.load %arg8[%c0_9, %c0_10] : memref<1x32xf32, #tpu.memory_space<vmem>>, vector<1x32xf32>
    %c0_11 = arith.constant 0 : index
    %c0_12 = arith.constant 0 : index
    %6 = vector.load %arg2[%c0_11, %c0_12] : memref<8x1xi32, #tpu.memory_space<vmem>>, vector<8x1xi32>
    %c0_i32 = arith.constant 0 : i32
    %7 = arith.index_cast %c0_i32 : i32 to index
    %c0_13 = arith.constant 0 : index
    %c0_14 = arith.constant 0 : index
    %8 = vector.load %arg1[%7, %c0_13, %c0_14] : memref<8x8x32xbf16, #tpu.memory_space<vmem>>, vector<1x8x32xbf16>
    %9 = vector.shape_cast %8 : vector<1x8x32xbf16> to vector<8x32xbf16>
    %cst = arith.constant dense<0.000000e+00> : vector<8x192xf32>
    %10 = tpu.matmul %9, %0, %cst {dimension_numbers = #tpu.dot_dimension_numbers<[1], [0], [0], [1], [0, 0, 1, 1], [], []>} : vector<8x32xbf16>, vector<32x192xbf16>, vector<8x192xf32> -> vector<8x192xf32>
    %11 = vector.broadcast %1 : vector<1x192xf32> to vector<8x192xf32>
    %12 = arith.addf %10, %11 : vector<8x192xf32>
    %13 = vector.extract_strided_slice %12 {offsets = [0, 0], sizes = [8, 96], strides = [1, 1]} : vector<8x192xf32> to vector<8x96xf32>
    %14 = arith.index_cast %c0_i32 : i32 to index
    %c0_15 = arith.constant 0 : index
    %c0_16 = arith.constant 0 : index
    %15 = vector.load %arg11[%14, %c0_15, %c0_16] : memref<8x8x96xf32, #tpu.memory_space<vmem>>, vector<1x8x96xf32>
    %16 = vector.shape_cast %15 : vector<1x8x96xf32> to vector<8x96xf32>
    %17 = vector.shape_cast %13 : vector<8x96xf32> to vector<1x8x96xf32>
    tpu.vector_store %arg11[%14, %c0_15, %c0_16], %17 {strides = array<i32>} : memref<8x8x96xf32, #tpu.memory_space<vmem>>, vector<1x8x96xf32>,
    %18 = vector.extract_strided_slice %12 {offsets = [0, 96], sizes = [8, 96], strides = [1, 1]} : vector<8x192xf32> to vector<8x96xf32>
    %19 = arith.index_cast %c0_i32 : i32 to index
    %c0_17 = arith.constant 0 : index
    %c0_18 = arith.constant 0 : index
    %20 = vector.load %arg12[%19, %c0_17, %c0_18] : memref<8x8x96xf32, #tpu.memory_space<vmem>>, vector<1x8x96xf32>
    %21 = vector.shape_cast %20 : vector<1x8x96xf32> to vector<8x96xf32>
    %22 = vector.shape_cast %18 : vector<8x96xf32> to vector<1x8x96xf32>
    tpu.vector_store %arg12[%19, %c0_17, %c0_18], %22 {strides = array<i32>} : memref<8x8x96xf32, #tpu.memory_space<vmem>>, vector<1x8x96xf32>,
    %c1_i32 = arith.constant 1 : i32
    %23 = arith.index_cast %c1_i32 : i32 to index
    %c0_19 = arith.constant 0 : index
    %c0_20 = arith.constant 0 : index
    %24 = vector.load %arg1[%23, %c0_19, %c0_20] : memref<8x8x32xbf16, #tpu.memory_space<vmem>>, vector<1x8x32xbf16>
    %25 = vector.shape_cast %24 : vector<1x8x32xbf16> to vector<8x32xbf16>
    %cst_21 = arith.constant dense<0.000000e+00> : vector<8x192xf32>
    %26 = tpu.matmul %25, %0, %cst_21 {dimension_numbers = #tpu.dot_dimension_numbers<[1], [0], [0], [1], [0, 0, 1, 1], [], []>} : vector<8x32xbf16>, vector<32x192xbf16>, vector<8x192xf32> -> vector<8x192xf32>
    %27 = vector.broadcast %1 : vector<1x192xf32> to vector<8x192xf32>
    %28 = arith.addf %26, %27 : vector<8x192xf32>
    %29 = vector.extract_strided_slice %28 {offsets = [0, 0], sizes = [8, 96], strides = [1, 1]} : vector<8x192xf32> to vector<8x96xf32>
    %30 = arith.index_cast %c1_i32 : i32 to index
    %c0_22 = arith.constant 0 : index
    %c0_23 = arith.constant 0 : index
    %31 = vector.load %arg11[%30, %c0_22, %c0_23] : memref<8x8x96xf32, #tpu.memory_space<vmem>>, vector<1x8x96xf32>
    %32 = vector.shape_cast %31 : vector<1x8x96xf32> to vector<8x96xf32>
    %33 = vector.shape_cast %29 : vector<8x96xf32> to vector<1x8x96xf32>
    tpu.vector_store %arg11[%30, %c0_22, %c0_23], %33 {strides = array<i32>} : memref<8x8x96xf32, #tpu.memory_space<vmem>>, vector<1x8x96xf32>,
    %34 = vector.extract_strided_slice %28 {offsets = [0, 96], sizes = [8, 96], strides = [1, 1]} : vector<8x192xf32> to vector<8x96xf32>
    %35 = arith.index_cast %c1_i32 : i32 to index
    %c0_24 = arith.constant 0 : index
    %c0_25 = arith.constant 0 : index
    %36 = vector.load %arg12[%35, %c0_24, %c0_25] : memref<8x8x96xf32, #tpu.memory_space<vmem>>, vector<1x8x96xf32>
    %37 = vector.shape_cast %36 : vector<1x8x96xf32> to vector<8x96xf32>
    %38 = vector.shape_cast %34 : vector<8x96xf32> to vector<1x8x96xf32>
    tpu.vector_store %arg12[%35, %c0_24, %c0_25], %38 {strides = array<i32>} : memref<8x8x96xf32, #tpu.memory_space<vmem>>, vector<1x8x96xf32>,
    %c2_i32 = arith.constant 2 : i32
    %39 = arith.index_cast %c2_i32 : i32 to index
    %c0_26 = arith.constant 0 : index
    %c0_27 = arith.constant 0 : index
    %40 = vector.load %arg1[%39, %c0_26, %c0_27] : memref<8x8x32xbf16, #tpu.memory_space<vmem>>, vector<1x8x32xbf16>
    %41 = vector.shape_cast %40 : vector<1x8x32xbf16> to vector<8x32xbf16>
    %cst_28 = arith.constant dense<0.000000e+00> : vector<8x192xf32>
    %42 = tpu.matmul %41, %0, %cst_28 {dimension_numbers = #tpu.dot_dimension_numbers<[1], [0], [0], [1], [0, 0, 1, 1], [], []>} : vector<8x32xbf16>, vector<32x192xbf16>, vector<8x192xf32> -> vector<8x192xf32>
    %43 = vector.broadcast %1 : vector<1x192xf32> to vector<8x192xf32>
    %44 = arith.addf %42, %43 : vector<8x192xf32>
    %45 = vector.extract_strided_slice %44 {offsets = [0, 0], sizes = [8, 96], strides = [1, 1]} : vector<8x192xf32> to vector<8x96xf32>
    %46 = arith.index_cast %c2_i32 : i32 to index
    %c0_29 = arith.constant 0 : index
    %c0_30 = arith.constant 0 : index
    %47 = vector.load %arg11[%46, %c0_29, %c0_30] : memref<8x8x96xf32, #tpu.memory_space<vmem>>, vector<1x8x96xf32>
    %48 = vector.shape_cast %47 : vector<1x8x96xf32> to vector<8x96xf32>
    %49 = vector.shape_cast %45 : vector<8x96xf32> to vector<1x8x96xf32>
    tpu.vector_store %arg11[%46, %c0_29, %c0_30], %49 {strides = array<i32>} : memref<8x8x96xf32, #tpu.memory_space<vmem>>, vector<1x8x96xf32>,
    %50 = vector.extract_strided_slice %44 {offsets = [0, 96], sizes = [8, 96], strides = [1, 1]} : vector<8x192xf32> to vector<8x96xf32>
    %51 = arith.index_cast %c2_i32 : i32 to index
    %c0_31 = arith.constant 0 : index
    %c0_32 = arith.constant 0 : index
    %52 = vector.load %arg12[%51, %c0_31, %c0_32] : memref<8x8x96xf32, #tpu.memory_space<vmem>>, vector<1x8x96xf32>
    %53 = vector.shape_cast %52 : vector<1x8x96xf32> to vector<8x96xf32>
    %54 = vector.shape_cast %50 : vector<8x96xf32> to vector<1x8x96xf32>
    tpu.vector_store %arg12[%51, %c0_31, %c0_32], %54 {strides = array<i32>} : memref<8x8x96xf32, #tpu.memory_space<vmem>>, vector<1x8x96xf32>,
    %c3_i32 = arith.constant 3 : i32
    %55 = arith.index_cast %c3_i32 : i32 to index
    %c0_33 = arith.constant 0 : index
    %c0_34 = arith.constant 0 : index
    %56 = vector.load %arg1[%55, %c0_33, %c0_34] : memref<8x8x32xbf16, #tpu.memory_space<vmem>>, vector<1x8x32xbf16>
    %57 = vector.shape_cast %56 : vector<1x8x32xbf16> to vector<8x32xbf16>
    %cst_35 = arith.constant dense<0.000000e+00> : vector<8x192xf32>
    %58 = tpu.matmul %57, %0, %cst_35 {dimension_numbers = #tpu.dot_dimension_numbers<[1], [0], [0], [1], [0, 0, 1, 1], [], []>} : vector<8x32xbf16>, vector<32x192xbf16>, vector<8x192xf32> -> vector<8x192xf32>
    %59 = vector.broadcast %1 : vector<1x192xf32> to vector<8x192xf32>
    %60 = arith.addf %58, %59 : vector<8x192xf32>
    %61 = vector.extract_strided_slice %60 {offsets = [0, 0], sizes = [8, 96], strides = [1, 1]} : vector<8x192xf32> to vector<8x96xf32>
    %62 = arith.index_cast %c3_i32 : i32 to index
    %c0_36 = arith.constant 0 : index
    %c0_37 = arith.constant 0 : index
    %63 = vector.load %arg11[%62, %c0_36, %c0_37] : memref<8x8x96xf32, #tpu.memory_space<vmem>>, vector<1x8x96xf32>
    %64 = vector.shape_cast %63 : vector<1x8x96xf32> to vector<8x96xf32>
    %65 = vector.shape_cast %61 : vector<8x96xf32> to vector<1x8x96xf32>
    tpu.vector_store %arg11[%62, %c0_36, %c0_37], %65 {strides = array<i32>} : memref<8x8x96xf32, #tpu.memory_space<vmem>>, vector<1x8x96xf32>,
    %66 = vector.extract_strided_slice %60 {offsets = [0, 96], sizes = [8, 96], strides = [1, 1]} : vector<8x192xf32> to vector<8x96xf32>
    %67 = arith.index_cast %c3_i32 : i32 to index
    %c0_38 = arith.constant 0 : index
    %c0_39 = arith.constant 0 : index
    %68 = vector.load %arg12[%67, %c0_38, %c0_39] : memref<8x8x96xf32, #tpu.memory_space<vmem>>, vector<1x8x96xf32>
    %69 = vector.shape_cast %68 : vector<1x8x96xf32> to vector<8x96xf32>
    %70 = vector.shape_cast %66 : vector<8x96xf32> to vector<1x8x96xf32>
    tpu.vector_store %arg12[%67, %c0_38, %c0_39], %70 {strides = array<i32>} : memref<8x8x96xf32, #tpu.memory_space<vmem>>, vector<1x8x96xf32>,
    %c4_i32 = arith.constant 4 : i32
    %71 = arith.index_cast %c4_i32 : i32 to index
    %c0_40 = arith.constant 0 : index
    %c0_41 = arith.constant 0 : index
    %72 = vector.load %arg1[%71, %c0_40, %c0_41] : memref<8x8x32xbf16, #tpu.memory_space<vmem>>, vector<1x8x32xbf16>
    %73 = vector.shape_cast %72 : vector<1x8x32xbf16> to vector<8x32xbf16>
    %cst_42 = arith.constant dense<0.000000e+00> : vector<8x192xf32>
    %74 = tpu.matmul %73, %0, %cst_42 {dimension_numbers = #tpu.dot_dimension_numbers<[1], [0], [0], [1], [0, 0, 1, 1], [], []>} : vector<8x32xbf16>, vector<32x192xbf16>, vector<8x192xf32> -> vector<8x192xf32>
    %75 = vector.broadcast %1 : vector<1x192xf32> to vector<8x192xf32>
    %76 = arith.addf %74, %75 : vector<8x192xf32>
    %77 = vector.extract_strided_slice %76 {offsets = [0, 0], sizes = [8, 96], strides = [1, 1]} : vector<8x192xf32> to vector<8x96xf32>
    %78 = arith.index_cast %c4_i32 : i32 to index
    %c0_43 = arith.constant 0 : index
    %c0_44 = arith.constant 0 : index
    %79 = vector.load %arg11[%78, %c0_43, %c0_44] : memref<8x8x96xf32, #tpu.memory_space<vmem>>, vector<1x8x96xf32>
    %80 = vector.shape_cast %79 : vector<1x8x96xf32> to vector<8x96xf32>
    %81 = vector.shape_cast %77 : vector<8x96xf32> to vector<1x8x96xf32>
    tpu.vector_store %arg11[%78, %c0_43, %c0_44], %81 {strides = array<i32>} : memref<8x8x96xf32, #tpu.memory_space<vmem>>, vector<1x8x96xf32>,
    %82 = vector.extract_strided_slice %76 {offsets = [0, 96], sizes = [8, 96], strides = [1, 1]} : vector<8x192xf32> to vector<8x96xf32>
    %83 = arith.index_cast %c4_i32 : i32 to index
    %c0_45 = arith.constant 0 : index
    %c0_46 = arith.constant 0 : index
    %84 = vector.load %arg12[%83, %c0_45, %c0_46] : memref<8x8x96xf32, #tpu.memory_space<vmem>>, vector<1x8x96xf32>
    %85 = vector.shape_cast %84 : vector<1x8x96xf32> to vector<8x96xf32>
    %86 = vector.shape_cast %82 : vector<8x96xf32> to vector<1x8x96xf32>
    tpu.vector_store %arg12[%83, %c0_45, %c0_46], %86 {strides = array<i32>} : memref<8x8x96xf32, #tpu.memory_space<vmem>>, vector<1x8x96xf32>,
    %c5_i32 = arith.constant 5 : i32
    %87 = arith.index_cast %c5_i32 : i32 to index
    %c0_47 = arith.constant 0 : index
    %c0_48 = arith.constant 0 : index
    %88 = vector.load %arg1[%87, %c0_47, %c0_48] : memref<8x8x32xbf16, #tpu.memory_space<vmem>>, vector<1x8x32xbf16>
    %89 = vector.shape_cast %88 : vector<1x8x32xbf16> to vector<8x32xbf16>
    %cst_49 = arith.constant dense<0.000000e+00> : vector<8x192xf32>
    %90 = tpu.matmul %89, %0, %cst_49 {dimension_numbers = #tpu.dot_dimension_numbers<[1], [0], [0], [1], [0, 0, 1, 1], [], []>} : vector<8x32xbf16>, vector<32x192xbf16>, vector<8x192xf32> -> vector<8x192xf32>
    %91 = vector.broadcast %1 : vector<1x192xf32> to vector<8x192xf32>
    %92 = arith.addf %90, %91 : vector<8x192xf32>
    %93 = vector.extract_strided_slice %92 {offsets = [0, 0], sizes = [8, 96], strides = [1, 1]} : vector<8x192xf32> to vector<8x96xf32>
    %94 = arith.index_cast %c5_i32 : i32 to index
    %c0_50 = arith.constant 0 : index
    %c0_51 = arith.constant 0 : index
    %95 = vector.load %arg11[%94, %c0_50, %c0_51] : memref<8x8x96xf32, #tpu.memory_space<vmem>>, vector<1x8x96xf32>
    %96 = vector.shape_cast %95 : vector<1x8x96xf32> to vector<8x96xf32>
    %97 = vector.shape_cast %93 : vector<8x96xf32> to vector<1x8x96xf32>
    tpu.vector_store %arg11[%94, %c0_50, %c0_51], %97 {strides = array<i32>} : memref<8x8x96xf32, #tpu.memory_space<vmem>>, vector<1x8x96xf32>,
    %98 = vector.extract_strided_slice %92 {offsets = [0, 96], sizes = [8, 96], strides = [1, 1]} : vector<8x192xf32> to vector<8x96xf32>
    %99 = arith.index_cast %c5_i32 : i32 to index
    %c0_52 = arith.constant 0 : index
    %c0_53 = arith.constant 0 : index
    %100 = vector.load %arg12[%99, %c0_52, %c0_53] : memref<8x8x96xf32, #tpu.memory_space<vmem>>, vector<1x8x96xf32>
    %101 = vector.shape_cast %100 : vector<1x8x96xf32> to vector<8x96xf32>
    %102 = vector.shape_cast %98 : vector<8x96xf32> to vector<1x8x96xf32>
    tpu.vector_store %arg12[%99, %c0_52, %c0_53], %102 {strides = array<i32>} : memref<8x8x96xf32, #tpu.memory_space<vmem>>, vector<1x8x96xf32>,
    %c6_i32 = arith.constant 6 : i32
    %103 = arith.index_cast %c6_i32 : i32 to index
    %c0_54 = arith.constant 0 : index
    %c0_55 = arith.constant 0 : index
    %104 = vector.load %arg1[%103, %c0_54, %c0_55] : memref<8x8x32xbf16, #tpu.memory_space<vmem>>, vector<1x8x32xbf16>
    %105 = vector.shape_cast %104 : vector<1x8x32xbf16> to vector<8x32xbf16>
    %cst_56 = arith.constant dense<0.000000e+00> : vector<8x192xf32>
    %106 = tpu.matmul %105, %0, %cst_56 {dimension_numbers = #tpu.dot_dimension_numbers<[1], [0], [0], [1], [0, 0, 1, 1], [], []>} : vector<8x32xbf16>, vector<32x192xbf16>, vector<8x192xf32> -> vector<8x192xf32>
    %107 = vector.broadcast %1 : vector<1x192xf32> to vector<8x192xf32>
    %108 = arith.addf %106, %107 : vector<8x192xf32>
    %109 = vector.extract_strided_slice %108 {offsets = [0, 0], sizes = [8, 96], strides = [1, 1]} : vector<8x192xf32> to vector<8x96xf32>
    %110 = arith.index_cast %c6_i32 : i32 to index
    %c0_57 = arith.constant 0 : index
    %c0_58 = arith.constant 0 : index
    %111 = vector.load %arg11[%110, %c0_57, %c0_58] : memref<8x8x96xf32, #tpu.memory_space<vmem>>, vector<1x8x96xf32>
    %112 = vector.shape_cast %111 : vector<1x8x96xf32> to vector<8x96xf32>
    %113 = vector.shape_cast %109 : vector<8x96xf32> to vector<1x8x96xf32>
    tpu.vector_store %arg11[%110, %c0_57, %c0_58], %113 {strides = array<i32>} : memref<8x8x96xf32, #tpu.memory_space<vmem>>, vector<1x8x96xf32>,
    %114 = vector.extract_strided_slice %108 {offsets = [0, 96], sizes = [8, 96], strides = [1, 1]} : vector<8x192xf32> to vector<8x96xf32>
    %115 = arith.index_cast %c6_i32 : i32 to index
    %c0_59 = arith.constant 0 : index
    %c0_60 = arith.constant 0 : index
    %116 = vector.load %arg12[%115, %c0_59, %c0_60] : memref<8x8x96xf32, #tpu.memory_space<vmem>>, vector<1x8x96xf32>
    %117 = vector.shape_cast %116 : vector<1x8x96xf32> to vector<8x96xf32>
    %118 = vector.shape_cast %114 : vector<8x96xf32> to vector<1x8x96xf32>
    tpu.vector_store %arg12[%115, %c0_59, %c0_60], %118 {strides = array<i32>} : memref<8x8x96xf32, #tpu.memory_space<vmem>>, vector<1x8x96xf32>,
    %c7_i32 = arith.constant 7 : i32
    %119 = arith.index_cast %c7_i32 : i32 to index
    %c0_61 = arith.constant 0 : index
    %c0_62 = arith.constant 0 : index
    %120 = vector.load %arg1[%119, %c0_61, %c0_62] : memref<8x8x32xbf16, #tpu.memory_space<vmem>>, vector<1x8x32xbf16>
    %121 = vector.shape_cast %120 : vector<1x8x32xbf16> to vector<8x32xbf16>
    %cst_63 = arith.constant dense<0.000000e+00> : vector<8x192xf32>
    %122 = tpu.matmul %121, %0, %cst_63 {dimension_numbers = #tpu.dot_dimension_numbers<[1], [0], [0], [1], [0, 0, 1, 1], [], []>} : vector<8x32xbf16>, vector<32x192xbf16>, vector<8x192xf32> -> vector<8x192xf32>
    %123 = vector.broadcast %1 : vector<1x192xf32> to vector<8x192xf32>
    %124 = arith.addf %122, %123 : vector<8x192xf32>
    %125 = vector.extract_strided_slice %124 {offsets = [0, 0], sizes = [8, 96], strides = [1, 1]} : vector<8x192xf32> to vector<8x96xf32>
    %126 = arith.index_cast %c7_i32 : i32 to index
    %c0_64 = arith.constant 0 : index
    %c0_65 = arith.constant 0 : index
    %127 = vector.load %arg11[%126, %c0_64, %c0_65] : memref<8x8x96xf32, #tpu.memory_space<vmem>>, vector<1x8x96xf32>
    %128 = vector.shape_cast %127 : vector<1x8x96xf32> to vector<8x96xf32>
    %129 = vector.shape_cast %125 : vector<8x96xf32> to vector<1x8x96xf32>
    tpu.vector_store %arg11[%126, %c0_64, %c0_65], %129 {strides = array<i32>} : memref<8x8x96xf32, #tpu.memory_space<vmem>>, vector<1x8x96xf32>,
    %130 = vector.extract_strided_slice %124 {offsets = [0, 96], sizes = [8, 96], strides = [1, 1]} : vector<8x192xf32> to vector<8x96xf32>
    %131 = arith.index_cast %c7_i32 : i32 to index
    %c0_66 = arith.constant 0 : index
    %c0_67 = arith.constant 0 : index
    %132 = vector.load %arg12[%131, %c0_66, %c0_67] : memref<8x8x96xf32, #tpu.memory_space<vmem>>, vector<1x8x96xf32>
    %133 = vector.shape_cast %132 : vector<1x8x96xf32> to vector<8x96xf32>
    %134 = vector.shape_cast %130 : vector<8x96xf32> to vector<1x8x96xf32>
    tpu.vector_store %arg12[%131, %c0_66, %c0_67], %134 {strides = array<i32>} : memref<8x8x96xf32, #tpu.memory_space<vmem>>, vector<1x8x96xf32>,
    %c8_i32 = arith.constant 8 : i32
    %cst_68 = arith.constant 0.000000e+00 : f32
    %135 = vector.broadcast %cst_68 : f32 to vector<8x32xf32>
    %c0_i32_69 = arith.constant 0 : i32
    %136 = vector.broadcast %c0_i32_69 : i32 to vector<8x1xi32>
    %137 = arith.cmpi slt, %136, %6 : vector<8x1xi32>
    %138 = arith.extui %137 : vector<8x1xi1> to vector<8x1xi32>
    %139 = arith.sitofp %138 : vector<8x1xi32> to vector<8x1xf32>
    %140 = arith.index_cast %c0_i32_69 : i32 to index
    %c0_70 = arith.constant 0 : index
    %c0_71 = arith.constant 0 : index
    %141 = vector.load %arg11[%140, %c0_70, %c0_71] : memref<8x8x96xf32, #tpu.memory_space<vmem>>, vector<1x8x96xf32>
    %142 = vector.shape_cast %141 : vector<1x8x96xf32> to vector<8x96xf32>
    %143 = arith.truncf %135 : vector<8x32xf32> to vector<8x32xbf16>
    %cst_72 = arith.constant dense<0.000000e+00> : vector<8x96xf32>
    %144 = tpu.matmul %143, %2, %cst_72 {dimension_numbers = #tpu.dot_dimension_numbers<[1], [0], [0], [1], [0, 0, 1, 1], [], []>} : vector<8x32xbf16>, vector<32x96xbf16>, vector<8x96xf32> -> vector<8x96xf32>
    %145 = vector.extract_strided_slice %142 {offsets = [0, 0], sizes = [8, 32], strides = [1, 1]} : vector<8x96xf32> to vector<8x32xf32>
    %146 = vector.extract_strided_slice %144 {offsets = [0, 0], sizes = [8, 32], strides = [1, 1]} : vector<8x96xf32> to vector<8x32xf32>
    %147 = arith.addf %145, %146 : vector<8x32xf32>
    %148 = arith.negf %147 : vector<8x32xf32>
    %149 = math.exp %148 : vector<8x32xf32>
    %cst_73 = arith.constant 1.000000e+00 : f32
    %150 = vector.broadcast %cst_73 : f32 to vector<8x32xf32>
    %151 = arith.addf %150, %149 : vector<8x32xf32>
    %152 = arith.divf %150, %151 : vector<8x32xf32>
    %153 = vector.extract_strided_slice %142 {offsets = [0, 32], sizes = [8, 32], strides = [1, 1]} : vector<8x96xf32> to vector<8x32xf32>
    %154 = vector.extract_strided_slice %144 {offsets = [0, 32], sizes = [8, 32], strides = [1, 1]} : vector<8x96xf32> to vector<8x32xf32>
    %155 = arith.addf %153, %154 : vector<8x32xf32>
    %156 = arith.negf %155 : vector<8x32xf32>
    %157 = math.exp %156 : vector<8x32xf32>
    %cst_74 = arith.constant 1.000000e+00 : f32
    %158 = vector.broadcast %cst_74 : f32 to vector<8x32xf32>
    %159 = arith.addf %158, %157 : vector<8x32xf32>
    %160 = arith.divf %158, %159 : vector<8x32xf32>
    %161 = vector.extract_strided_slice %142 {offsets = [0, 64], sizes = [8, 32], strides = [1, 1]} : vector<8x96xf32> to vector<8x32xf32>
    %162 = vector.extract_strided_slice %144 {offsets = [0, 64], sizes = [8, 32], strides = [1, 1]} : vector<8x96xf32> to vector<8x32xf32>
    %163 = vector.broadcast %4 : vector<1x32xf32> to vector<8x32xf32>
    %164 = arith.addf %162, %163 : vector<8x32xf32>
    %165 = arith.mulf %152, %164 : vector<8x32xf32>
    %166 = arith.addf %161, %165 : vector<8x32xf32>
    %167 = math.tanh %166 : vector<8x32xf32>
    %cst_75 = arith.constant 1.000000e+00 : f32
    %168 = vector.broadcast %cst_75 : f32 to vector<8x32xf32>
    %169 = arith.subf %168, %160 : vector<8x32xf32>
    %170 = arith.mulf %169, %167 : vector<8x32xf32>
    %171 = arith.mulf %160, %135 : vector<8x32xf32>
    %172 = arith.addf %170, %171 : vector<8x32xf32>
    %173 = vector.broadcast %139 : vector<8x1xf32> to vector<8x32xf32>
    %174 = arith.mulf %173, %172 : vector<8x32xf32>
    %cst_76 = arith.constant 1.000000e+00 : f32
    %175 = vector.broadcast %cst_76 : f32 to vector<8x1xf32>
    %176 = arith.subf %175, %139 : vector<8x1xf32>
    %177 = vector.broadcast %176 : vector<8x1xf32> to vector<8x32xf32>
    %178 = arith.mulf %177, %135 : vector<8x32xf32>
    %179 = arith.addf %174, %178 : vector<8x32xf32>
    %180 = vector.broadcast %139 : vector<8x1xf32> to vector<8x32xf32>
    %181 = arith.mulf %180, %179 : vector<8x32xf32>
    %182 = arith.index_cast %c0_i32_69 : i32 to index
    %c0_77 = arith.constant 0 : index
    %c0_78 = arith.constant 0 : index
    %183 = vector.load %arg9[%182, %c0_77, %c0_78] : memref<8x8x32xf32, #tpu.memory_space<vmem>>, vector<1x8x32xf32>
    %184 = vector.shape_cast %183 : vector<1x8x32xf32> to vector<8x32xf32>
    %185 = vector.shape_cast %181 : vector<8x32xf32> to vector<1x8x32xf32>
    tpu.vector_store %arg9[%182, %c0_77, %c0_78], %185 {strides = array<i32>} : memref<8x8x32xf32, #tpu.memory_space<vmem>>, vector<1x8x32xf32>,
    %c1_i32_79 = arith.constant 1 : i32
    %186 = vector.broadcast %c1_i32_79 : i32 to vector<8x1xi32>
    %187 = arith.cmpi slt, %186, %6 : vector<8x1xi32>
    %188 = arith.extui %187 : vector<8x1xi1> to vector<8x1xi32>
    %189 = arith.sitofp %188 : vector<8x1xi32> to vector<8x1xf32>
    %190 = arith.index_cast %c1_i32_79 : i32 to index
    %c0_80 = arith.constant 0 : index
    %c0_81 = arith.constant 0 : index
    %191 = vector.load %arg11[%190, %c0_80, %c0_81] : memref<8x8x96xf32, #tpu.memory_space<vmem>>, vector<1x8x96xf32>
    %192 = vector.shape_cast %191 : vector<1x8x96xf32> to vector<8x96xf32>
    %193 = arith.truncf %179 : vector<8x32xf32> to vector<8x32xbf16>
    %cst_82 = arith.constant dense<0.000000e+00> : vector<8x96xf32>
    %194 = tpu.matmul %193, %2, %cst_82 {dimension_numbers = #tpu.dot_dimension_numbers<[1], [0], [0], [1], [0, 0, 1, 1], [], []>} : vector<8x32xbf16>, vector<32x96xbf16>, vector<8x96xf32> -> vector<8x96xf32>
    %195 = vector.extract_strided_slice %192 {offsets = [0, 0], sizes = [8, 32], strides = [1, 1]} : vector<8x96xf32> to vector<8x32xf32>
    %196 = vector.extract_strided_slice %194 {offsets = [0, 0], sizes = [8, 32], strides = [1, 1]} : vector<8x96xf32> to vector<8x32xf32>
    %197 = arith.addf %195, %196 : vector<8x32xf32>
    %198 = arith.negf %197 : vector<8x32xf32>
    %199 = math.exp %198 : vector<8x32xf32>
    %cst_83 = arith.constant 1.000000e+00 : f32
    %200 = vector.broadcast %cst_83 : f32 to vector<8x32xf32>
    %201 = arith.addf %200, %199 : vector<8x32xf32>
    %202 = arith.divf %200, %201 : vector<8x32xf32>
    %203 = vector.extract_strided_slice %192 {offsets = [0, 32], sizes = [8, 32], strides = [1, 1]} : vector<8x96xf32> to vector<8x32xf32>
    %204 = vector.extract_strided_slice %194 {offsets = [0, 32], sizes = [8, 32], strides = [1, 1]} : vector<8x96xf32> to vector<8x32xf32>
    %205 = arith.addf %203, %204 : vector<8x32xf32>
    %206 = arith.negf %205 : vector<8x32xf32>
    %207 = math.exp %206 : vector<8x32xf32>
    %cst_84 = arith.constant 1.000000e+00 : f32
    %208 = vector.broadcast %cst_84 : f32 to vector<8x32xf32>
    %209 = arith.addf %208, %207 : vector<8x32xf32>
    %210 = arith.divf %208, %209 : vector<8x32xf32>
    %211 = vector.extract_strided_slice %192 {offsets = [0, 64], sizes = [8, 32], strides = [1, 1]} : vector<8x96xf32> to vector<8x32xf32>
    %212 = vector.extract_strided_slice %194 {offsets = [0, 64], sizes = [8, 32], strides = [1, 1]} : vector<8x96xf32> to vector<8x32xf32>
    %213 = vector.broadcast %4 : vector<1x32xf32> to vector<8x32xf32>
    %214 = arith.addf %212, %213 : vector<8x32xf32>
    %215 = arith.mulf %202, %214 : vector<8x32xf32>
    %216 = arith.addf %211, %215 : vector<8x32xf32>
    %217 = math.tanh %216 : vector<8x32xf32>
    %cst_85 = arith.constant 1.000000e+00 : f32
    %218 = vector.broadcast %cst_85 : f32 to vector<8x32xf32>
    %219 = arith.subf %218, %210 : vector<8x32xf32>
    %220 = arith.mulf %219, %217 : vector<8x32xf32>
    %221 = arith.mulf %210, %179 : vector<8x32xf32>
    %222 = arith.addf %220, %221 : vector<8x32xf32>
    %223 = vector.broadcast %189 : vector<8x1xf32> to vector<8x32xf32>
    %224 = arith.mulf %223, %222 : vector<8x32xf32>
    %cst_86 = arith.constant 1.000000e+00 : f32
    %225 = vector.broadcast %cst_86 : f32 to vector<8x1xf32>
    %226 = arith.subf %225, %189 : vector<8x1xf32>
    %227 = vector.broadcast %226 : vector<8x1xf32> to vector<8x32xf32>
    %228 = arith.mulf %227, %179 : vector<8x32xf32>
    %229 = arith.addf %224, %228 : vector<8x32xf32>
    %230 = vector.broadcast %189 : vector<8x1xf32> to vector<8x32xf32>
    %231 = arith.mulf %230, %229 : vector<8x32xf32>
    %232 = arith.index_cast %c1_i32_79 : i32 to index
    %c0_87 = arith.constant 0 : index
    %c0_88 = arith.constant 0 : index
    %233 = vector.load %arg9[%232, %c0_87, %c0_88] : memref<8x8x32xf32, #tpu.memory_space<vmem>>, vector<1x8x32xf32>
    %234 = vector.shape_cast %233 : vector<1x8x32xf32> to vector<8x32xf32>
    %235 = vector.shape_cast %231 : vector<8x32xf32> to vector<1x8x32xf32>
    tpu.vector_store %arg9[%232, %c0_87, %c0_88], %235 {strides = array<i32>} : memref<8x8x32xf32, #tpu.memory_space<vmem>>, vector<1x8x32xf32>,
    %c2_i32_89 = arith.constant 2 : i32
    %236 = vector.broadcast %c2_i32_89 : i32 to vector<8x1xi32>
    %237 = arith.cmpi slt, %236, %6 : vector<8x1xi32>
    %238 = arith.extui %237 : vector<8x1xi1> to vector<8x1xi32>
    %239 = arith.sitofp %238 : vector<8x1xi32> to vector<8x1xf32>
    %240 = arith.index_cast %c2_i32_89 : i32 to index
    %c0_90 = arith.constant 0 : index
    %c0_91 = arith.constant 0 : index
    %241 = vector.load %arg11[%240, %c0_90, %c0_91] : memref<8x8x96xf32, #tpu.memory_space<vmem>>, vector<1x8x96xf32>
    %242 = vector.shape_cast %241 : vector<1x8x96xf32> to vector<8x96xf32>
    %243 = arith.truncf %229 : vector<8x32xf32> to vector<8x32xbf16>
    %cst_92 = arith.constant dense<0.000000e+00> : vector<8x96xf32>
    %244 = tpu.matmul %243, %2, %cst_92 {dimension_numbers = #tpu.dot_dimension_numbers<[1], [0], [0], [1], [0, 0, 1, 1], [], []>} : vector<8x32xbf16>, vector<32x96xbf16>, vector<8x96xf32> -> vector<8x96xf32>
    %245 = vector.extract_strided_slice %242 {offsets = [0, 0], sizes = [8, 32], strides = [1, 1]} : vector<8x96xf32> to vector<8x32xf32>
    %246 = vector.extract_strided_slice %244 {offsets = [0, 0], sizes = [8, 32], strides = [1, 1]} : vector<8x96xf32> to vector<8x32xf32>
    %247 = arith.addf %245, %246 : vector<8x32xf32>
    %248 = arith.negf %247 : vector<8x32xf32>
    %249 = math.exp %248 : vector<8x32xf32>
    %cst_93 = arith.constant 1.000000e+00 : f32
    %250 = vector.broadcast %cst_93 : f32 to vector<8x32xf32>
    %251 = arith.addf %250, %249 : vector<8x32xf32>
    %252 = arith.divf %250, %251 : vector<8x32xf32>
    %253 = vector.extract_strided_slice %242 {offsets = [0, 32], sizes = [8, 32], strides = [1, 1]} : vector<8x96xf32> to vector<8x32xf32>
    %254 = vector.extract_strided_slice %244 {offsets = [0, 32], sizes = [8, 32], strides = [1, 1]} : vector<8x96xf32> to vector<8x32xf32>
    %255 = arith.addf %253, %254 : vector<8x32xf32>
    %256 = arith.negf %255 : vector<8x32xf32>
    %257 = math.exp %256 : vector<8x32xf32>
    %cst_94 = arith.constant 1.000000e+00 : f32
    %258 = vector.broadcast %cst_94 : f32 to vector<8x32xf32>
    %259 = arith.addf %258, %257 : vector<8x32xf32>
    %260 = arith.divf %258, %259 : vector<8x32xf32>
    %261 = vector.extract_strided_slice %242 {offsets = [0, 64], sizes = [8, 32], strides = [1, 1]} : vector<8x96xf32> to vector<8x32xf32>
    %262 = vector.extract_strided_slice %244 {offsets = [0, 64], sizes = [8, 32], strides = [1, 1]} : vector<8x96xf32> to vector<8x32xf32>
    %263 = vector.broadcast %4 : vector<1x32xf32> to vector<8x32xf32>
    %264 = arith.addf %262, %263 : vector<8x32xf32>
    %265 = arith.mulf %252, %264 : vector<8x32xf32>
    %266 = arith.addf %261, %265 : vector<8x32xf32>
    %267 = math.tanh %266 : vector<8x32xf32>
    %cst_95 = arith.constant 1.000000e+00 : f32
    %268 = vector.broadcast %cst_95 : f32 to vector<8x32xf32>
    %269 = arith.subf %268, %260 : vector<8x32xf32>
    %270 = arith.mulf %269, %267 : vector<8x32xf32>
    %271 = arith.mulf %260, %229 : vector<8x32xf32>
    %272 = arith.addf %270, %271 : vector<8x32xf32>
    %273 = vector.broadcast %239 : vector<8x1xf32> to vector<8x32xf32>
    %274 = arith.mulf %273, %272 : vector<8x32xf32>
    %cst_96 = arith.constant 1.000000e+00 : f32
    %275 = vector.broadcast %cst_96 : f32 to vector<8x1xf32>
    %276 = arith.subf %275, %239 : vector<8x1xf32>
    %277 = vector.broadcast %276 : vector<8x1xf32> to vector<8x32xf32>
    %278 = arith.mulf %277, %229 : vector<8x32xf32>
    %279 = arith.addf %274, %278 : vector<8x32xf32>
    %280 = vector.broadcast %239 : vector<8x1xf32> to vector<8x32xf32>
    %281 = arith.mulf %280, %279 : vector<8x32xf32>
    %282 = arith.index_cast %c2_i32_89 : i32 to index
    %c0_97 = arith.constant 0 : index
    %c0_98 = arith.constant 0 : index
    %283 = vector.load %arg9[%282, %c0_97, %c0_98] : memref<8x8x32xf32, #tpu.memory_space<vmem>>, vector<1x8x32xf32>
    %284 = vector.shape_cast %283 : vector<1x8x32xf32> to vector<8x32xf32>
    %285 = vector.shape_cast %281 : vector<8x32xf32> to vector<1x8x32xf32>
    tpu.vector_store %arg9[%282, %c0_97, %c0_98], %285 {strides = array<i32>} : memref<8x8x32xf32, #tpu.memory_space<vmem>>, vector<1x8x32xf32>,
    %c3_i32_99 = arith.constant 3 : i32
    %286 = vector.broadcast %c3_i32_99 : i32 to vector<8x1xi32>
    %287 = arith.cmpi slt, %286, %6 : vector<8x1xi32>
    %288 = arith.extui %287 : vector<8x1xi1> to vector<8x1xi32>
    %289 = arith.sitofp %288 : vector<8x1xi32> to vector<8x1xf32>
    %290 = arith.index_cast %c3_i32_99 : i32 to index
    %c0_100 = arith.constant 0 : index
    %c0_101 = arith.constant 0 : index
    %291 = vector.load %arg11[%290, %c0_100, %c0_101] : memref<8x8x96xf32, #tpu.memory_space<vmem>>, vector<1x8x96xf32>
    %292 = vector.shape_cast %291 : vector<1x8x96xf32> to vector<8x96xf32>
    %293 = arith.truncf %279 : vector<8x32xf32> to vector<8x32xbf16>
    %cst_102 = arith.constant dense<0.000000e+00> : vector<8x96xf32>
    %294 = tpu.matmul %293, %2, %cst_102 {dimension_numbers = #tpu.dot_dimension_numbers<[1], [0], [0], [1], [0, 0, 1, 1], [], []>} : vector<8x32xbf16>, vector<32x96xbf16>, vector<8x96xf32> -> vector<8x96xf32>
    %295 = vector.extract_strided_slice %292 {offsets = [0, 0], sizes = [8, 32], strides = [1, 1]} : vector<8x96xf32> to vector<8x32xf32>
    %296 = vector.extract_strided_slice %294 {offsets = [0, 0], sizes = [8, 32], strides = [1, 1]} : vector<8x96xf32> to vector<8x32xf32>
    %297 = arith.addf %295, %296 : vector<8x32xf32>
    %298 = arith.negf %297 : vector<8x32xf32>
    %299 = math.exp %298 : vector<8x32xf32>
    %cst_103 = arith.constant 1.000000e+00 : f32
    %300 = vector.broadcast %cst_103 : f32 to vector<8x32xf32>
    %301 = arith.addf %300, %299 : vector<8x32xf32>
    %302 = arith.divf %300, %301 : vector<8x32xf32>
    %303 = vector.extract_strided_slice %292 {offsets = [0, 32], sizes = [8, 32], strides = [1, 1]} : vector<8x96xf32> to vector<8x32xf32>
    %304 = vector.extract_strided_slice %294 {offsets = [0, 32], sizes = [8, 32], strides = [1, 1]} : vector<8x96xf32> to vector<8x32xf32>
    %305 = arith.addf %303, %304 : vector<8x32xf32>
    %306 = arith.negf %305 : vector<8x32xf32>
    %307 = math.exp %306 : vector<8x32xf32>
    %cst_104 = arith.constant 1.000000e+00 : f32
    %308 = vector.broadcast %cst_104 : f32 to vector<8x32xf32>
    %309 = arith.addf %308, %307 : vector<8x32xf32>
    %310 = arith.divf %308, %309 : vector<8x32xf32>
    %311 = vector.extract_strided_slice %292 {offsets = [0, 64], sizes = [8, 32], strides = [1, 1]} : vector<8x96xf32> to vector<8x32xf32>
    %312 = vector.extract_strided_slice %294 {offsets = [0, 64], sizes = [8, 32], strides = [1, 1]} : vector<8x96xf32> to vector<8x32xf32>
    %313 = vector.broadcast %4 : vector<1x32xf32> to vector<8x32xf32>
    %314 = arith.addf %312, %313 : vector<8x32xf32>
    %315 = arith.mulf %302, %314 : vector<8x32xf32>
    %316 = arith.addf %311, %315 : vector<8x32xf32>
    %317 = math.tanh %316 : vector<8x32xf32>
    %cst_105 = arith.constant 1.000000e+00 : f32
    %318 = vector.broadcast %cst_105 : f32 to vector<8x32xf32>
    %319 = arith.subf %318, %310 : vector<8x32xf32>
    %320 = arith.mulf %319, %317 : vector<8x32xf32>
    %321 = arith.mulf %310, %279 : vector<8x32xf32>
    %322 = arith.addf %320, %321 : vector<8x32xf32>
    %323 = vector.broadcast %289 : vector<8x1xf32> to vector<8x32xf32>
    %324 = arith.mulf %323, %322 : vector<8x32xf32>
    %cst_106 = arith.constant 1.000000e+00 : f32
    %325 = vector.broadcast %cst_106 : f32 to vector<8x1xf32>
    %326 = arith.subf %325, %289 : vector<8x1xf32>
    %327 = vector.broadcast %326 : vector<8x1xf32> to vector<8x32xf32>
    %328 = arith.mulf %327, %279 : vector<8x32xf32>
    %329 = arith.addf %324, %328 : vector<8x32xf32>
    %330 = vector.broadcast %289 : vector<8x1xf32> to vector<8x32xf32>
    %331 = arith.mulf %330, %329 : vector<8x32xf32>
    %332 = arith.index_cast %c3_i32_99 : i32 to index
    %c0_107 = arith.constant 0 : index
    %c0_108 = arith.constant 0 : index
    %333 = vector.load %arg9[%332, %c0_107, %c0_108] : memref<8x8x32xf32, #tpu.memory_space<vmem>>, vector<1x8x32xf32>
    %334 = vector.shape_cast %333 : vector<1x8x32xf32> to vector<8x32xf32>
    %335 = vector.shape_cast %331 : vector<8x32xf32> to vector<1x8x32xf32>
    tpu.vector_store %arg9[%332, %c0_107, %c0_108], %335 {strides = array<i32>} : memref<8x8x32xf32, #tpu.memory_space<vmem>>, vector<1x8x32xf32>,
    %c4_i32_109 = arith.constant 4 : i32
    %336 = vector.broadcast %c4_i32_109 : i32 to vector<8x1xi32>
    %337 = arith.cmpi slt, %336, %6 : vector<8x1xi32>
    %338 = arith.extui %337 : vector<8x1xi1> to vector<8x1xi32>
    %339 = arith.sitofp %338 : vector<8x1xi32> to vector<8x1xf32>
    %340 = arith.index_cast %c4_i32_109 : i32 to index
    %c0_110 = arith.constant 0 : index
    %c0_111 = arith.constant 0 : index
    %341 = vector.load %arg11[%340, %c0_110, %c0_111] : memref<8x8x96xf32, #tpu.memory_space<vmem>>, vector<1x8x96xf32>
    %342 = vector.shape_cast %341 : vector<1x8x96xf32> to vector<8x96xf32>
    %343 = arith.truncf %329 : vector<8x32xf32> to vector<8x32xbf16>
    %cst_112 = arith.constant dense<0.000000e+00> : vector<8x96xf32>
    %344 = tpu.matmul %343, %2, %cst_112 {dimension_numbers = #tpu.dot_dimension_numbers<[1], [0], [0], [1], [0, 0, 1, 1], [], []>} : vector<8x32xbf16>, vector<32x96xbf16>, vector<8x96xf32> -> vector<8x96xf32>
    %345 = vector.extract_strided_slice %342 {offsets = [0, 0], sizes = [8, 32], strides = [1, 1]} : vector<8x96xf32> to vector<8x32xf32>
    %346 = vector.extract_strided_slice %344 {offsets = [0, 0], sizes = [8, 32], strides = [1, 1]} : vector<8x96xf32> to vector<8x32xf32>
    %347 = arith.addf %345, %346 : vector<8x32xf32>
    %348 = arith.negf %347 : vector<8x32xf32>
    %349 = math.exp %348 : vector<8x32xf32>
    %cst_113 = arith.constant 1.000000e+00 : f32
    %350 = vector.broadcast %cst_113 : f32 to vector<8x32xf32>
    %351 = arith.addf %350, %349 : vector<8x32xf32>
    %352 = arith.divf %350, %351 : vector<8x32xf32>
    %353 = vector.extract_strided_slice %342 {offsets = [0, 32], sizes = [8, 32], strides = [1, 1]} : vector<8x96xf32> to vector<8x32xf32>
    %354 = vector.extract_strided_slice %344 {offsets = [0, 32], sizes = [8, 32], strides = [1, 1]} : vector<8x96xf32> to vector<8x32xf32>
    %355 = arith.addf %353, %354 : vector<8x32xf32>
    %356 = arith.negf %355 : vector<8x32xf32>
    %357 = math.exp %356 : vector<8x32xf32>
    %cst_114 = arith.constant 1.000000e+00 : f32
    %358 = vector.broadcast %cst_114 : f32 to vector<8x32xf32>
    %359 = arith.addf %358, %357 : vector<8x32xf32>
    %360 = arith.divf %358, %359 : vector<8x32xf32>
    %361 = vector.extract_strided_slice %342 {offsets = [0, 64], sizes = [8, 32], strides = [1, 1]} : vector<8x96xf32> to vector<8x32xf32>
    %362 = vector.extract_strided_slice %344 {offsets = [0, 64], sizes = [8, 32], strides = [1, 1]} : vector<8x96xf32> to vector<8x32xf32>
    %363 = vector.broadcast %4 : vector<1x32xf32> to vector<8x32xf32>
    %364 = arith.addf %362, %363 : vector<8x32xf32>
    %365 = arith.mulf %352, %364 : vector<8x32xf32>
    %366 = arith.addf %361, %365 : vector<8x32xf32>
    %367 = math.tanh %366 : vector<8x32xf32>
    %cst_115 = arith.constant 1.000000e+00 : f32
    %368 = vector.broadcast %cst_115 : f32 to vector<8x32xf32>
    %369 = arith.subf %368, %360 : vector<8x32xf32>
    %370 = arith.mulf %369, %367 : vector<8x32xf32>
    %371 = arith.mulf %360, %329 : vector<8x32xf32>
    %372 = arith.addf %370, %371 : vector<8x32xf32>
    %373 = vector.broadcast %339 : vector<8x1xf32> to vector<8x32xf32>
    %374 = arith.mulf %373, %372 : vector<8x32xf32>
    %cst_116 = arith.constant 1.000000e+00 : f32
    %375 = vector.broadcast %cst_116 : f32 to vector<8x1xf32>
    %376 = arith.subf %375, %339 : vector<8x1xf32>
    %377 = vector.broadcast %376 : vector<8x1xf32> to vector<8x32xf32>
    %378 = arith.mulf %377, %329 : vector<8x32xf32>
    %379 = arith.addf %374, %378 : vector<8x32xf32>
    %380 = vector.broadcast %339 : vector<8x1xf32> to vector<8x32xf32>
    %381 = arith.mulf %380, %379 : vector<8x32xf32>
    %382 = arith.index_cast %c4_i32_109 : i32 to index
    %c0_117 = arith.constant 0 : index
    %c0_118 = arith.constant 0 : index
    %383 = vector.load %arg9[%382, %c0_117, %c0_118] : memref<8x8x32xf32, #tpu.memory_space<vmem>>, vector<1x8x32xf32>
    %384 = vector.shape_cast %383 : vector<1x8x32xf32> to vector<8x32xf32>
    %385 = vector.shape_cast %381 : vector<8x32xf32> to vector<1x8x32xf32>
    tpu.vector_store %arg9[%382, %c0_117, %c0_118], %385 {strides = array<i32>} : memref<8x8x32xf32, #tpu.memory_space<vmem>>, vector<1x8x32xf32>,
    %c5_i32_119 = arith.constant 5 : i32
    %386 = vector.broadcast %c5_i32_119 : i32 to vector<8x1xi32>
    %387 = arith.cmpi slt, %386, %6 : vector<8x1xi32>
    %388 = arith.extui %387 : vector<8x1xi1> to vector<8x1xi32>
    %389 = arith.sitofp %388 : vector<8x1xi32> to vector<8x1xf32>
    %390 = arith.index_cast %c5_i32_119 : i32 to index
    %c0_120 = arith.constant 0 : index
    %c0_121 = arith.constant 0 : index
    %391 = vector.load %arg11[%390, %c0_120, %c0_121] : memref<8x8x96xf32, #tpu.memory_space<vmem>>, vector<1x8x96xf32>
    %392 = vector.shape_cast %391 : vector<1x8x96xf32> to vector<8x96xf32>
    %393 = arith.truncf %379 : vector<8x32xf32> to vector<8x32xbf16>
    %cst_122 = arith.constant dense<0.000000e+00> : vector<8x96xf32>
    %394 = tpu.matmul %393, %2, %cst_122 {dimension_numbers = #tpu.dot_dimension_numbers<[1], [0], [0], [1], [0, 0, 1, 1], [], []>} : vector<8x32xbf16>, vector<32x96xbf16>, vector<8x96xf32> -> vector<8x96xf32>
    %395 = vector.extract_strided_slice %392 {offsets = [0, 0], sizes = [8, 32], strides = [1, 1]} : vector<8x96xf32> to vector<8x32xf32>
    %396 = vector.extract_strided_slice %394 {offsets = [0, 0], sizes = [8, 32], strides = [1, 1]} : vector<8x96xf32> to vector<8x32xf32>
    %397 = arith.addf %395, %396 : vector<8x32xf32>
    %398 = arith.negf %397 : vector<8x32xf32>
    %399 = math.exp %398 : vector<8x32xf32>
    %cst_123 = arith.constant 1.000000e+00 : f32
    %400 = vector.broadcast %cst_123 : f32 to vector<8x32xf32>
    %401 = arith.addf %400, %399 : vector<8x32xf32>
    %402 = arith.divf %400, %401 : vector<8x32xf32>
    %403 = vector.extract_strided_slice %392 {offsets = [0, 32], sizes = [8, 32], strides = [1, 1]} : vector<8x96xf32> to vector<8x32xf32>
    %404 = vector.extract_strided_slice %394 {offsets = [0, 32], sizes = [8, 32], strides = [1, 1]} : vector<8x96xf32> to vector<8x32xf32>
    %405 = arith.addf %403, %404 : vector<8x32xf32>
    %406 = arith.negf %405 : vector<8x32xf32>
    %407 = math.exp %406 : vector<8x32xf32>
    %cst_124 = arith.constant 1.000000e+00 : f32
    %408 = vector.broadcast %cst_124 : f32 to vector<8x32xf32>
    %409 = arith.addf %408, %407 : vector<8x32xf32>
    %410 = arith.divf %408, %409 : vector<8x32xf32>
    %411 = vector.extract_strided_slice %392 {offsets = [0, 64], sizes = [8, 32], strides = [1, 1]} : vector<8x96xf32> to vector<8x32xf32>
    %412 = vector.extract_strided_slice %394 {offsets = [0, 64], sizes = [8, 32], strides = [1, 1]} : vector<8x96xf32> to vector<8x32xf32>
    %413 = vector.broadcast %4 : vector<1x32xf32> to vector<8x32xf32>
    %414 = arith.addf %412, %413 : vector<8x32xf32>
    %415 = arith.mulf %402, %414 : vector<8x32xf32>
    %416 = arith.addf %411, %415 : vector<8x32xf32>
    %417 = math.tanh %416 : vector<8x32xf32>
    %cst_125 = arith.constant 1.000000e+00 : f32
    %418 = vector.broadcast %cst_125 : f32 to vector<8x32xf32>
    %419 = arith.subf %418, %410 : vector<8x32xf32>
    %420 = arith.mulf %419, %417 : vector<8x32xf32>
    %421 = arith.mulf %410, %379 : vector<8x32xf32>
    %422 = arith.addf %420, %421 : vector<8x32xf32>
    %423 = vector.broadcast %389 : vector<8x1xf32> to vector<8x32xf32>
    %424 = arith.mulf %423, %422 : vector<8x32xf32>
    %cst_126 = arith.constant 1.000000e+00 : f32
    %425 = vector.broadcast %cst_126 : f32 to vector<8x1xf32>
    %426 = arith.subf %425, %389 : vector<8x1xf32>
    %427 = vector.broadcast %426 : vector<8x1xf32> to vector<8x32xf32>
    %428 = arith.mulf %427, %379 : vector<8x32xf32>
    %429 = arith.addf %424, %428 : vector<8x32xf32>
    %430 = vector.broadcast %389 : vector<8x1xf32> to vector<8x32xf32>
    %431 = arith.mulf %430, %429 : vector<8x32xf32>
    %432 = arith.index_cast %c5_i32_119 : i32 to index
    %c0_127 = arith.constant 0 : index
    %c0_128 = arith.constant 0 : index
    %433 = vector.load %arg9[%432, %c0_127, %c0_128] : memref<8x8x32xf32, #tpu.memory_space<vmem>>, vector<1x8x32xf32>
    %434 = vector.shape_cast %433 : vector<1x8x32xf32> to vector<8x32xf32>
    %435 = vector.shape_cast %431 : vector<8x32xf32> to vector<1x8x32xf32>
    tpu.vector_store %arg9[%432, %c0_127, %c0_128], %435 {strides = array<i32>} : memref<8x8x32xf32, #tpu.memory_space<vmem>>, vector<1x8x32xf32>,
    %c6_i32_129 = arith.constant 6 : i32
    %436 = vector.broadcast %c6_i32_129 : i32 to vector<8x1xi32>
    %437 = arith.cmpi slt, %436, %6 : vector<8x1xi32>
    %438 = arith.extui %437 : vector<8x1xi1> to vector<8x1xi32>
    %439 = arith.sitofp %438 : vector<8x1xi32> to vector<8x1xf32>
    %440 = arith.index_cast %c6_i32_129 : i32 to index
    %c0_130 = arith.constant 0 : index
    %c0_131 = arith.constant 0 : index
    %441 = vector.load %arg11[%440, %c0_130, %c0_131] : memref<8x8x96xf32, #tpu.memory_space<vmem>>, vector<1x8x96xf32>
    %442 = vector.shape_cast %441 : vector<1x8x96xf32> to vector<8x96xf32>
    %443 = arith.truncf %429 : vector<8x32xf32> to vector<8x32xbf16>
    %cst_132 = arith.constant dense<0.000000e+00> : vector<8x96xf32>
    %444 = tpu.matmul %443, %2, %cst_132 {dimension_numbers = #tpu.dot_dimension_numbers<[1], [0], [0], [1], [0, 0, 1, 1], [], []>} : vector<8x32xbf16>, vector<32x96xbf16>, vector<8x96xf32> -> vector<8x96xf32>
    %445 = vector.extract_strided_slice %442 {offsets = [0, 0], sizes = [8, 32], strides = [1, 1]} : vector<8x96xf32> to vector<8x32xf32>
    %446 = vector.extract_strided_slice %444 {offsets = [0, 0], sizes = [8, 32], strides = [1, 1]} : vector<8x96xf32> to vector<8x32xf32>
    %447 = arith.addf %445, %446 : vector<8x32xf32>
    %448 = arith.negf %447 : vector<8x32xf32>
    %449 = math.exp %448 : vector<8x32xf32>
    %cst_133 = arith.constant 1.000000e+00 : f32
    %450 = vector.broadcast %cst_133 : f32 to vector<8x32xf32>
    %451 = arith.addf %450, %449 : vector<8x32xf32>
    %452 = arith.divf %450, %451 : vector<8x32xf32>
    %453 = vector.extract_strided_slice %442 {offsets = [0, 32], sizes = [8, 32], strides = [1, 1]} : vector<8x96xf32> to vector<8x32xf32>
    %454 = vector.extract_strided_slice %444 {offsets = [0, 32], sizes = [8, 32], strides = [1, 1]} : vector<8x96xf32> to vector<8x32xf32>
    %455 = arith.addf %453, %454 : vector<8x32xf32>
    %456 = arith.negf %455 : vector<8x32xf32>
    %457 = math.exp %456 : vector<8x32xf32>
    %cst_134 = arith.constant 1.000000e+00 : f32
    %458 = vector.broadcast %cst_134 : f32 to vector<8x32xf32>
    %459 = arith.addf %458, %457 : vector<8x32xf32>
    %460 = arith.divf %458, %459 : vector<8x32xf32>
    %461 = vector.extract_strided_slice %442 {offsets = [0, 64], sizes = [8, 32], strides = [1, 1]} : vector<8x96xf32> to vector<8x32xf32>
    %462 = vector.extract_strided_slice %444 {offsets = [0, 64], sizes = [8, 32], strides = [1, 1]} : vector<8x96xf32> to vector<8x32xf32>
    %463 = vector.broadcast %4 : vector<1x32xf32> to vector<8x32xf32>
    %464 = arith.addf %462, %463 : vector<8x32xf32>
    %465 = arith.mulf %452, %464 : vector<8x32xf32>
    %466 = arith.addf %461, %465 : vector<8x32xf32>
    %467 = math.tanh %466 : vector<8x32xf32>
    %cst_135 = arith.constant 1.000000e+00 : f32
    %468 = vector.broadcast %cst_135 : f32 to vector<8x32xf32>
    %469 = arith.subf %468, %460 : vector<8x32xf32>
    %470 = arith.mulf %469, %467 : vector<8x32xf32>
    %471 = arith.mulf %460, %429 : vector<8x32xf32>
    %472 = arith.addf %470, %471 : vector<8x32xf32>
    %473 = vector.broadcast %439 : vector<8x1xf32> to vector<8x32xf32>
    %474 = arith.mulf %473, %472 : vector<8x32xf32>
    %cst_136 = arith.constant 1.000000e+00 : f32
    %475 = vector.broadcast %cst_136 : f32 to vector<8x1xf32>
    %476 = arith.subf %475, %439 : vector<8x1xf32>
    %477 = vector.broadcast %476 : vector<8x1xf32> to vector<8x32xf32>
    %478 = arith.mulf %477, %429 : vector<8x32xf32>
    %479 = arith.addf %474, %478 : vector<8x32xf32>
    %480 = vector.broadcast %439 : vector<8x1xf32> to vector<8x32xf32>
    %481 = arith.mulf %480, %479 : vector<8x32xf32>
    %482 = arith.index_cast %c6_i32_129 : i32 to index
    %c0_137 = arith.constant 0 : index
    %c0_138 = arith.constant 0 : index
    %483 = vector.load %arg9[%482, %c0_137, %c0_138] : memref<8x8x32xf32, #tpu.memory_space<vmem>>, vector<1x8x32xf32>
    %484 = vector.shape_cast %483 : vector<1x8x32xf32> to vector<8x32xf32>
    %485 = vector.shape_cast %481 : vector<8x32xf32> to vector<1x8x32xf32>
    tpu.vector_store %arg9[%482, %c0_137, %c0_138], %485 {strides = array<i32>} : memref<8x8x32xf32, #tpu.memory_space<vmem>>, vector<1x8x32xf32>,
    %c7_i32_139 = arith.constant 7 : i32
    %486 = vector.broadcast %c7_i32_139 : i32 to vector<8x1xi32>
    %487 = arith.cmpi slt, %486, %6 : vector<8x1xi32>
    %488 = arith.extui %487 : vector<8x1xi1> to vector<8x1xi32>
    %489 = arith.sitofp %488 : vector<8x1xi32> to vector<8x1xf32>
    %490 = arith.index_cast %c7_i32_139 : i32 to index
    %c0_140 = arith.constant 0 : index
    %c0_141 = arith.constant 0 : index
    %491 = vector.load %arg11[%490, %c0_140, %c0_141] : memref<8x8x96xf32, #tpu.memory_space<vmem>>, vector<1x8x96xf32>
    %492 = vector.shape_cast %491 : vector<1x8x96xf32> to vector<8x96xf32>
    %493 = arith.truncf %479 : vector<8x32xf32> to vector<8x32xbf16>
    %cst_142 = arith.constant dense<0.000000e+00> : vector<8x96xf32>
    %494 = tpu.matmul %493, %2, %cst_142 {dimension_numbers = #tpu.dot_dimension_numbers<[1], [0], [0], [1], [0, 0, 1, 1], [], []>} : vector<8x32xbf16>, vector<32x96xbf16>, vector<8x96xf32> -> vector<8x96xf32>
    %495 = vector.extract_strided_slice %492 {offsets = [0, 0], sizes = [8, 32], strides = [1, 1]} : vector<8x96xf32> to vector<8x32xf32>
    %496 = vector.extract_strided_slice %494 {offsets = [0, 0], sizes = [8, 32], strides = [1, 1]} : vector<8x96xf32> to vector<8x32xf32>
    %497 = arith.addf %495, %496 : vector<8x32xf32>
    %498 = arith.negf %497 : vector<8x32xf32>
    %499 = math.exp %498 : vector<8x32xf32>
    %cst_143 = arith.constant 1.000000e+00 : f32
    %500 = vector.broadcast %cst_143 : f32 to vector<8x32xf32>
    %501 = arith.addf %500, %499 : vector<8x32xf32>
    %502 = arith.divf %500, %501 : vector<8x32xf32>
    %503 = vector.extract_strided_slice %492 {offsets = [0, 32], sizes = [8, 32], strides = [1, 1]} : vector<8x96xf32> to vector<8x32xf32>
    %504 = vector.extract_strided_slice %494 {offsets = [0, 32], sizes = [8, 32], strides = [1, 1]} : vector<8x96xf32> to vector<8x32xf32>
    %505 = arith.addf %503, %504 : vector<8x32xf32>
    %506 = arith.negf %505 : vector<8x32xf32>
    %507 = math.exp %506 : vector<8x32xf32>
    %cst_144 = arith.constant 1.000000e+00 : f32
    %508 = vector.broadcast %cst_144 : f32 to vector<8x32xf32>
    %509 = arith.addf %508, %507 : vector<8x32xf32>
    %510 = arith.divf %508, %509 : vector<8x32xf32>
    %511 = vector.extract_strided_slice %492 {offsets = [0, 64], sizes = [8, 32], strides = [1, 1]} : vector<8x96xf32> to vector<8x32xf32>
    %512 = vector.extract_strided_slice %494 {offsets = [0, 64], sizes = [8, 32], strides = [1, 1]} : vector<8x96xf32> to vector<8x32xf32>
    %513 = vector.broadcast %4 : vector<1x32xf32> to vector<8x32xf32>
    %514 = arith.addf %512, %513 : vector<8x32xf32>
    %515 = arith.mulf %502, %514 : vector<8x32xf32>
    %516 = arith.addf %511, %515 : vector<8x32xf32>
    %517 = math.tanh %516 : vector<8x32xf32>
    %cst_145 = arith.constant 1.000000e+00 : f32
    %518 = vector.broadcast %cst_145 : f32 to vector<8x32xf32>
    %519 = arith.subf %518, %510 : vector<8x32xf32>
    %520 = arith.mulf %519, %517 : vector<8x32xf32>
    %521 = arith.mulf %510, %479 : vector<8x32xf32>
    %522 = arith.addf %520, %521 : vector<8x32xf32>
    %523 = vector.broadcast %489 : vector<8x1xf32> to vector<8x32xf32>
    %524 = arith.mulf %523, %522 : vector<8x32xf32>
    %cst_146 = arith.constant 1.000000e+00 : f32
    %525 = vector.broadcast %cst_146 : f32 to vector<8x1xf32>
    %526 = arith.subf %525, %489 : vector<8x1xf32>
    %527 = vector.broadcast %526 : vector<8x1xf32> to vector<8x32xf32>
    %528 = arith.mulf %527, %479 : vector<8x32xf32>
    %529 = arith.addf %524, %528 : vector<8x32xf32>
    %530 = vector.broadcast %489 : vector<8x1xf32> to vector<8x32xf32>
    %531 = arith.mulf %530, %529 : vector<8x32xf32>
    %532 = arith.index_cast %c7_i32_139 : i32 to index
    %c0_147 = arith.constant 0 : index
    %c0_148 = arith.constant 0 : index
    %533 = vector.load %arg9[%532, %c0_147, %c0_148] : memref<8x8x32xf32, #tpu.memory_space<vmem>>, vector<1x8x32xf32>
    %534 = vector.shape_cast %533 : vector<1x8x32xf32> to vector<8x32xf32>
    %535 = vector.shape_cast %531 : vector<8x32xf32> to vector<1x8x32xf32>
    tpu.vector_store %arg9[%532, %c0_147, %c0_148], %535 {strides = array<i32>} : memref<8x8x32xf32, #tpu.memory_space<vmem>>, vector<1x8x32xf32>,
    %c8_i32_149 = arith.constant 8 : i32
    %c0_150 = arith.constant 0 : index
    %c0_151 = arith.constant 0 : index
    %c0_152 = arith.constant 0 : index
    %536 = vector.load %arg10[%c0_150, %c0_151, %c0_152] : memref<2x8x32xf32, #tpu.memory_space<vmem>>, vector<1x8x32xf32>
    %537 = vector.shape_cast %536 : vector<1x8x32xf32> to vector<8x32xf32>
    %538 = vector.shape_cast %529 : vector<8x32xf32> to vector<1x8x32xf32>
    tpu.vector_store %arg10[%c0_150, %c0_151, %c0_152], %538 {strides = array<i32>} : memref<2x8x32xf32, #tpu.memory_space<vmem>>, vector<1x8x32xf32>,
    %cst_153 = arith.constant 0.000000e+00 : f32
    %539 = vector.broadcast %cst_153 : f32 to vector<8x32xf32>
    %c0_i32_154 = arith.constant 0 : i32
    %c7_i32_155 = arith.constant 7 : i32
    %540 = arith.subi %c7_i32_155, %c0_i32_154 : i32
    %541 = vector.broadcast %540 : i32 to vector<8x1xi32>
    %542 = arith.cmpi slt, %541, %6 : vector<8x1xi32>
    %543 = arith.extui %542 : vector<8x1xi1> to vector<8x1xi32>
    %544 = arith.sitofp %543 : vector<8x1xi32> to vector<8x1xf32>
    %545 = arith.index_cast %540 : i32 to index
    %c0_156 = arith.constant 0 : index
    %c0_157 = arith.constant 0 : index
    %546 = vector.load %arg12[%545, %c0_156, %c0_157] : memref<8x8x96xf32, #tpu.memory_space<vmem>>, vector<1x8x96xf32>
    %547 = vector.shape_cast %546 : vector<1x8x96xf32> to vector<8x96xf32>
    %548 = arith.truncf %539 : vector<8x32xf32> to vector<8x32xbf16>
    %cst_158 = arith.constant dense<0.000000e+00> : vector<8x96xf32>
    %549 = tpu.matmul %548, %3, %cst_158 {dimension_numbers = #tpu.dot_dimension_numbers<[1], [0], [0], [1], [0, 0, 1, 1], [], []>} : vector<8x32xbf16>, vector<32x96xbf16>, vector<8x96xf32> -> vector<8x96xf32>
    %550 = vector.extract_strided_slice %547 {offsets = [0, 0], sizes = [8, 32], strides = [1, 1]} : vector<8x96xf32> to vector<8x32xf32>
    %551 = vector.extract_strided_slice %549 {offsets = [0, 0], sizes = [8, 32], strides = [1, 1]} : vector<8x96xf32> to vector<8x32xf32>
    %552 = arith.addf %550, %551 : vector<8x32xf32>
    %553 = arith.negf %552 : vector<8x32xf32>
    %554 = math.exp %553 : vector<8x32xf32>
    %cst_159 = arith.constant 1.000000e+00 : f32
    %555 = vector.broadcast %cst_159 : f32 to vector<8x32xf32>
    %556 = arith.addf %555, %554 : vector<8x32xf32>
    %557 = arith.divf %555, %556 : vector<8x32xf32>
    %558 = vector.extract_strided_slice %547 {offsets = [0, 32], sizes = [8, 32], strides = [1, 1]} : vector<8x96xf32> to vector<8x32xf32>
    %559 = vector.extract_strided_slice %549 {offsets = [0, 32], sizes = [8, 32], strides = [1, 1]} : vector<8x96xf32> to vector<8x32xf32>
    %560 = arith.addf %558, %559 : vector<8x32xf32>
    %561 = arith.negf %560 : vector<8x32xf32>
    %562 = math.exp %561 : vector<8x32xf32>
    %cst_160 = arith.constant 1.000000e+00 : f32
    %563 = vector.broadcast %cst_160 : f32 to vector<8x32xf32>
    %564 = arith.addf %563, %562 : vector<8x32xf32>
    %565 = arith.divf %563, %564 : vector<8x32xf32>
    %566 = vector.extract_strided_slice %547 {offsets = [0, 64], sizes = [8, 32], strides = [1, 1]} : vector<8x96xf32> to vector<8x32xf32>
    %567 = vector.extract_strided_slice %549 {offsets = [0, 64], sizes = [8, 32], strides = [1, 1]} : vector<8x96xf32> to vector<8x32xf32>
    %568 = vector.broadcast %5 : vector<1x32xf32> to vector<8x32xf32>
    %569 = arith.addf %567, %568 : vector<8x32xf32>
    %570 = arith.mulf %557, %569 : vector<8x32xf32>
    %571 = arith.addf %566, %570 : vector<8x32xf32>
    %572 = math.tanh %571 : vector<8x32xf32>
    %cst_161 = arith.constant 1.000000e+00 : f32
    %573 = vector.broadcast %cst_161 : f32 to vector<8x32xf32>
    %574 = arith.subf %573, %565 : vector<8x32xf32>
    %575 = arith.mulf %574, %572 : vector<8x32xf32>
    %576 = arith.mulf %565, %539 : vector<8x32xf32>
    %577 = arith.addf %575, %576 : vector<8x32xf32>
    %578 = vector.broadcast %544 : vector<8x1xf32> to vector<8x32xf32>
    %579 = arith.mulf %578, %577 : vector<8x32xf32>
    %cst_162 = arith.constant 1.000000e+00 : f32
    %580 = vector.broadcast %cst_162 : f32 to vector<8x1xf32>
    %581 = arith.subf %580, %544 : vector<8x1xf32>
    %582 = vector.broadcast %581 : vector<8x1xf32> to vector<8x32xf32>
    %583 = arith.mulf %582, %539 : vector<8x32xf32>
    %584 = arith.addf %579, %583 : vector<8x32xf32>
    %585 = arith.index_cast %540 : i32 to index
    %c0_163 = arith.constant 0 : index
    %c0_164 = arith.constant 0 : index
    %586 = vector.load %arg9[%585, %c0_163, %c0_164] : memref<8x8x32xf32, #tpu.memory_space<vmem>>, vector<1x8x32xf32>
    %587 = vector.shape_cast %586 : vector<1x8x32xf32> to vector<8x32xf32>
    %588 = vector.broadcast %544 : vector<8x1xf32> to vector<8x32xf32>
    %589 = arith.mulf %588, %584 : vector<8x32xf32>
    %590 = arith.addf %587, %589 : vector<8x32xf32>
    %591 = arith.index_cast %540 : i32 to index
    %c0_165 = arith.constant 0 : index
    %c0_166 = arith.constant 0 : index
    %592 = vector.load %arg9[%591, %c0_165, %c0_166] : memref<8x8x32xf32, #tpu.memory_space<vmem>>, vector<1x8x32xf32>
    %593 = vector.shape_cast %592 : vector<1x8x32xf32> to vector<8x32xf32>
    %594 = vector.shape_cast %590 : vector<8x32xf32> to vector<1x8x32xf32>
    tpu.vector_store %arg9[%591, %c0_165, %c0_166], %594 {strides = array<i32>} : memref<8x8x32xf32, #tpu.memory_space<vmem>>, vector<1x8x32xf32>,
    %c1_i32_167 = arith.constant 1 : i32
    %c7_i32_168 = arith.constant 7 : i32
    %595 = arith.subi %c7_i32_168, %c1_i32_167 : i32
    %596 = vector.broadcast %595 : i32 to vector<8x1xi32>
    %597 = arith.cmpi slt, %596, %6 : vector<8x1xi32>
    %598 = arith.extui %597 : vector<8x1xi1> to vector<8x1xi32>
    %599 = arith.sitofp %598 : vector<8x1xi32> to vector<8x1xf32>
    %600 = arith.index_cast %595 : i32 to index
    %c0_169 = arith.constant 0 : index
    %c0_170 = arith.constant 0 : index
    %601 = vector.load %arg12[%600, %c0_169, %c0_170] : memref<8x8x96xf32, #tpu.memory_space<vmem>>, vector<1x8x96xf32>
    %602 = vector.shape_cast %601 : vector<1x8x96xf32> to vector<8x96xf32>
    %603 = arith.truncf %584 : vector<8x32xf32> to vector<8x32xbf16>
    %cst_171 = arith.constant dense<0.000000e+00> : vector<8x96xf32>
    %604 = tpu.matmul %603, %3, %cst_171 {dimension_numbers = #tpu.dot_dimension_numbers<[1], [0], [0], [1], [0, 0, 1, 1], [], []>} : vector<8x32xbf16>, vector<32x96xbf16>, vector<8x96xf32> -> vector<8x96xf32>
    %605 = vector.extract_strided_slice %602 {offsets = [0, 0], sizes = [8, 32], strides = [1, 1]} : vector<8x96xf32> to vector<8x32xf32>
    %606 = vector.extract_strided_slice %604 {offsets = [0, 0], sizes = [8, 32], strides = [1, 1]} : vector<8x96xf32> to vector<8x32xf32>
    %607 = arith.addf %605, %606 : vector<8x32xf32>
    %608 = arith.negf %607 : vector<8x32xf32>
    %609 = math.exp %608 : vector<8x32xf32>
    %cst_172 = arith.constant 1.000000e+00 : f32
    %610 = vector.broadcast %cst_172 : f32 to vector<8x32xf32>
    %611 = arith.addf %610, %609 : vector<8x32xf32>
    %612 = arith.divf %610, %611 : vector<8x32xf32>
    %613 = vector.extract_strided_slice %602 {offsets = [0, 32], sizes = [8, 32], strides = [1, 1]} : vector<8x96xf32> to vector<8x32xf32>
    %614 = vector.extract_strided_slice %604 {offsets = [0, 32], sizes = [8, 32], strides = [1, 1]} : vector<8x96xf32> to vector<8x32xf32>
    %615 = arith.addf %613, %614 : vector<8x32xf32>
    %616 = arith.negf %615 : vector<8x32xf32>
    %617 = math.exp %616 : vector<8x32xf32>
    %cst_173 = arith.constant 1.000000e+00 : f32
    %618 = vector.broadcast %cst_173 : f32 to vector<8x32xf32>
    %619 = arith.addf %618, %617 : vector<8x32xf32>
    %620 = arith.divf %618, %619 : vector<8x32xf32>
    %621 = vector.extract_strided_slice %602 {offsets = [0, 64], sizes = [8, 32], strides = [1, 1]} : vector<8x96xf32> to vector<8x32xf32>
    %622 = vector.extract_strided_slice %604 {offsets = [0, 64], sizes = [8, 32], strides = [1, 1]} : vector<8x96xf32> to vector<8x32xf32>
    %623 = vector.broadcast %5 : vector<1x32xf32> to vector<8x32xf32>
    %624 = arith.addf %622, %623 : vector<8x32xf32>
    %625 = arith.mulf %612, %624 : vector<8x32xf32>
    %626 = arith.addf %621, %625 : vector<8x32xf32>
    %627 = math.tanh %626 : vector<8x32xf32>
    %cst_174 = arith.constant 1.000000e+00 : f32
    %628 = vector.broadcast %cst_174 : f32 to vector<8x32xf32>
    %629 = arith.subf %628, %620 : vector<8x32xf32>
    %630 = arith.mulf %629, %627 : vector<8x32xf32>
    %631 = arith.mulf %620, %584 : vector<8x32xf32>
    %632 = arith.addf %630, %631 : vector<8x32xf32>
    %633 = vector.broadcast %599 : vector<8x1xf32> to vector<8x32xf32>
    %634 = arith.mulf %633, %632 : vector<8x32xf32>
    %cst_175 = arith.constant 1.000000e+00 : f32
    %635 = vector.broadcast %cst_175 : f32 to vector<8x1xf32>
    %636 = arith.subf %635, %599 : vector<8x1xf32>
    %637 = vector.broadcast %636 : vector<8x1xf32> to vector<8x32xf32>
    %638 = arith.mulf %637, %584 : vector<8x32xf32>
    %639 = arith.addf %634, %638 : vector<8x32xf32>
    %640 = arith.index_cast %595 : i32 to index
    %c0_176 = arith.constant 0 : index
    %c0_177 = arith.constant 0 : index
    %641 = vector.load %arg9[%640, %c0_176, %c0_177] : memref<8x8x32xf32, #tpu.memory_space<vmem>>, vector<1x8x32xf32>
    %642 = vector.shape_cast %641 : vector<1x8x32xf32> to vector<8x32xf32>
    %643 = vector.broadcast %599 : vector<8x1xf32> to vector<8x32xf32>
    %644 = arith.mulf %643, %639 : vector<8x32xf32>
    %645 = arith.addf %642, %644 : vector<8x32xf32>
    %646 = arith.index_cast %595 : i32 to index
    %c0_178 = arith.constant 0 : index
    %c0_179 = arith.constant 0 : index
    %647 = vector.load %arg9[%646, %c0_178, %c0_179] : memref<8x8x32xf32, #tpu.memory_space<vmem>>, vector<1x8x32xf32>
    %648 = vector.shape_cast %647 : vector<1x8x32xf32> to vector<8x32xf32>
    %649 = vector.shape_cast %645 : vector<8x32xf32> to vector<1x8x32xf32>
    tpu.vector_store %arg9[%646, %c0_178, %c0_179], %649 {strides = array<i32>} : memref<8x8x32xf32, #tpu.memory_space<vmem>>, vector<1x8x32xf32>,
    %c2_i32_180 = arith.constant 2 : i32
    %c7_i32_181 = arith.constant 7 : i32
    %650 = arith.subi %c7_i32_181, %c2_i32_180 : i32
    %651 = vector.broadcast %650 : i32 to vector<8x1xi32>
    %652 = arith.cmpi slt, %651, %6 : vector<8x1xi32>
    %653 = arith.extui %652 : vector<8x1xi1> to vector<8x1xi32>
    %654 = arith.sitofp %653 : vector<8x1xi32> to vector<8x1xf32>
    %655 = arith.index_cast %650 : i32 to index
    %c0_182 = arith.constant 0 : index
    %c0_183 = arith.constant 0 : index
    %656 = vector.load %arg12[%655, %c0_182, %c0_183] : memref<8x8x96xf32, #tpu.memory_space<vmem>>, vector<1x8x96xf32>
    %657 = vector.shape_cast %656 : vector<1x8x96xf32> to vector<8x96xf32>
    %658 = arith.truncf %639 : vector<8x32xf32> to vector<8x32xbf16>
    %cst_184 = arith.constant dense<0.000000e+00> : vector<8x96xf32>
    %659 = tpu.matmul %658, %3, %cst_184 {dimension_numbers = #tpu.dot_dimension_numbers<[1], [0], [0], [1], [0, 0, 1, 1], [], []>} : vector<8x32xbf16>, vector<32x96xbf16>, vector<8x96xf32> -> vector<8x96xf32>
    %660 = vector.extract_strided_slice %657 {offsets = [0, 0], sizes = [8, 32], strides = [1, 1]} : vector<8x96xf32> to vector<8x32xf32>
    %661 = vector.extract_strided_slice %659 {offsets = [0, 0], sizes = [8, 32], strides = [1, 1]} : vector<8x96xf32> to vector<8x32xf32>
    %662 = arith.addf %660, %661 : vector<8x32xf32>
    %663 = arith.negf %662 : vector<8x32xf32>
    %664 = math.exp %663 : vector<8x32xf32>
    %cst_185 = arith.constant 1.000000e+00 : f32
    %665 = vector.broadcast %cst_185 : f32 to vector<8x32xf32>
    %666 = arith.addf %665, %664 : vector<8x32xf32>
    %667 = arith.divf %665, %666 : vector<8x32xf32>
    %668 = vector.extract_strided_slice %657 {offsets = [0, 32], sizes = [8, 32], strides = [1, 1]} : vector<8x96xf32> to vector<8x32xf32>
    %669 = vector.extract_strided_slice %659 {offsets = [0, 32], sizes = [8, 32], strides = [1, 1]} : vector<8x96xf32> to vector<8x32xf32>
    %670 = arith.addf %668, %669 : vector<8x32xf32>
    %671 = arith.negf %670 : vector<8x32xf32>
    %672 = math.exp %671 : vector<8x32xf32>
    %cst_186 = arith.constant 1.000000e+00 : f32
    %673 = vector.broadcast %cst_186 : f32 to vector<8x32xf32>
    %674 = arith.addf %673, %672 : vector<8x32xf32>
    %675 = arith.divf %673, %674 : vector<8x32xf32>
    %676 = vector.extract_strided_slice %657 {offsets = [0, 64], sizes = [8, 32], strides = [1, 1]} : vector<8x96xf32> to vector<8x32xf32>
    %677 = vector.extract_strided_slice %659 {offsets = [0, 64], sizes = [8, 32], strides = [1, 1]} : vector<8x96xf32> to vector<8x32xf32>
    %678 = vector.broadcast %5 : vector<1x32xf32> to vector<8x32xf32>
    %679 = arith.addf %677, %678 : vector<8x32xf32>
    %680 = arith.mulf %667, %679 : vector<8x32xf32>
    %681 = arith.addf %676, %680 : vector<8x32xf32>
    %682 = math.tanh %681 : vector<8x32xf32>
    %cst_187 = arith.constant 1.000000e+00 : f32
    %683 = vector.broadcast %cst_187 : f32 to vector<8x32xf32>
    %684 = arith.subf %683, %675 : vector<8x32xf32>
    %685 = arith.mulf %684, %682 : vector<8x32xf32>
    %686 = arith.mulf %675, %639 : vector<8x32xf32>
    %687 = arith.addf %685, %686 : vector<8x32xf32>
    %688 = vector.broadcast %654 : vector<8x1xf32> to vector<8x32xf32>
    %689 = arith.mulf %688, %687 : vector<8x32xf32>
    %cst_188 = arith.constant 1.000000e+00 : f32
    %690 = vector.broadcast %cst_188 : f32 to vector<8x1xf32>
    %691 = arith.subf %690, %654 : vector<8x1xf32>
    %692 = vector.broadcast %691 : vector<8x1xf32> to vector<8x32xf32>
    %693 = arith.mulf %692, %639 : vector<8x32xf32>
    %694 = arith.addf %689, %693 : vector<8x32xf32>
    %695 = arith.index_cast %650 : i32 to index
    %c0_189 = arith.constant 0 : index
    %c0_190 = arith.constant 0 : index
    %696 = vector.load %arg9[%695, %c0_189, %c0_190] : memref<8x8x32xf32, #tpu.memory_space<vmem>>, vector<1x8x32xf32>
    %697 = vector.shape_cast %696 : vector<1x8x32xf32> to vector<8x32xf32>
    %698 = vector.broadcast %654 : vector<8x1xf32> to vector<8x32xf32>
    %699 = arith.mulf %698, %694 : vector<8x32xf32>
    %700 = arith.addf %697, %699 : vector<8x32xf32>
    %701 = arith.index_cast %650 : i32 to index
    %c0_191 = arith.constant 0 : index
    %c0_192 = arith.constant 0 : index
    %702 = vector.load %arg9[%701, %c0_191, %c0_192] : memref<8x8x32xf32, #tpu.memory_space<vmem>>, vector<1x8x32xf32>
    %703 = vector.shape_cast %702 : vector<1x8x32xf32> to vector<8x32xf32>
    %704 = vector.shape_cast %700 : vector<8x32xf32> to vector<1x8x32xf32>
    tpu.vector_store %arg9[%701, %c0_191, %c0_192], %704 {strides = array<i32>} : memref<8x8x32xf32, #tpu.memory_space<vmem>>, vector<1x8x32xf32>,
    %c3_i32_193 = arith.constant 3 : i32
    %c7_i32_194 = arith.constant 7 : i32
    %705 = arith.subi %c7_i32_194, %c3_i32_193 : i32
    %706 = vector.broadcast %705 : i32 to vector<8x1xi32>
    %707 = arith.cmpi slt, %706, %6 : vector<8x1xi32>
    %708 = arith.extui %707 : vector<8x1xi1> to vector<8x1xi32>
    %709 = arith.sitofp %708 : vector<8x1xi32> to vector<8x1xf32>
    %710 = arith.index_cast %705 : i32 to index
    %c0_195 = arith.constant 0 : index
    %c0_196 = arith.constant 0 : index
    %711 = vector.load %arg12[%710, %c0_195, %c0_196] : memref<8x8x96xf32, #tpu.memory_space<vmem>>, vector<1x8x96xf32>
    %712 = vector.shape_cast %711 : vector<1x8x96xf32> to vector<8x96xf32>
    %713 = arith.truncf %694 : vector<8x32xf32> to vector<8x32xbf16>
    %cst_197 = arith.constant dense<0.000000e+00> : vector<8x96xf32>
    %714 = tpu.matmul %713, %3, %cst_197 {dimension_numbers = #tpu.dot_dimension_numbers<[1], [0], [0], [1], [0, 0, 1, 1], [], []>} : vector<8x32xbf16>, vector<32x96xbf16>, vector<8x96xf32> -> vector<8x96xf32>
    %715 = vector.extract_strided_slice %712 {offsets = [0, 0], sizes = [8, 32], strides = [1, 1]} : vector<8x96xf32> to vector<8x32xf32>
    %716 = vector.extract_strided_slice %714 {offsets = [0, 0], sizes = [8, 32], strides = [1, 1]} : vector<8x96xf32> to vector<8x32xf32>
    %717 = arith.addf %715, %716 : vector<8x32xf32>
    %718 = arith.negf %717 : vector<8x32xf32>
    %719 = math.exp %718 : vector<8x32xf32>
    %cst_198 = arith.constant 1.000000e+00 : f32
    %720 = vector.broadcast %cst_198 : f32 to vector<8x32xf32>
    %721 = arith.addf %720, %719 : vector<8x32xf32>
    %722 = arith.divf %720, %721 : vector<8x32xf32>
    %723 = vector.extract_strided_slice %712 {offsets = [0, 32], sizes = [8, 32], strides = [1, 1]} : vector<8x96xf32> to vector<8x32xf32>
    %724 = vector.extract_strided_slice %714 {offsets = [0, 32], sizes = [8, 32], strides = [1, 1]} : vector<8x96xf32> to vector<8x32xf32>
    %725 = arith.addf %723, %724 : vector<8x32xf32>
    %726 = arith.negf %725 : vector<8x32xf32>
    %727 = math.exp %726 : vector<8x32xf32>
    %cst_199 = arith.constant 1.000000e+00 : f32
    %728 = vector.broadcast %cst_199 : f32 to vector<8x32xf32>
    %729 = arith.addf %728, %727 : vector<8x32xf32>
    %730 = arith.divf %728, %729 : vector<8x32xf32>
    %731 = vector.extract_strided_slice %712 {offsets = [0, 64], sizes = [8, 32], strides = [1, 1]} : vector<8x96xf32> to vector<8x32xf32>
    %732 = vector.extract_strided_slice %714 {offsets = [0, 64], sizes = [8, 32], strides = [1, 1]} : vector<8x96xf32> to vector<8x32xf32>
    %733 = vector.broadcast %5 : vector<1x32xf32> to vector<8x32xf32>
    %734 = arith.addf %732, %733 : vector<8x32xf32>
    %735 = arith.mulf %722, %734 : vector<8x32xf32>
    %736 = arith.addf %731, %735 : vector<8x32xf32>
    %737 = math.tanh %736 : vector<8x32xf32>
    %cst_200 = arith.constant 1.000000e+00 : f32
    %738 = vector.broadcast %cst_200 : f32 to vector<8x32xf32>
    %739 = arith.subf %738, %730 : vector<8x32xf32>
    %740 = arith.mulf %739, %737 : vector<8x32xf32>
    %741 = arith.mulf %730, %694 : vector<8x32xf32>
    %742 = arith.addf %740, %741 : vector<8x32xf32>
    %743 = vector.broadcast %709 : vector<8x1xf32> to vector<8x32xf32>
    %744 = arith.mulf %743, %742 : vector<8x32xf32>
    %cst_201 = arith.constant 1.000000e+00 : f32
    %745 = vector.broadcast %cst_201 : f32 to vector<8x1xf32>
    %746 = arith.subf %745, %709 : vector<8x1xf32>
    %747 = vector.broadcast %746 : vector<8x1xf32> to vector<8x32xf32>
    %748 = arith.mulf %747, %694 : vector<8x32xf32>
    %749 = arith.addf %744, %748 : vector<8x32xf32>
    %750 = arith.index_cast %705 : i32 to index
    %c0_202 = arith.constant 0 : index
    %c0_203 = arith.constant 0 : index
    %751 = vector.load %arg9[%750, %c0_202, %c0_203] : memref<8x8x32xf32, #tpu.memory_space<vmem>>, vector<1x8x32xf32>
    %752 = vector.shape_cast %751 : vector<1x8x32xf32> to vector<8x32xf32>
    %753 = vector.broadcast %709 : vector<8x1xf32> to vector<8x32xf32>
    %754 = arith.mulf %753, %749 : vector<8x32xf32>
    %755 = arith.addf %752, %754 : vector<8x32xf32>
    %756 = arith.index_cast %705 : i32 to index
    %c0_204 = arith.constant 0 : index
    %c0_205 = arith.constant 0 : index
    %757 = vector.load %arg9[%756, %c0_204, %c0_205] : memref<8x8x32xf32, #tpu.memory_space<vmem>>, vector<1x8x32xf32>
    %758 = vector.shape_cast %757 : vector<1x8x32xf32> to vector<8x32xf32>
    %759 = vector.shape_cast %755 : vector<8x32xf32> to vector<1x8x32xf32>
    tpu.vector_store %arg9[%756, %c0_204, %c0_205], %759 {strides = array<i32>} : memref<8x8x32xf32, #tpu.memory_space<vmem>>, vector<1x8x32xf32>,
    %c4_i32_206 = arith.constant 4 : i32
    %c7_i32_207 = arith.constant 7 : i32
    %760 = arith.subi %c7_i32_207, %c4_i32_206 : i32
    %761 = vector.broadcast %760 : i32 to vector<8x1xi32>
    %762 = arith.cmpi slt, %761, %6 : vector<8x1xi32>
    %763 = arith.extui %762 : vector<8x1xi1> to vector<8x1xi32>
    %764 = arith.sitofp %763 : vector<8x1xi32> to vector<8x1xf32>
    %765 = arith.index_cast %760 : i32 to index
    %c0_208 = arith.constant 0 : index
    %c0_209 = arith.constant 0 : index
    %766 = vector.load %arg12[%765, %c0_208, %c0_209] : memref<8x8x96xf32, #tpu.memory_space<vmem>>, vector<1x8x96xf32>
    %767 = vector.shape_cast %766 : vector<1x8x96xf32> to vector<8x96xf32>
    %768 = arith.truncf %749 : vector<8x32xf32> to vector<8x32xbf16>
    %cst_210 = arith.constant dense<0.000000e+00> : vector<8x96xf32>
    %769 = tpu.matmul %768, %3, %cst_210 {dimension_numbers = #tpu.dot_dimension_numbers<[1], [0], [0], [1], [0, 0, 1, 1], [], []>} : vector<8x32xbf16>, vector<32x96xbf16>, vector<8x96xf32> -> vector<8x96xf32>
    %770 = vector.extract_strided_slice %767 {offsets = [0, 0], sizes = [8, 32], strides = [1, 1]} : vector<8x96xf32> to vector<8x32xf32>
    %771 = vector.extract_strided_slice %769 {offsets = [0, 0], sizes = [8, 32], strides = [1, 1]} : vector<8x96xf32> to vector<8x32xf32>
    %772 = arith.addf %770, %771 : vector<8x32xf32>
    %773 = arith.negf %772 : vector<8x32xf32>
    %774 = math.exp %773 : vector<8x32xf32>
    %cst_211 = arith.constant 1.000000e+00 : f32
    %775 = vector.broadcast %cst_211 : f32 to vector<8x32xf32>
    %776 = arith.addf %775, %774 : vector<8x32xf32>
    %777 = arith.divf %775, %776 : vector<8x32xf32>
    %778 = vector.extract_strided_slice %767 {offsets = [0, 32], sizes = [8, 32], strides = [1, 1]} : vector<8x96xf32> to vector<8x32xf32>
    %779 = vector.extract_strided_slice %769 {offsets = [0, 32], sizes = [8, 32], strides = [1, 1]} : vector<8x96xf32> to vector<8x32xf32>
    %780 = arith.addf %778, %779 : vector<8x32xf32>
    %781 = arith.negf %780 : vector<8x32xf32>
    %782 = math.exp %781 : vector<8x32xf32>
    %cst_212 = arith.constant 1.000000e+00 : f32
    %783 = vector.broadcast %cst_212 : f32 to vector<8x32xf32>
    %784 = arith.addf %783, %782 : vector<8x32xf32>
    %785 = arith.divf %783, %784 : vector<8x32xf32>
    %786 = vector.extract_strided_slice %767 {offsets = [0, 64], sizes = [8, 32], strides = [1, 1]} : vector<8x96xf32> to vector<8x32xf32>
    %787 = vector.extract_strided_slice %769 {offsets = [0, 64], sizes = [8, 32], strides = [1, 1]} : vector<8x96xf32> to vector<8x32xf32>
    %788 = vector.broadcast %5 : vector<1x32xf32> to vector<8x32xf32>
    %789 = arith.addf %787, %788 : vector<8x32xf32>
    %790 = arith.mulf %777, %789 : vector<8x32xf32>
    %791 = arith.addf %786, %790 : vector<8x32xf32>
    %792 = math.tanh %791 : vector<8x32xf32>
    %cst_213 = arith.constant 1.000000e+00 : f32
    %793 = vector.broadcast %cst_213 : f32 to vector<8x32xf32>
    %794 = arith.subf %793, %785 : vector<8x32xf32>
    %795 = arith.mulf %794, %792 : vector<8x32xf32>
    %796 = arith.mulf %785, %749 : vector<8x32xf32>
    %797 = arith.addf %795, %796 : vector<8x32xf32>
    %798 = vector.broadcast %764 : vector<8x1xf32> to vector<8x32xf32>
    %799 = arith.mulf %798, %797 : vector<8x32xf32>
    %cst_214 = arith.constant 1.000000e+00 : f32
    %800 = vector.broadcast %cst_214 : f32 to vector<8x1xf32>
    %801 = arith.subf %800, %764 : vector<8x1xf32>
    %802 = vector.broadcast %801 : vector<8x1xf32> to vector<8x32xf32>
    %803 = arith.mulf %802, %749 : vector<8x32xf32>
    %804 = arith.addf %799, %803 : vector<8x32xf32>
    %805 = arith.index_cast %760 : i32 to index
    %c0_215 = arith.constant 0 : index
    %c0_216 = arith.constant 0 : index
    %806 = vector.load %arg9[%805, %c0_215, %c0_216] : memref<8x8x32xf32, #tpu.memory_space<vmem>>, vector<1x8x32xf32>
    %807 = vector.shape_cast %806 : vector<1x8x32xf32> to vector<8x32xf32>
    %808 = vector.broadcast %764 : vector<8x1xf32> to vector<8x32xf32>
    %809 = arith.mulf %808, %804 : vector<8x32xf32>
    %810 = arith.addf %807, %809 : vector<8x32xf32>
    %811 = arith.index_cast %760 : i32 to index
    %c0_217 = arith.constant 0 : index
    %c0_218 = arith.constant 0 : index
    %812 = vector.load %arg9[%811, %c0_217, %c0_218] : memref<8x8x32xf32, #tpu.memory_space<vmem>>, vector<1x8x32xf32>
    %813 = vector.shape_cast %812 : vector<1x8x32xf32> to vector<8x32xf32>
    %814 = vector.shape_cast %810 : vector<8x32xf32> to vector<1x8x32xf32>
    tpu.vector_store %arg9[%811, %c0_217, %c0_218], %814 {strides = array<i32>} : memref<8x8x32xf32, #tpu.memory_space<vmem>>, vector<1x8x32xf32>,
    %c5_i32_219 = arith.constant 5 : i32
    %c7_i32_220 = arith.constant 7 : i32
    %815 = arith.subi %c7_i32_220, %c5_i32_219 : i32
    %816 = vector.broadcast %815 : i32 to vector<8x1xi32>
    %817 = arith.cmpi slt, %816, %6 : vector<8x1xi32>
    %818 = arith.extui %817 : vector<8x1xi1> to vector<8x1xi32>
    %819 = arith.sitofp %818 : vector<8x1xi32> to vector<8x1xf32>
    %820 = arith.index_cast %815 : i32 to index
    %c0_221 = arith.constant 0 : index
    %c0_222 = arith.constant 0 : index
    %821 = vector.load %arg12[%820, %c0_221, %c0_222] : memref<8x8x96xf32, #tpu.memory_space<vmem>>, vector<1x8x96xf32>
    %822 = vector.shape_cast %821 : vector<1x8x96xf32> to vector<8x96xf32>
    %823 = arith.truncf %804 : vector<8x32xf32> to vector<8x32xbf16>
    %cst_223 = arith.constant dense<0.000000e+00> : vector<8x96xf32>
    %824 = tpu.matmul %823, %3, %cst_223 {dimension_numbers = #tpu.dot_dimension_numbers<[1], [0], [0], [1], [0, 0, 1, 1], [], []>} : vector<8x32xbf16>, vector<32x96xbf16>, vector<8x96xf32> -> vector<8x96xf32>
    %825 = vector.extract_strided_slice %822 {offsets = [0, 0], sizes = [8, 32], strides = [1, 1]} : vector<8x96xf32> to vector<8x32xf32>
    %826 = vector.extract_strided_slice %824 {offsets = [0, 0], sizes = [8, 32], strides = [1, 1]} : vector<8x96xf32> to vector<8x32xf32>
    %827 = arith.addf %825, %826 : vector<8x32xf32>
    %828 = arith.negf %827 : vector<8x32xf32>
    %829 = math.exp %828 : vector<8x32xf32>
    %cst_224 = arith.constant 1.000000e+00 : f32
    %830 = vector.broadcast %cst_224 : f32 to vector<8x32xf32>
    %831 = arith.addf %830, %829 : vector<8x32xf32>
    %832 = arith.divf %830, %831 : vector<8x32xf32>
    %833 = vector.extract_strided_slice %822 {offsets = [0, 32], sizes = [8, 32], strides = [1, 1]} : vector<8x96xf32> to vector<8x32xf32>
    %834 = vector.extract_strided_slice %824 {offsets = [0, 32], sizes = [8, 32], strides = [1, 1]} : vector<8x96xf32> to vector<8x32xf32>
    %835 = arith.addf %833, %834 : vector<8x32xf32>
    %836 = arith.negf %835 : vector<8x32xf32>
    %837 = math.exp %836 : vector<8x32xf32>
    %cst_225 = arith.constant 1.000000e+00 : f32
    %838 = vector.broadcast %cst_225 : f32 to vector<8x32xf32>
    %839 = arith.addf %838, %837 : vector<8x32xf32>
    %840 = arith.divf %838, %839 : vector<8x32xf32>
    %841 = vector.extract_strided_slice %822 {offsets = [0, 64], sizes = [8, 32], strides = [1, 1]} : vector<8x96xf32> to vector<8x32xf32>
    %842 = vector.extract_strided_slice %824 {offsets = [0, 64], sizes = [8, 32], strides = [1, 1]} : vector<8x96xf32> to vector<8x32xf32>
    %843 = vector.broadcast %5 : vector<1x32xf32> to vector<8x32xf32>
    %844 = arith.addf %842, %843 : vector<8x32xf32>
    %845 = arith.mulf %832, %844 : vector<8x32xf32>
    %846 = arith.addf %841, %845 : vector<8x32xf32>
    %847 = math.tanh %846 : vector<8x32xf32>
    %cst_226 = arith.constant 1.000000e+00 : f32
    %848 = vector.broadcast %cst_226 : f32 to vector<8x32xf32>
    %849 = arith.subf %848, %840 : vector<8x32xf32>
    %850 = arith.mulf %849, %847 : vector<8x32xf32>
    %851 = arith.mulf %840, %804 : vector<8x32xf32>
    %852 = arith.addf %850, %851 : vector<8x32xf32>
    %853 = vector.broadcast %819 : vector<8x1xf32> to vector<8x32xf32>
    %854 = arith.mulf %853, %852 : vector<8x32xf32>
    %cst_227 = arith.constant 1.000000e+00 : f32
    %855 = vector.broadcast %cst_227 : f32 to vector<8x1xf32>
    %856 = arith.subf %855, %819 : vector<8x1xf32>
    %857 = vector.broadcast %856 : vector<8x1xf32> to vector<8x32xf32>
    %858 = arith.mulf %857, %804 : vector<8x32xf32>
    %859 = arith.addf %854, %858 : vector<8x32xf32>
    %860 = arith.index_cast %815 : i32 to index
    %c0_228 = arith.constant 0 : index
    %c0_229 = arith.constant 0 : index
    %861 = vector.load %arg9[%860, %c0_228, %c0_229] : memref<8x8x32xf32, #tpu.memory_space<vmem>>, vector<1x8x32xf32>
    %862 = vector.shape_cast %861 : vector<1x8x32xf32> to vector<8x32xf32>
    %863 = vector.broadcast %819 : vector<8x1xf32> to vector<8x32xf32>
    %864 = arith.mulf %863, %859 : vector<8x32xf32>
    %865 = arith.addf %862, %864 : vector<8x32xf32>
    %866 = arith.index_cast %815 : i32 to index
    %c0_230 = arith.constant 0 : index
    %c0_231 = arith.constant 0 : index
    %867 = vector.load %arg9[%866, %c0_230, %c0_231] : memref<8x8x32xf32, #tpu.memory_space<vmem>>, vector<1x8x32xf32>
    %868 = vector.shape_cast %867 : vector<1x8x32xf32> to vector<8x32xf32>
    %869 = vector.shape_cast %865 : vector<8x32xf32> to vector<1x8x32xf32>
    tpu.vector_store %arg9[%866, %c0_230, %c0_231], %869 {strides = array<i32>} : memref<8x8x32xf32, #tpu.memory_space<vmem>>, vector<1x8x32xf32>,
    %c6_i32_232 = arith.constant 6 : i32
    %c7_i32_233 = arith.constant 7 : i32
    %870 = arith.subi %c7_i32_233, %c6_i32_232 : i32
    %871 = vector.broadcast %870 : i32 to vector<8x1xi32>
    %872 = arith.cmpi slt, %871, %6 : vector<8x1xi32>
    %873 = arith.extui %872 : vector<8x1xi1> to vector<8x1xi32>
    %874 = arith.sitofp %873 : vector<8x1xi32> to vector<8x1xf32>
    %875 = arith.index_cast %870 : i32 to index
    %c0_234 = arith.constant 0 : index
    %c0_235 = arith.constant 0 : index
    %876 = vector.load %arg12[%875, %c0_234, %c0_235] : memref<8x8x96xf32, #tpu.memory_space<vmem>>, vector<1x8x96xf32>
    %877 = vector.shape_cast %876 : vector<1x8x96xf32> to vector<8x96xf32>
    %878 = arith.truncf %859 : vector<8x32xf32> to vector<8x32xbf16>
    %cst_236 = arith.constant dense<0.000000e+00> : vector<8x96xf32>
    %879 = tpu.matmul %878, %3, %cst_236 {dimension_numbers = #tpu.dot_dimension_numbers<[1], [0], [0], [1], [0, 0, 1, 1], [], []>} : vector<8x32xbf16>, vector<32x96xbf16>, vector<8x96xf32> -> vector<8x96xf32>
    %880 = vector.extract_strided_slice %877 {offsets = [0, 0], sizes = [8, 32], strides = [1, 1]} : vector<8x96xf32> to vector<8x32xf32>
    %881 = vector.extract_strided_slice %879 {offsets = [0, 0], sizes = [8, 32], strides = [1, 1]} : vector<8x96xf32> to vector<8x32xf32>
    %882 = arith.addf %880, %881 : vector<8x32xf32>
    %883 = arith.negf %882 : vector<8x32xf32>
    %884 = math.exp %883 : vector<8x32xf32>
    %cst_237 = arith.constant 1.000000e+00 : f32
    %885 = vector.broadcast %cst_237 : f32 to vector<8x32xf32>
    %886 = arith.addf %885, %884 : vector<8x32xf32>
    %887 = arith.divf %885, %886 : vector<8x32xf32>
    %888 = vector.extract_strided_slice %877 {offsets = [0, 32], sizes = [8, 32], strides = [1, 1]} : vector<8x96xf32> to vector<8x32xf32>
    %889 = vector.extract_strided_slice %879 {offsets = [0, 32], sizes = [8, 32], strides = [1, 1]} : vector<8x96xf32> to vector<8x32xf32>
    %890 = arith.addf %888, %889 : vector<8x32xf32>
    %891 = arith.negf %890 : vector<8x32xf32>
    %892 = math.exp %891 : vector<8x32xf32>
    %cst_238 = arith.constant 1.000000e+00 : f32
    %893 = vector.broadcast %cst_238 : f32 to vector<8x32xf32>
    %894 = arith.addf %893, %892 : vector<8x32xf32>
    %895 = arith.divf %893, %894 : vector<8x32xf32>
    %896 = vector.extract_strided_slice %877 {offsets = [0, 64], sizes = [8, 32], strides = [1, 1]} : vector<8x96xf32> to vector<8x32xf32>
    %897 = vector.extract_strided_slice %879 {offsets = [0, 64], sizes = [8, 32], strides = [1, 1]} : vector<8x96xf32> to vector<8x32xf32>
    %898 = vector.broadcast %5 : vector<1x32xf32> to vector<8x32xf32>
    %899 = arith.addf %897, %898 : vector<8x32xf32>
    %900 = arith.mulf %887, %899 : vector<8x32xf32>
    %901 = arith.addf %896, %900 : vector<8x32xf32>
    %902 = math.tanh %901 : vector<8x32xf32>
    %cst_239 = arith.constant 1.000000e+00 : f32
    %903 = vector.broadcast %cst_239 : f32 to vector<8x32xf32>
    %904 = arith.subf %903, %895 : vector<8x32xf32>
    %905 = arith.mulf %904, %902 : vector<8x32xf32>
    %906 = arith.mulf %895, %859 : vector<8x32xf32>
    %907 = arith.addf %905, %906 : vector<8x32xf32>
    %908 = vector.broadcast %874 : vector<8x1xf32> to vector<8x32xf32>
    %909 = arith.mulf %908, %907 : vector<8x32xf32>
    %cst_240 = arith.constant 1.000000e+00 : f32
    %910 = vector.broadcast %cst_240 : f32 to vector<8x1xf32>
    %911 = arith.subf %910, %874 : vector<8x1xf32>
    %912 = vector.broadcast %911 : vector<8x1xf32> to vector<8x32xf32>
    %913 = arith.mulf %912, %859 : vector<8x32xf32>
    %914 = arith.addf %909, %913 : vector<8x32xf32>
    %915 = arith.index_cast %870 : i32 to index
    %c0_241 = arith.constant 0 : index
    %c0_242 = arith.constant 0 : index
    %916 = vector.load %arg9[%915, %c0_241, %c0_242] : memref<8x8x32xf32, #tpu.memory_space<vmem>>, vector<1x8x32xf32>
    %917 = vector.shape_cast %916 : vector<1x8x32xf32> to vector<8x32xf32>
    %918 = vector.broadcast %874 : vector<8x1xf32> to vector<8x32xf32>
    %919 = arith.mulf %918, %914 : vector<8x32xf32>
    %920 = arith.addf %917, %919 : vector<8x32xf32>
    %921 = arith.index_cast %870 : i32 to index
    %c0_243 = arith.constant 0 : index
    %c0_244 = arith.constant 0 : index
    %922 = vector.load %arg9[%921, %c0_243, %c0_244] : memref<8x8x32xf32, #tpu.memory_space<vmem>>, vector<1x8x32xf32>
    %923 = vector.shape_cast %922 : vector<1x8x32xf32> to vector<8x32xf32>
    %924 = vector.shape_cast %920 : vector<8x32xf32> to vector<1x8x32xf32>
    tpu.vector_store %arg9[%921, %c0_243, %c0_244], %924 {strides = array<i32>} : memref<8x8x32xf32, #tpu.memory_space<vmem>>, vector<1x8x32xf32>,
    %c7_i32_245 = arith.constant 7 : i32
    %c7_i32_246 = arith.constant 7 : i32
    %925 = arith.subi %c7_i32_246, %c7_i32_245 : i32
    %926 = vector.broadcast %925 : i32 to vector<8x1xi32>
    %927 = arith.cmpi slt, %926, %6 : vector<8x1xi32>
    %928 = arith.extui %927 : vector<8x1xi1> to vector<8x1xi32>
    %929 = arith.sitofp %928 : vector<8x1xi32> to vector<8x1xf32>
    %930 = arith.index_cast %925 : i32 to index
    %c0_247 = arith.constant 0 : index
    %c0_248 = arith.constant 0 : index
    %931 = vector.load %arg12[%930, %c0_247, %c0_248] : memref<8x8x96xf32, #tpu.memory_space<vmem>>, vector<1x8x96xf32>
    %932 = vector.shape_cast %931 : vector<1x8x96xf32> to vector<8x96xf32>
    %933 = arith.truncf %914 : vector<8x32xf32> to vector<8x32xbf16>
    %cst_249 = arith.constant dense<0.000000e+00> : vector<8x96xf32>
    %934 = tpu.matmul %933, %3, %cst_249 {dimension_numbers = #tpu.dot_dimension_numbers<[1], [0], [0], [1], [0, 0, 1, 1], [], []>} : vector<8x32xbf16>, vector<32x96xbf16>, vector<8x96xf32> -> vector<8x96xf32>
    %935 = vector.extract_strided_slice %932 {offsets = [0, 0], sizes = [8, 32], strides = [1, 1]} : vector<8x96xf32> to vector<8x32xf32>
    %936 = vector.extract_strided_slice %934 {offsets = [0, 0], sizes = [8, 32], strides = [1, 1]} : vector<8x96xf32> to vector<8x32xf32>
    %937 = arith.addf %935, %936 : vector<8x32xf32>
    %938 = arith.negf %937 : vector<8x32xf32>
    %939 = math.exp %938 : vector<8x32xf32>
    %cst_250 = arith.constant 1.000000e+00 : f32
    %940 = vector.broadcast %cst_250 : f32 to vector<8x32xf32>
    %941 = arith.addf %940, %939 : vector<8x32xf32>
    %942 = arith.divf %940, %941 : vector<8x32xf32>
    %943 = vector.extract_strided_slice %932 {offsets = [0, 32], sizes = [8, 32], strides = [1, 1]} : vector<8x96xf32> to vector<8x32xf32>
    %944 = vector.extract_strided_slice %934 {offsets = [0, 32], sizes = [8, 32], strides = [1, 1]} : vector<8x96xf32> to vector<8x32xf32>
    %945 = arith.addf %943, %944 : vector<8x32xf32>
    %946 = arith.negf %945 : vector<8x32xf32>
    %947 = math.exp %946 : vector<8x32xf32>
    %cst_251 = arith.constant 1.000000e+00 : f32
    %948 = vector.broadcast %cst_251 : f32 to vector<8x32xf32>
    %949 = arith.addf %948, %947 : vector<8x32xf32>
    %950 = arith.divf %948, %949 : vector<8x32xf32>
    %951 = vector.extract_strided_slice %932 {offsets = [0, 64], sizes = [8, 32], strides = [1, 1]} : vector<8x96xf32> to vector<8x32xf32>
    %952 = vector.extract_strided_slice %934 {offsets = [0, 64], sizes = [8, 32], strides = [1, 1]} : vector<8x96xf32> to vector<8x32xf32>
    %953 = vector.broadcast %5 : vector<1x32xf32> to vector<8x32xf32>
    %954 = arith.addf %952, %953 : vector<8x32xf32>
    %955 = arith.mulf %942, %954 : vector<8x32xf32>
    %956 = arith.addf %951, %955 : vector<8x32xf32>
    %957 = math.tanh %956 : vector<8x32xf32>
    %cst_252 = arith.constant 1.000000e+00 : f32
    %958 = vector.broadcast %cst_252 : f32 to vector<8x32xf32>
    %959 = arith.subf %958, %950 : vector<8x32xf32>
    %960 = arith.mulf %959, %957 : vector<8x32xf32>
    %961 = arith.mulf %950, %914 : vector<8x32xf32>
    %962 = arith.addf %960, %961 : vector<8x32xf32>
    %963 = vector.broadcast %929 : vector<8x1xf32> to vector<8x32xf32>
    %964 = arith.mulf %963, %962 : vector<8x32xf32>
    %cst_253 = arith.constant 1.000000e+00 : f32
    %965 = vector.broadcast %cst_253 : f32 to vector<8x1xf32>
    %966 = arith.subf %965, %929 : vector<8x1xf32>
    %967 = vector.broadcast %966 : vector<8x1xf32> to vector<8x32xf32>
    %968 = arith.mulf %967, %914 : vector<8x32xf32>
    %969 = arith.addf %964, %968 : vector<8x32xf32>
    %970 = arith.index_cast %925 : i32 to index
    %c0_254 = arith.constant 0 : index
    %c0_255 = arith.constant 0 : index
    %971 = vector.load %arg9[%970, %c0_254, %c0_255] : memref<8x8x32xf32, #tpu.memory_space<vmem>>, vector<1x8x32xf32>
    %972 = vector.shape_cast %971 : vector<1x8x32xf32> to vector<8x32xf32>
    %973 = vector.broadcast %929 : vector<8x1xf32> to vector<8x32xf32>
    %974 = arith.mulf %973, %969 : vector<8x32xf32>
    %975 = arith.addf %972, %974 : vector<8x32xf32>
    %976 = arith.index_cast %925 : i32 to index
    %c0_256 = arith.constant 0 : index
    %c0_257 = arith.constant 0 : index
    %977 = vector.load %arg9[%976, %c0_256, %c0_257] : memref<8x8x32xf32, #tpu.memory_space<vmem>>, vector<1x8x32xf32>
    %978 = vector.shape_cast %977 : vector<1x8x32xf32> to vector<8x32xf32>
    %979 = vector.shape_cast %975 : vector<8x32xf32> to vector<1x8x32xf32>
    tpu.vector_store %arg9[%976, %c0_256, %c0_257], %979 {strides = array<i32>} : memref<8x8x32xf32, #tpu.memory_space<vmem>>, vector<1x8x32xf32>,
    %c8_i32_258 = arith.constant 8 : i32
    %c1 = arith.constant 1 : index
    %c0_259 = arith.constant 0 : index
    %c0_260 = arith.constant 0 : index
    %980 = vector.load %arg10[%c1, %c0_259, %c0_260] : memref<2x8x32xf32, #tpu.memory_space<vmem>>, vector<1x8x32xf32>
    %981 = vector.shape_cast %980 : vector<1x8x32xf32> to vector<8x32xf32>
    %982 = vector.shape_cast %969 : vector<8x32xf32> to vector<1x8x32xf32>
    tpu.vector_store %arg10[%c1, %c0_259, %c0_260], %982 {strides = array<i32>} : memref<2x8x32xf32, #tpu.memory_space<vmem>>, vector<1x8x32xf32>,
    return
  }
  func.func @transform_0(%arg0: i32) -> (i32, i32, i32) {
    %c0_i32 = arith.constant 0 : i32
    %c0_i32_0 = arith.constant 0 : i32
    %c0_i32_1 = arith.constant 0 : i32
    return %c0_i32, %arg0, %c0_i32_0 : i32, i32, i32
  }
  func.func @transform_1(%arg0: i32) -> (i32, i32) {
    %c0_i32 = arith.constant 0 : i32
    %c0_i32_0 = arith.constant 0 : i32
    return %arg0, %c0_i32 : i32, i32
  }
  func.func @transform_2(%arg0: i32) -> (i32, i32) {
    %c0_i32 = arith.constant 0 : i32
    %c0_i32_0 = arith.constant 0 : i32
    %c0_i32_1 = arith.constant 0 : i32
    return %c0_i32, %c0_i32_0 : i32, i32
  }
  func.func @transform_3(%arg0: i32) -> (i32, i32) {
    %c0_i32 = arith.constant 0 : i32
    %c0_i32_0 = arith.constant 0 : i32
    %c0_i32_1 = arith.constant 0 : i32
    return %c0_i32, %c0_i32_0 : i32, i32
  }
  func.func @transform_4(%arg0: i32) -> (i32, i32) {
    %c0_i32 = arith.constant 0 : i32
    %c0_i32_0 = arith.constant 0 : i32
    %c0_i32_1 = arith.constant 0 : i32
    return %c0_i32, %c0_i32_0 : i32, i32
  }
  func.func @transform_5(%arg0: i32) -> (i32, i32) {
    %c0_i32 = arith.constant 0 : i32
    %c0_i32_0 = arith.constant 0 : i32
    %c0_i32_1 = arith.constant 0 : i32
    return %c0_i32, %c0_i32_0 : i32, i32
  }
  func.func @transform_6(%arg0: i32) -> (i32, i32) {
    %c0_i32 = arith.constant 0 : i32
    %c0_i32_0 = arith.constant 0 : i32
    %c0_i32_1 = arith.constant 0 : i32
    return %c0_i32, %c0_i32_0 : i32, i32
  }
  func.func @transform_7(%arg0: i32) -> (i32, i32) {
    %c0_i32 = arith.constant 0 : i32
    %c0_i32_0 = arith.constant 0 : i32
    %c0_i32_1 = arith.constant 0 : i32
    return %c0_i32, %c0_i32_0 : i32, i32
  }
  func.func @transform_8(%arg0: i32) -> (i32, i32, i32) {
    %c0_i32 = arith.constant 0 : i32
    %c0_i32_0 = arith.constant 0 : i32
    %c0_i32_1 = arith.constant 0 : i32
    return %c0_i32, %arg0, %c0_i32_0 : i32, i32, i32
  }
  func.func @transform_9(%arg0: i32) -> (i32, i32, i32) {
    %c0_i32 = arith.constant 0 : i32
    %c0_i32_0 = arith.constant 0 : i32
    %c0_i32_1 = arith.constant 0 : i32
    return %c0_i32, %arg0, %c0_i32_0 : i32, i32, i32
  }
}

</mosaic_0001>

<bundles_post_ra>
// kernel: tpu_custom_call.1
= control target key start
LH: loop header
LB: loop body
LE: loop exit
PB: predicated region body
PF: predicated region fallthrough
CT: control target
= control target key end

     0   :  { %15 = vsyncpa [#allocation5], 0  ;;  %s3400_s0 = inlined_call_operand.hbm [shape: bf16[8,8,32], index: 0, kind: input, shape index: {}]   ;;  %s3401_s1 = inlined_call_operand.vmem [shape: s32[8,1], index: 1, kind: input, shape index: {}]   ;;  %s3402_s2 = inlined_call_operand.hbm [shape: bf16[32,192], index: 2, kind: input, shape index: {}]   ;;  %s3403_s3 = inlined_call_operand.vmem [shape: f32[1,192], index: 3, kind: input, shape index: {}]   ;;  %s3404_s4 = inlined_call_operand.vmem [shape: bf16[32,96], index: 4, kind: input, shape index: {}]   ;;  %s3405_s5 = inlined_call_operand.vmem [shape: f32[1,32], index: 5, kind: input, shape index: {}]   ;;  %s3406_s6 = inlined_call_operand.hbm [shape: bf16[32,96], index: 6, kind: input, shape index: {}]   ;;  %s3407_s7 = inlined_call_operand.vmem [shape: f32[1,32], index: 7, kind: input, shape index: {}]   ;;  %s3408_s8 = inlined_call_operand.hbm [shape: f32[8,8,32], index: 8, kind: output, shape index: {0}]   ;;  %s3409_s9 = inlined_call_operand.hbm [shape: f32[2,8,32], index: 9, kind: output, shape index: {1}]  }
   0x1   :  { %16 = vsyncpa [#allocation8], 0 }
   0x2   :  { %17 = vsyncpa [#allocation6], 0 }
   0x3   :  { %18 = vsyncpa [#allocation12], 0  ;;  %s2610_s30 = smov [#allocation7]   ;;  %s2492_s13 = scalar_lea.hbm %s3402_s2, 512 }
   0x4   :  { %s38_s10 = sshll.u32 %s2610_s30, 4  ;;  %p2493_p0 = scmp.ne.s32.totalorder %s3402_s2, %s2492_s13  ;;  %s39_s10 = int_to_ptr.vmem [resolvable:$true] %s38_s10 }
   0x5   :  { %p2496_p1 = scmp.lt.u32.totalorder %s2492_s13, %s3402_s2 }
   0x7   :  { %p2498_p2 = pnand %p2496_p1, %p2493_p0 }
   0x9   :  { %2501 = shalt.err (!%p2498_p2)
}
   0xa   :  { %s2502_s18 = scalar_lea.vmem %s39_s10, 512  ;;  %p2507_p4 = scmp.lt.s32.totalorder %s39_s10, %s39_s10 }
   0xb   :  { %p2503_p3 = scmp.ne.s32.totalorder %s39_s10, %s2502_s18  ;;  %p2508_p5 = scmp.lt.s32.totalorder %s2502_s18, %s2502_s18 }
   0xd   :  { %p2509_p6 = por %p2508_p5, %p2507_p4 }
   0xf   :  { %p2510_p7 = pnand %p2509_p6, %p2503_p3 }
  0x11   :  { %2513 = shalt.err (!%p2510_p7)
}
  0x12   :  { %s2611_s19 = smov 128   ;;  %s2612_s20 = smov 8  }
  0x13   :  { %44 = dma.hbm_to_vmem [thread:$0]  %s3402_s2, 512, %s39_s10, [#allocation8], %s2611_s19, %s2611_s19, %s2612_s20  }
  0x14   :  { %s2613_s23 = smov [#allocation4]   ;;  %s2514_s27 = scalar_lea.hbm %s3400_s0, 512 }
  0x15   :  { %s24_s24 = sshll.u32 %s2613_s23, 4  ;;  %p2515_p8 = scmp.ne.s32.totalorder %s3400_s0, %s2514_s27  ;;  %s25_s24 = int_to_ptr.vmem [resolvable:$true] %s24_s24 }
  0x16   :  { %p2518_p9 = scmp.lt.u32.totalorder %s2514_s27, %s3400_s0 }
  0x18   :  { %p2520_p10 = pnand %p2518_p9, %p2515_p8 }
  0x1a   :  { %2523 = shalt.err (!%p2520_p10)
}
  0x1b   :  { %s2524_s12 = scalar_lea.vmem %s25_s24, 512  ;;  %p2529_p12 = scmp.lt.s32.totalorder %s25_s24, %s25_s24 }
  0x1c   :  { %p2525_p11 = scmp.ne.s32.totalorder %s25_s24, %s2524_s12  ;;  %p2530_p13 = scmp.lt.s32.totalorder %s2524_s12, %s2524_s12 }
  0x1e   :  { %p2531_p0 = por %p2530_p13, %p2529_p12 }
  0x20   :  { %p2532_p1 = pnand %p2531_p0, %p2525_p11 }
  0x22   :  { %2535 = shalt.err (!%p2532_p1)
}
  0x23   :  { %s2614_s2 = smov 64   ;;  %s2615_s10 = smov 4  }
  0x24   :  { %30 = dma.hbm_to_vmem [thread:$0]  %s3400_s0, 512, %s25_s24, [#allocation5], %s2614_s2, %s2614_s2, %s2615_s10  }
  0x25   :  { %s2616_s15 = smov [#allocation9]   ;;  %s2536_s21 = scalar_lea.hbm %s3406_s6, 256 }
  0x26   :  { %s56_s16 = sshll.u32 %s2616_s15, 4  ;;  %p2537_p2 = scmp.ne.s32.totalorder %s3406_s6, %s2536_s21  ;;  %s57_s16 = int_to_ptr.vmem [resolvable:$true] %s56_s16 }
  0x27   :  { %p2540_p3 = scmp.lt.u32.totalorder %s2536_s21, %s3406_s6 }
  0x29   :  { %p2542_p4 = pnand %p2540_p3, %p2537_p2 }
  0x2b   :  { %2545 = shalt.err (!%p2542_p4)
}
  0x2c   :  { %s2546_s27 = scalar_lea.vmem %s57_s16, 256  ;;  %p2551_p6 = scmp.lt.s32.totalorder %s57_s16, %s57_s16 }
  0x2d   :  { %p2547_p5 = scmp.ne.s32.totalorder %s57_s16, %s2546_s27  ;;  %p2552_p7 = scmp.lt.s32.totalorder %s2546_s27, %s2546_s27 }
  0x2f   :  { %p2553_p8 = por %p2552_p7, %p2551_p6 }
  0x31   :  { %p2554_p9 = pnand %p2553_p8, %p2547_p5 }
  0x33   :  { %2557 = shalt.err (!%p2554_p9)
}
  0x34   :  { %62 = dma.hbm_to_vmem [thread:$0]  %s3406_s6, 256, %s57_s16, [#allocation8], %s2614_s2, %s2614_s2, %s2615_s10  }
  0x35   :  { %2602 = dma.done.wait [#allocation5], 512  }
  0x36   :  { %2603 = vsyncadd [#allocation5], 4294966784 }
  0x37   :  { %2604 = dma.done.wait [#allocation8], 768  }
  0x38   :  { %2605 = vsyncadd [#allocation8], 4294966528  ;;  %v2617_v0 = vmov 0   ;;  %v2721_v1 = vld [vmem:[#allocation7 + $0x4] ss:$8 sps:$4 sm:$0xff]   ;;  %vm123_vm0 = vcmask 261120   ;;  %v93_v13 = vlaneseq }
  0x39   :  { %159 = vmatprep.mubr.bf16.mxu0 %v2617_v0  ;;  %2384 = vset.pattern.permute.xlu1 %v2617_v0  ;;  %v2723_v2 = vld [vmem:[#allocation7] ss:$8 sps:$4 sm:$0xff]   ;;  %v2726_v3 = vld [vmem:[#allocation7 + $0x14] ss:$8 sps:$4 sm:$0xff]   ;;  %v2730_v4 = vld [vmem:[#allocation7 + $0x10] ss:$8 sps:$4 sm:$0xff]  }
  0x3a   :  { %2385 = vset.pattern.permute.xlu0 %v2617_v0  ;;  %216 = vmatprep.mubr.bf16.mxu1 %v2617_v0  ;;  %v91_v5 = vld [vmem:[#allocation4] sm:$0xf]  ;;  %v238_v7 = vld [vmem:[#allocation4 + $0x8] sm:$0xf]  ;;  %v354_v8 = vld [vmem:[#allocation4 + $0x10] sm:$0xf] }
  0x3b   :  { %127 = vmatprep.subr.bf16.mxu0 %v2721_v1  ;;  %184 = vmatprep.subr.bf16.mxu1 %v2721_v1  ;;  %v2154_v6 = vld [vmem:[%s3405_s5] ss:$0 sm:$0xff]  ;;  %v470_v9 = vld [vmem:[#allocation4 + $0x18] sm:$0xf]  ;;  %v2618_v11 = vmov 0.0   ;;  %v2771_v12 = vld [vmem:[%s3404_s4 + $0x8] sm:$0xff]  }
  0x3c   :  { %128 = vmatpush1.bf16.msra.mxu0 %v2723_v2  ;;  %185 = vmatpush1.bf16.msra.mxu1 %v2723_v2  ;;  %v2763_v10 = vld [vmem:[%s3404_s4] sm:$0xff]   ;;  %vm2619_vm1 = vmmov 0   ;;  %v2785_v14 = vshrl.u32 %v93_v13, 7  ;;  %vm168_vm2 = vcmask 785408   ;;  %v296_v59 = vld [vmem:[#allocation4 + $0xc] sm:$0xf] }
  0x3d   :  { %129 = vmatprep.subr.bf16.mxu0 %v2726_v3  ;;  %186 = vmatprep.subr.bf16.mxu1 %v2726_v3  ;;  %v2791_v16 = vld [vmem:[%s3403_s3] sm:$0x3]  ;;  %v180_v57 = vld [vmem:[#allocation4 + $0x4] sm:$0xf]  ;;  %v412_v60 = vld [vmem:[#allocation4 + $0x14] sm:$0xf] }
  0x3e   :  { %656 = vrot.lane.b32.xlu0 %v2154_v6, %s2614_s2  ;;  %v95_v15 = vsub.s32 0, %v2785_v14  ;;  %v2827_v38 = vld [vmem:[%s3401_s1] sm:$0xff]  ;;  %s2620_s1 = smov 96   ;;  %v528_v61 = vld [vmem:[#allocation4 + $0x1c] sm:$0xf]  ;;  %s2621_s15 = smov 32  }
  0x3f   :  { %vm585_vm3 = vcmp.gt.s32.totalorder %v2827_v38, 0  ;;  %vm699_vm4 = vcmp.gt.s32.totalorder %v2827_v38, 1  ;;  %vm798_vm5 = vcmp.gt.s32.totalorder %v2827_v38, 2  ;;  %vm897_vm6 = vcmp.gt.s32.totalorder %v2827_v38, 3  ;;  %s2623_s16 = smov [#allocation11]  }
  0x40   :  { %130 = vmatpush1.bf16.msra.mxu0 %v2730_v4  ;;  %187 = vmatpush1.bf16.msra.mxu1 %v2730_v4  ;;  %v2794_v17 = vrot.slane %v2791_v16, %v95_v15  ;;  %v2150_v44 = vsel %vm585_vm3, 1.0, %v2618_v11  ;;  %vm996_vm7 = vcmp.gt.s32.totalorder %v2827_v38, 4  ;;  %vm1095_vm8 = vcmp.gt.s32.totalorder %v2827_v38, 5  ;;  %s2121_s17 = sshll.u32 %s2623_s16, 4  ;;  %s3362_s17 = int_to_ptr.vmem [resolvable:$true] %s2121_s17 }
  0x41   :  { %242 = vmatprep.subr.bf16.mxu0 %v2721_v1  ;;  %300 = vmatprep.subr.bf16.mxu1 %v2721_v1  ;;  %v685_v46 = vsub.f32 1.0, %v2150_v44  ;;  %vm1194_vm9 = vcmp.gt.s32.totalorder %v2827_v38, 6  ;;  %vm1293_vm10 = vcmp.gt.s32.totalorder %v2827_v38, 7 }
  0x43   :  { %2142 = vmatmul.mubr.msk.bf16.vlgmr.msra.gmra.mrb[0].mxu0 %vm123_vm0, %v91_v5  ;;  %2143 = vmatmul.mubr.msk.bf16.vlgmr.msra.gmra.mrb[0].mxu1 %vm123_vm0, %v180_v57 }
  0x44   :  { %243 = vmatpush1.bf16.msra.mxu0 %v2723_v2  ;;  %274 = vmatprep.mubr.bf16.mxu0 %v2617_v0 }
  0x45   :  { %244 = vmatprep.subr.bf16.mxu0 %v2726_v3  ;;  %301 = vmatpush1.bf16.msra.mxu1 %v2723_v2 }
  0x46   :  { %332 = vmatprep.mubr.bf16.mxu1 %v2617_v0  ;;  %302 = vmatprep.subr.bf16.mxu1 %v2726_v3 }
  0x48   :  { %245 = vmatpush1.bf16.msra.mxu0 %v2730_v4 }
  0x49   :  { %358 = vmatprep.subr.bf16.mxu0 %v2721_v1  ;;  %303 = vmatpush1.bf16.msra.mxu1 %v2730_v4 }
  0x4a   :  { %416 = vmatprep.subr.bf16.mxu1 %v2721_v1 }
  0x4b   :  { %2144 = vmatmul.mubr.msk.bf16.vlgmr.msra.gmra.mrb[4].mxu0 %vm123_vm0, %v238_v7 }
  0x4c   :  { %359 = vmatpush1.bf16.msra.mxu0 %v2723_v2  ;;  %390 = vmatprep.mubr.bf16.mxu0 %v2617_v0 }
  0x4d   :  { %360 = vmatprep.subr.bf16.mxu0 %v2726_v3  ;;  %2145 = vmatmul.mubr.msk.bf16.vlgmr.msra.gmra.mrb[4].mxu1 %vm123_vm0, %v296_v59 }
  0x4e   :  { %417 = vmatpush1.bf16.msra.mxu1 %v2723_v2  ;;  %448 = vmatprep.mubr.bf16.mxu1 %v2617_v0 }
  0x4f   :  { %418 = vmatprep.subr.bf16.mxu1 %v2726_v3 }
  0x50   :  { %361 = vmatpush1.bf16.msra.mxu0 %v2730_v4 }
  0x51   :  { %474 = vmatprep.subr.bf16.mxu0 %v2721_v1 }
  0x52   :  { %419 = vmatpush1.bf16.msra.mxu1 %v2730_v4 }
  0x53   :  { %2146 = vmatmul.mubr.msk.bf16.vlgmr.msra.gmra.mrb[8].mxu0 %vm123_vm0, %v354_v8  ;;  %532 = vmatprep.subr.bf16.mxu1 %v2721_v1 }
  0x54   :  { %475 = vmatpush1.bf16.msra.mxu0 %v2723_v2  ;;  %506 = vmatprep.mubr.bf16.mxu0 %v2617_v0 }
  0x55   :  { %476 = vmatprep.subr.bf16.mxu0 %v2726_v3  ;;  %2147 = vmatmul.mubr.msk.bf16.vlgmr.msra.gmra.mrb[8].mxu1 %vm123_vm0, %v412_v60 }
  0x56   :  { %533 = vmatpush1.bf16.msra.mxu1 %v2723_v2  ;;  %564 = vmatprep.mubr.bf16.mxu1 %v2617_v0 }
  0x57   :  { %534 = vmatprep.subr.bf16.mxu1 %v2726_v3 }
  0x58   :  { %477 = vmatpush1.bf16.msra.mxu0 %v2730_v4 }
  0x59   :  { %2242 = vmatprep.subr.bf16.mxu0 %v2618_v11 }
  0x5a   :  { %535 = vmatpush1.bf16.msra.mxu1 %v2730_v4 }
  0x5b   :  { %2148 = vmatmul.mubr.msk.bf16.vlgmr.msra.gmra.mrb[12].mxu0 %vm123_vm0, %v470_v9  ;;  %2250 = vmatprep.subr.bf16.mxu1 %v2618_v11 }
  0x5c   :  { %2243 = vmatpush3.bf16.msra.mxu0 %v2763_v10  ;;  %2246 = vmatprep.mubr.msk.bf16.mxu0 %vm2619_vm1, %v2618_v11 }
  0x5d   :  { %2244 = vmatprep.subr.bf16.mxu0 %v2618_v11  ;;  %2149 = vmatmul.mubr.msk.bf16.vlgmr.msra.gmra.mrb[12].mxu1 %vm123_vm0, %v528_v61 }
  0x5e   :  { %2251 = vmatpush3.bf16.msra.mxu1 %v2763_v10  ;;  %2254 = vmatprep.mubr.msk.bf16.mxu1 %vm2619_vm1, %v2618_v11 }
  0x5f   :  { %2252 = vmatprep.subr.bf16.mxu1 %v2618_v11 }
  0x60   :  { %2245 = vmatpush3.bf16.msra.mxu0 %v2771_v12 }
  0x61   :  { %2258 = vmatprep.subr.bf16.mxu0 %v2618_v11 }
  0x62   :  { %2253 = vmatpush3.bf16.msra.mxu1 %v2771_v12 }
  0x63   :  { %2247 = vmatmul.mubr.bf16.vlgmr.msra.gmra.mrb[16].mxu0 %v2617_v0  ;;  %2266 = vmatprep.subr.bf16.mxu1 %v2618_v11 }
  0x64   :  { %2259 = vmatpush3.bf16.msra.mxu0 %v2763_v10  ;;  %2262 = vmatprep.mubr.msk.bf16.mxu0 %vm2619_vm1, %v2618_v11 }
  0x65   :  { %2260 = vmatprep.subr.bf16.mxu0 %v2618_v11 }
  0x68   :  { %2261 = vmatpush3.bf16.msra.mxu0 %v2771_v12 }
  0x69   :  { %2274 = vmatprep.subr.bf16.mxu0 %v2618_v11 }
  0xb0   :  { %v2829_v39 = vpop.permute.xlu0 %656 }
 0x116   :  { %v161_v18 = vpop.f32.mrb[0].mxu0  ;;  %v218_v13 = vpop.f32.mrb[0].mxu1 }
 0x117   :  { %v2797_v19 = vadd.f32 %v161_v18, %v2794_v17  ;;  %v2799_v20 = vpop.f32.mrb[1].mxu0  ;;  %v2874_v15 = vadd.f32 %v218_v13, %v2794_v17  ;;  %v2876_v18 = vpop.f32.mrb[1].mxu1 }
 0x118   :  { %v165_v21 = vpop.f32.mrb[2].mxu0 }
 0x119   :  { %169 = vst.msk [vmem:[#allocation2] sm:$0xff] %vm168_vm2, %v2797_v19  ;;  %v166_v22 = vpop.f32.mrb[3].mxu0  ;;  %v222_v21 = vpop.f32.mrb[2].mxu1  ;;  %226 = vst.msk [vmem:[#allocation2 + $0x8] sm:$0xff] %vm168_vm2, %v2874_v15 }
 0x11a   :  { %v223_v22 = vpop.f32.mrb[3].mxu1 }
 0x11e   :  { %v276_v23 = vpop.f32.mrb[4].mxu0 }
 0x11f   :  { %v2804_v24 = vadd.f32 %v276_v23, %v2794_v17  ;;  %v2806_v25 = vpop.f32.mrb[5].mxu0 }
 0x120   :  { %v280_v26 = vpop.f32.mrb[6].mxu0  ;;  %v588_v47 = vld [vmem:[#allocation2] sm:$0xff]  ;;  %v334_v23 = vpop.f32.mrb[4].mxu1 }
 0x121   :  { %284 = vst.msk [vmem:[#allocation2 + $0x10] sm:$0xff] %vm168_vm2, %v2804_v24  ;;  %v281_v27 = vpop.f32.mrb[7].mxu0  ;;  %v2881_v26 = vadd.f32 %v334_v23, %v2794_v17 }
 0x122   :  { %v2883_v27 = vpop.f32.mrb[5].mxu1 }
 0x123   :  { %342 = vst.msk [vmem:[#allocation2 + $0x18] sm:$0xff] %vm168_vm2, %v2881_v26 }
 0x126   :  { %v392_v28 = vpop.f32.mrb[8].mxu0 }
 0x127   :  { %v2811_v29 = vadd.f32 %v392_v28, %v2794_v17  ;;  %v2813_v30 = vpop.f32.mrb[9].mxu0  ;;  %v338_v28 = vpop.f32.mrb[6].mxu1 }
 0x128   :  { %v396_v31 = vpop.f32.mrb[10].mxu0 }
 0x129   :  { %400 = vst.msk [vmem:[#allocation2 + $0x20] sm:$0xff] %vm168_vm2, %v2811_v29  ;;  %v397_v32 = vpop.f32.mrb[11].mxu0  ;;  %v339_v31 = vpop.f32.mrb[7].mxu1 }
 0x12a   :  { %v450_v32 = vpop.f32.mrb[8].mxu1 }
 0x12e   :  { %v508_v33 = vpop.f32.mrb[12].mxu0 }
 0x12f   :  { %v2818_v34 = vadd.f32 %v508_v33, %v2794_v17  ;;  %v2820_v35 = vpop.f32.mrb[13].mxu0  ;;  %v2888_v33 = vadd.f32 %v450_v32, %v2794_v17 }
 0x130   :  { %v512_v36 = vpop.f32.mrb[14].mxu0 }
 0x131   :  { %516 = vst.msk [vmem:[#allocation2 + $0x30] sm:$0xff] %vm168_vm2, %v2818_v34  ;;  %v513_v37 = vpop.f32.mrb[15].mxu0  ;;  %v2890_v36 = vpop.f32.mrb[9].mxu1  ;;  %458 = vst.msk [vmem:[#allocation2 + $0x28] sm:$0xff] %vm168_vm2, %v2888_v33 }
 0x132   :  { %v454_v37 = vpop.f32.mrb[10].mxu1 }
 0x136   :  { %v638_v40 = vpop.f32.mrb[16].mxu0 }
 0x137   :  { %v2248_v41 = vpop.f32.mrb[17].mxu0  ;;  %v659_v42 = vadd.f32 %v2829_v39, %v638_v40  ;;  %v644_v48 = vadd.f32 %v638_v40, %v588_v47  ;;  %v455_v40 = vpop.f32.mrb[11].mxu1 }
 0x138   :  { %v641_v43 = vpop.f32.mrb[18].mxu0  ;;  %v566_v41 = vpop.f32.mrb[12].mxu1 }
 0x139   :  { %661 = vrot.lane.b32.xlu0 %v659_v42, %s2614_s2  ;;  %v2249_v45 = vpop.f32.mrb[19].mxu0  ;;  %v2153_v49 = vmul.f32 -1.442695, %v644_v48  ;;  %v2895_v42 = vadd.f32 %v566_v41, %v2794_v17  ;;  %v2897_v43 = vpop.f32.mrb[13].mxu1 }
 0x13b   :  { %2396 = vpow2.f32 %v2153_v49  ;;  %574 = vst.msk [vmem:[#allocation2 + $0x38] sm:$0xff] %vm168_vm2, %v2895_v42 }
 0x13d   :  { %688 = vperm.xlu0 %2385, %v685_v46  }
 0x145   :  { %v2397_v50 = vpop.eup %2396 }
 0x146   :  { %v648_v51 = vadd.f32 1.0, %v2397_v50 }
 0x148   :  { %2398 = vrcp.f32 %v648_v51  ;;  %v2155_v51 = vsel %vm699_vm4, 1.0, %v2618_v11 }
 0x149   :  { %v783_v60 = vsub.f32 1.0, %v2155_v51 }
 0x152   :  { %v2399_v52 = vpop.eup %2398 }
 0x153   :  { %v671_v63 = vsub.f32 1.0, %v2399_v52  ;;  %v677_v3 = vmul.f32 0.0, %v2399_v52 }
 0x1ab   :  { %v662_v53 = vpop.permute.xlu0 %661 }
 0x1ac   :  { %v664_v54 = vmul.f32 %v2399_v52, %v662_v53  ;;  %v702_v52 = vld [vmem:[#allocation2 + $0x8] sm:$0xff] }
 0x1ae   :  { %666 = vrot.lane.b32.xlu1 %v664_v54, %s2614_s2 }
 0x1b2   :  { %681 = vperm.xlu1 %2384, %v2150_v44   ;;  %v570_v44 = vpop.f32.mrb[14].mxu1 }
 0x1b3   :  { %v571_v45 = vpop.f32.mrb[15].mxu1 }
 0x1b4   :  { %v2158_v45 = vsel %vm798_vm5, 1.0, %v2618_v11 }
 0x1bc   :  { %v2864_v2 = vpop.permute.xlu0 %688 }
 0x1bd   :  { %v691_v6 = vmul.f32 0.0, %v2864_v2 }
 0x220   :  { %v667_v55 = vpop.permute.xlu1 %666 }
 0x221   :  { %v669_v56 = vadd.f32 %v667_v55, %v588_v47 }
 0x223   :  { %2400 = vtanh.f32 %v669_v56 }
 0x22d   :  { %v2401_v58 = vpop.eup %2400 }
 0x22e   :  { %673 = vrot.lane.b32.xlu1 %v2401_v58, %s2620_s1 }
 0x231   :  { %v2862_v62 = vpop.permute.xlu1 %681 }
 0x2a0   :  { %v674_v1 = vpop.permute.xlu1 %673 }
 0x2a1   :  { %v676_v4 = vmul.f32 %v674_v1, %v671_v63 }
 0x2a3   :  { %v678_v5 = vadd.f32 %v677_v3, %v676_v4 }
 0x2a5   :  { %v684_v7 = vmul.f32 %v2862_v62, %v678_v5 }
 0x2a7   :  { %v2868_v8 = vadd.f32 %v691_v6, %v684_v7 }
 0x2a9   :  { %v703_v9 = vpack.c.bf16 %v2868_v8, %v2868_v8 }
 0x2ab   :  { %705 = vrot.lane.b32.xlu1 %v703_v9, %s2620_s1 }
 0x31d   :  { %v706_v46 = vpop.permute.xlu1 %705 }
 0x31e   :  { %2255 = vmatmul.mubr.msk.bf16.vlgmr.msra.gmra.mrb[16].mxu1 %vm123_vm0, %v706_v46  ;;  %v801_v46 = vld [vmem:[#allocation2 + $0x10] sm:$0xff] }
 0x31f   :  { %2267 = vmatpush3.bf16.msra.mxu1 %v2763_v10  ;;  %2270 = vmatprep.mubr.msk.bf16.mxu1 %vm2619_vm1, %v2618_v11 }
 0x320   :  { %2268 = vmatprep.subr.bf16.mxu1 %v2618_v11 }
 0x323   :  { %2269 = vmatpush3.bf16.msra.mxu1 %v2771_v12 }
 0x324   :  { %2282 = vmatprep.subr.bf16.mxu1 %v2618_v11 }
 0x3f1   :  { %v744_v17 = vpop.f32.mrb[16].mxu1 }
 0x3f2   :  { %v2256_v47 = vpop.f32.mrb[17].mxu1  ;;  %v757_v48 = vadd.f32 %v744_v17, %v2829_v39  ;;  %v750_v53 = vadd.f32 %v744_v17, %v702_v52 }
 0x3f3   :  { %v747_v49 = vpop.f32.mrb[18].mxu1 }
 0x3f4   :  { %759 = vrot.lane.b32.xlu0 %v757_v48, %s2614_s2  ;;  %v2257_v50 = vpop.f32.mrb[19].mxu1  ;;  %v2157_v54 = vmul.f32 -1.442695, %v750_v53  ;;  %v882_v53 = vsub.f32 1.0, %v2158_v45 }
 0x3f6   :  { %2402 = vpow2.f32 %v2157_v54 }
 0x3f8   :  { %779 = vperm.xlu0 %2385, %v2155_v51  }
 0x400   :  { %v2403_v55 = vpop.eup %2402 }
 0x401   :  { %v754_v56 = vadd.f32 1.0, %v2403_v55 }
 0x403   :  { %2404 = vrcp.f32 %v754_v56 }
 0x40d   :  { %v2405_v57 = vpop.eup %2404 }
 0x40e   :  { %v769_v4 = vsub.f32 1.0, %v2405_v57  ;;  %v775_v6 = vmul.f32 %v2405_v57, %v2868_v8 }
 0x466   :  { %v760_v58 = vpop.permute.xlu0 %759 }
 0x467   :  { %v762_v59 = vmul.f32 %v2405_v57, %v760_v58 }
 0x469   :  { %764 = vrot.lane.b32.xlu1 %v762_v59, %s2614_s2 }
 0x46d   :  { %786 = vperm.xlu1 %2384, %v783_v60  }
 0x477   :  { %v2914_v3 = vpop.permute.xlu0 %779 }
 0x4db   :  { %v765_v61 = vpop.permute.xlu1 %764 }
 0x4dc   :  { %v767_v63 = vadd.f32 %v765_v61, %v702_v52 }
 0x4de   :  { %2406 = vtanh.f32 %v767_v63 }
 0x4e8   :  { %v2407_v1 = vpop.eup %2406 }
 0x4e9   :  { %771 = vrot.lane.b32.xlu0 %v2407_v1, %s2620_s1 }
 0x4ec   :  { %v2917_v9 = vpop.permute.xlu1 %786 }
 0x4ed   :  { %v789_v21 = vmul.f32 %v2917_v9, %v2868_v8 }
 0x55b   :  { %v772_v5 = vpop.permute.xlu0 %771 }
 0x55c   :  { %v774_v7 = vmul.f32 %v772_v5, %v769_v4 }
 0x55e   :  { %v776_v13 = vadd.f32 %v775_v6, %v774_v7 }
 0x560   :  { %v782_v22 = vmul.f32 %v2914_v3, %v776_v13 }
 0x562   :  { %v2922_v23 = vadd.f32 %v789_v21, %v782_v22 }
 0x564   :  { %v802_v28 = vpack.c.bf16 %v2922_v23, %v2922_v23 }
 0x566   :  { %804 = vrot.lane.b32.xlu1 %v802_v28, %s2620_s1 }
 0x5d8   :  { %v805_v31 = vpop.permute.xlu1 %804 }
 0x5d9   :  { %2263 = vmatmul.mubr.msk.bf16.vlgmr.msra.gmra.mrb[20].mxu0 %vm123_vm0, %v805_v31 }
 0x5da   :  { %2275 = vmatpush3.bf16.msra.mxu0 %v2763_v10  ;;  %2278 = vmatprep.mubr.msk.bf16.mxu0 %vm2619_vm1, %v2618_v11 }
 0x5db   :  { %2276 = vmatprep.subr.bf16.mxu0 %v2618_v11 }
 0x5de   :  { %2277 = vmatpush3.bf16.msra.mxu0 %v2771_v12 }
 0x5df   :  { %2290 = vmatprep.subr.bf16.mxu0 %v2618_v11 }
 0x6ac   :  { %v843_v32 = vpop.f32.mrb[20].mxu0 }
 0x6ad   :  { %v2264_v37 = vpop.f32.mrb[21].mxu0  ;;  %v856_v40 = vadd.f32 %v843_v32, %v2829_v39  ;;  %v849_v17 = vadd.f32 %v843_v32, %v801_v46 }
 0x6ae   :  { %v846_v41 = vpop.f32.mrb[22].mxu0  ;;  %v2161_v37 = vsel %vm897_vm6, 1.0, %v2618_v11 }
 0x6af   :  { %858 = vrot.lane.b32.xlu0 %v856_v40, %s2614_s2  ;;  %v2265_v44 = vpop.f32.mrb[23].mxu0  ;;  %v2160_v47 = vmul.f32 -1.442695, %v849_v17  ;;  %v900_v40 = vld [vmem:[#allocation2 + $0x18] sm:$0xff] }
 0x6b1   :  { %2408 = vpow2.f32 %v2160_v47 }
 0x6b3   :  { %878 = vperm.xlu0 %2385, %v2158_v45  }
 0x6bb   :  { %v2409_v48 = vpop.eup %2408 }
 0x6bc   :  { %v853_v49 = vadd.f32 1.0, %v2409_v48 }
 0x6be   :  { %2410 = vrcp.f32 %v853_v49  ;;  %v981_v49 = vsub.f32 1.0, %v2161_v37 }
 0x6c8   :  { %v2411_v50 = vpop.eup %2410 }
 0x6c9   :  { %v868_v58 = vsub.f32 1.0, %v2411_v50  ;;  %v874_v60 = vmul.f32 %v2411_v50, %v2922_v23 }
 0x721   :  { %v859_v51 = vpop.permute.xlu0 %858 }
 0x722   :  { %v861_v52 = vmul.f32 %v2411_v50, %v859_v51 }
 0x724   :  { %863 = vrot.lane.b32.xlu1 %v861_v52, %s2614_s2 }
 0x728   :  { %885 = vperm.xlu1 %2384, %v882_v53  }
 0x732   :  { %v2940_v57 = vpop.permute.xlu0 %878 }
 0x796   :  { %v864_v54 = vpop.permute.xlu1 %863 }
 0x797   :  { %v866_v55 = vadd.f32 %v864_v54, %v801_v46 }
 0x799   :  { %2412 = vtanh.f32 %v866_v55 }
 0x7a3   :  { %v2413_v56 = vpop.eup %2412 }
 0x7a4   :  { %870 = vrot.lane.b32.xlu0 %v2413_v56, %s2620_s1 }
 0x7a7   :  { %v2943_v63 = vpop.permute.xlu1 %885 }
 0x7a8   :  { %v888_v4 = vmul.f32 %v2943_v63, %v2922_v23 }
 0x816   :  { %v871_v59 = vpop.permute.xlu0 %870 }
 0x817   :  { %v873_v61 = vmul.f32 %v871_v59, %v868_v58 }
 0x819   :  { %v875_v1 = vadd.f32 %v874_v60, %v873_v61 }
 0x81b   :  { %v881_v5 = vmul.f32 %v2940_v57, %v875_v1 }
 0x81d   :  { %v2948_v6 = vadd.f32 %v888_v4, %v881_v5 }
 0x81f   :  { %v901_v7 = vpack.c.bf16 %v2948_v6, %v2948_v6 }
 0x821   :  { %903 = vrot.lane.b32.xlu1 %v901_v7, %s2620_s1 }
 0x893   :  { %v904_v13 = vpop.permute.xlu1 %903 }
 0x894   :  { %2271 = vmatmul.mubr.msk.bf16.vlgmr.msra.gmra.mrb[20].mxu1 %vm123_vm0, %v904_v13 }
 0x895   :  { %2283 = vmatpush3.bf16.msra.mxu1 %v2763_v10  ;;  %2286 = vmatprep.mubr.msk.bf16.mxu1 %vm2619_vm1, %v2618_v11 }
 0x896   :  { %2284 = vmatprep.subr.bf16.mxu1 %v2618_v11 }
 0x899   :  { %2285 = vmatpush3.bf16.msra.mxu1 %v2771_v12 }
 0x89a   :  { %2298 = vmatprep.subr.bf16.mxu1 %v2618_v11 }
 0x967   :  { %v942_v21 = vpop.f32.mrb[20].mxu1 }
 0x968   :  { %v2272_v22 = vpop.f32.mrb[21].mxu1  ;;  %v955_v28 = vadd.f32 %v942_v21, %v2829_v39  ;;  %v948_v41 = vadd.f32 %v942_v21, %v900_v40 }
 0x969   :  { %v945_v31 = vpop.f32.mrb[22].mxu1 }
 0x96a   :  { %957 = vrot.lane.b32.xlu0 %v955_v28, %s2614_s2  ;;  %v2273_v32 = vpop.f32.mrb[23].mxu1  ;;  %v2163_v44 = vmul.f32 -1.442695, %v948_v41 }
 0x96b   :  { %v2164_v32 = vsel %vm996_vm7, 1.0, %v2618_v11 }
 0x96c   :  { %2414 = vpow2.f32 %v2163_v44 }
 0x96e   :  { %977 = vperm.xlu0 %2385, %v2161_v37   ;;  %v999_v37 = vld [vmem:[#allocation2 + $0x20] sm:$0xff] }
 0x976   :  { %v2415_v45 = vpop.eup %2414 }
 0x977   :  { %v952_v46 = vadd.f32 1.0, %v2415_v45 }
 0x979   :  { %2416 = vrcp.f32 %v952_v46 }
 0x983   :  { %v2417_v17 = vpop.eup %2416 }
 0x984   :  { %v967_v54 = vsub.f32 1.0, %v2417_v17  ;;  %v973_v56 = vmul.f32 %v2417_v17, %v2948_v6 }
 0x9dc   :  { %v958_v47 = vpop.permute.xlu0 %957 }
 0x9dd   :  { %v960_v48 = vmul.f32 %v2417_v17, %v958_v47 }
 0x9df   :  { %962 = vrot.lane.b32.xlu1 %v960_v48, %s2614_s2  ;;  %v1080_v48 = vsub.f32 1.0, %v2164_v32 }
 0x9e3   :  { %984 = vperm.xlu1 %2384, %v981_v49  }
 0x9ed   :  { %v2966_v53 = vpop.permute.xlu0 %977 }
 0xa51   :  { %v963_v50 = vpop.permute.xlu1 %962 }
 0xa52   :  { %v965_v51 = vadd.f32 %v963_v50, %v900_v40 }
 0xa54   :  { %2418 = vtanh.f32 %v965_v51 }
 0xa5e   :  { %v2419_v52 = vpop.eup %2418 }
 0xa5f   :  { %969 = vrot.lane.b32.xlu0 %v2419_v52, %s2620_s1 }
 0xa62   :  { %v2969_v59 = vpop.permute.xlu1 %984 }
 0xa63   :  { %v987_v61 = vmul.f32 %v2969_v59, %v2948_v6 }
 0xad1   :  { %v970_v55 = vpop.permute.xlu0 %969 }
 0xad2   :  { %v972_v58 = vmul.f32 %v970_v55, %v967_v54 }
 0xad4   :  { %v974_v60 = vadd.f32 %v973_v56, %v972_v58 }
 0xad6   :  { %v980_v1 = vmul.f32 %v2966_v53, %v974_v60 }
 0xad8   :  { %v2974_v4 = vadd.f32 %v987_v61, %v980_v1 }
 0xada   :  { %v1000_v5 = vpack.c.bf16 %v2974_v4, %v2974_v4 }
 0xadc   :  { %1002 = vrot.lane.b32.xlu1 %v1000_v5, %s2620_s1 }
 0xb4e   :  { %v1003_v7 = vpop.permute.xlu1 %1002 }
 0xb4f   :  { %2279 = vmatmul.mubr.msk.bf16.vlgmr.msra.gmra.mrb[24].mxu0 %vm123_vm0, %v1003_v7 }
 0xb50   :  { %2291 = vmatpush3.bf16.msra.mxu0 %v2763_v10  ;;  %2294 = vmatprep.mubr.msk.bf16.mxu0 %vm2619_vm1, %v2618_v11 }
 0xb51   :  { %2292 = vmatprep.subr.bf16.mxu0 %v2618_v11 }
 0xb54   :  { %2293 = vmatpush3.bf16.msra.mxu0 %v2771_v12 }
 0xb55   :  { %2306 = vmatprep.subr.bf16.mxu0 %v2618_v11 }
 0xc22   :  { %v1041_v13 = vpop.f32.mrb[24].mxu0 }
 0xc23   :  { %v2280_v21 = vpop.f32.mrb[25].mxu0  ;;  %v1054_v22 = vadd.f32 %v1041_v13, %v2829_v39  ;;  %v1047_v40 = vadd.f32 %v1041_v13, %v999_v37 }
 0xc24   :  { %v1044_v28 = vpop.f32.mrb[26].mxu0 }
 0xc25   :  { %1056 = vrot.lane.b32.xlu0 %v1054_v22, %s2614_s2  ;;  %v2281_v31 = vpop.f32.mrb[27].mxu0  ;;  %v2166_v41 = vmul.f32 -1.442695, %v1047_v40  ;;  %v1098_v40 = vld [vmem:[#allocation2 + $0x28] sm:$0xff] }
 0xc27   :  { %2420 = vpow2.f32 %v2166_v41 }
 0xc29   :  { %1076 = vperm.xlu0 %2385, %v2164_v32  }
 0xc31   :  { %v2421_v44 = vpop.eup %2420 }
 0xc32   :  { %v1051_v45 = vadd.f32 1.0, %v2421_v44 }
 0xc34   :  { %2422 = vrcp.f32 %v1051_v45 }
 0xc3e   :  { %v2423_v46 = vpop.eup %2422 }
 0xc3f   :  { %v1066_v54 = vsub.f32 1.0, %v2423_v46  ;;  %v1072_v56 = vmul.f32 %v2423_v46, %v2974_v4 }
 0xc97   :  { %v1057_v17 = vpop.permute.xlu0 %1056 }
 0xc98   :  { %v1059_v47 = vmul.f32 %v2423_v46, %v1057_v17 }
 0xc9a   :  { %1061 = vrot.lane.b32.xlu1 %v1059_v47, %s2614_s2 }
 0xc9e   :  { %1083 = vperm.xlu1 %2384, %v1080_v48  }
 0xca8   :  { %v2992_v52 = vpop.permute.xlu0 %1076 }
 0xd0c   :  { %v1062_v49 = vpop.permute.xlu1 %1061 }
 0xd0d   :  { %v1064_v50 = vadd.f32 %v1062_v49, %v999_v37 }
 0xd0f   :  { %2424 = vtanh.f32 %v1064_v50 }
 0xd19   :  { %v2425_v51 = vpop.eup %2424 }
 0xd1a   :  { %1068 = vrot.lane.b32.xlu0 %v2425_v51, %s2620_s1 }
 0xd1d   :  { %v2995_v60 = vpop.permute.xlu1 %1083 }
 0xd1e   :  { %v1086_v1 = vmul.f32 %v2995_v60, %v2974_v4 }
 0xd8c   :  { %v1069_v55 = vpop.permute.xlu0 %1068 }
 0xd8d   :  { %v1071_v58 = vmul.f32 %v1069_v55, %v1066_v54  ;;  %v99_v54 = vsub.s32 1, %v2785_v14  ;;  %v2179_v55 = vld [vmem:[%s3407_s7] ss:$0 sm:$0xff]  ;;  %s2622_s7 = smov [#allocation10]  }
 0xd8f   :  { %v1073_v61 = vadd.f32 %v1072_v56, %v1071_v58  ;;  %v3023_v56 = vrot.slane %v2791_v16, %v99_v54  ;;  %v1197_v54 = vld [vmem:[#allocation2 + $0x30] sm:$0xff] }
 0xd91   :  { %v1079_v5 = vmul.f32 %v2992_v52, %v1073_v61  ;;  %v569_v58 = vadd.f32 %v2897_v43, %v3023_v56 }
 0xd93   :  { %v3000_v7 = vadd.f32 %v1086_v1, %v1079_v5 }
 0xd95   :  { %v1099_v13 = vpack.c.bf16 %v3000_v7, %v3000_v7 }
 0xd97   :  { %1101 = vrot.lane.b32.xlu1 %v1099_v13, %s2620_s1 }
 0xe09   :  { %v1102_v21 = vpop.permute.xlu1 %1101 }
 0xe0a   :  { %2287 = vmatmul.mubr.msk.bf16.vlgmr.msra.gmra.mrb[24].mxu1 %vm123_vm0, %v1102_v21 }
 0xe0b   :  { %2299 = vmatpush3.bf16.msra.mxu1 %v2763_v10  ;;  %2302 = vmatprep.mubr.msk.bf16.mxu1 %vm2619_vm1, %v2618_v11  ;;  %v2167_v10 = vsel %vm1095_vm8, 1.0, %v2618_v11 }
 0xe0c   :  { %2300 = vmatprep.subr.bf16.mxu1 %v2618_v11  ;;  %v1179_v48 = vsub.f32 1.0, %v2167_v10 }
 0xe0f   :  { %2301 = vmatpush3.bf16.msra.mxu1 %v2771_v12 }
 0xe10   :  { %2314 = vmatprep.subr.bf16.mxu1 %v2618_v11 }
 0xedd   :  { %v1140_v22 = vpop.f32.mrb[24].mxu1 }
 0xede   :  { %v2288_v28 = vpop.f32.mrb[25].mxu1  ;;  %v1153_v31 = vadd.f32 %v1140_v22, %v2829_v39  ;;  %v1146_v41 = vadd.f32 %v1140_v22, %v1098_v40 }
 0xedf   :  { %v1143_v32 = vpop.f32.mrb[26].mxu1 }
 0xee0   :  { %1155 = vrot.lane.b32.xlu0 %v1153_v31, %s2614_s2  ;;  %v2289_v37 = vpop.f32.mrb[27].mxu1  ;;  %v2169_v44 = vmul.f32 -1.442695, %v1146_v41 }
 0xee1   :  { %v3046_v37 = vld [vmem:[#allocation9] sm:$0xff]  }
 0xee2   :  { %2426 = vpow2.f32 %v2169_v44 }
 0xee4   :  { %1175 = vperm.xlu0 %2385, %v2167_v10  }
 0xeec   :  { %v2427_v12 = vpop.eup %2426 }
 0xeed   :  { %v1150_v45 = vadd.f32 1.0, %v2427_v12 }
 0xeef   :  { %2428 = vrcp.f32 %v1150_v45 }
 0xef9   :  { %v2429_v46 = vpop.eup %2428 }
 0xefa   :  { %v1165_v14 = vsub.f32 1.0, %v2429_v46  ;;  %v1171_v5 = vmul.f32 %v2429_v46, %v3000_v7 }
 0xf52   :  { %v1156_v17 = vpop.permute.xlu0 %1155 }
 0xf53   :  { %v1158_v47 = vmul.f32 %v2429_v46, %v1156_v17 }
 0xf55   :  { %1160 = vrot.lane.b32.xlu1 %v1158_v47, %s2614_s2 }
 0xf59   :  { %1182 = vperm.xlu1 %2384, %v1179_v48  }
 0xf63   :  { %v3029_v61 = vpop.permute.xlu0 %1175 }
 0xfc7   :  { %v1161_v49 = vpop.permute.xlu1 %1160 }
 0xfc8   :  { %v1163_v50 = vadd.f32 %v1161_v49, %v1098_v40  ;;  %v3050_v40 = vld [vmem:[#allocation9 + $0x8] sm:$0xff]  }
 0xfca   :  { %2430 = vtanh.f32 %v1163_v50 }
 0xfd4   :  { %v2431_v51 = vpop.eup %2430 }
 0xfd5   :  { %1167 = vrot.lane.b32.xlu0 %v2431_v51, %s2620_s1 }
 0xfd8   :  { %v3032_v21 = vpop.permute.xlu1 %1182 }
 0xfd9   :  { %1462 = vrot.lane.b32.xlu0 %v2179_v55, %s2614_s2  ;;  %v1185_v16 = vmul.f32 %v3032_v21, %v3000_v7 }
 0xfdd   :  { %579 = vrot.lane.b32.xlu0 %v569_v58, %s2621_s15 }
0x1047   :  { %v1168_v1 = vpop.permute.xlu0 %1167 }
0x1048   :  { %v1170_v13 = vmul.f32 %v1168_v1, %v1165_v14 }
0x104a   :  { %v1172_v22 = vadd.f32 %v1171_v5, %v1170_v13 }
0x104b   :  { %v3044_v32 = vpop.permute.xlu0 %1462 }
0x104c   :  { %v1178_v28 = vmul.f32 %v3029_v61, %v1172_v22 }
0x104e   :  { %v3037_v31 = vadd.f32 %v1185_v16, %v1178_v28 }
0x104f   :  { %v580_v41 = vpop.permute.xlu0 %579 }
0x1050   :  { %v1198_v43 = vpack.c.bf16 %v3037_v31, %v3037_v31 }
0x1052   :  { %1200 = vrot.lane.b32.xlu1 %v1198_v43, %s2620_s1 }
0x1056   :  { %577 = vrot.lane.b32.xlu1 %v2895_v42, %s2621_s15 }
0x10c4   :  { %v1201_v10 = vpop.permute.xlu1 %1200 }
0x10c5   :  { %2295 = vmatmul.mubr.msk.bf16.vlgmr.msra.gmra.mrb[28].mxu0 %vm123_vm0, %v1201_v10 }
0x10c6   :  { %2307 = vmatpush3.bf16.msra.mxu0 %v3046_v37  ;;  %2310 = vmatprep.mubr.msk.bf16.mxu0 %vm2619_vm1, %v2618_v11 }
0x10c7   :  { %2308 = vmatprep.subr.bf16.mxu0 %v2618_v11 }
0x10c8   :  { %v578_v44 = vpop.permute.xlu1 %577 }
0x10c9   :  { %v581_v42 = vsel %vm123_vm0, %v578_v44, %v580_v41  ;;  %v2170_v44 = vsel %vm1194_vm9, 1.0, %v2618_v11 }
0x10ca   :  { %584 = vst.msk [vmem:[#allocation3 + $0x38] sm:$0xff] %vm168_vm2, %v581_v42  ;;  %2309 = vmatpush3.bf16.msra.mxu0 %v3050_v40 }
0x10cb   :  { %2322 = vmatprep.subr.bf16.mxu0 %v2618_v11 }
0x10cd   :  { %2311 = vmatmul.mubr.bf16.vlgmr.msra.gmra.mrb[32].mxu0 %v2617_v0 }
0x10ce   :  { %2323 = vmatpush3.bf16.msra.mxu0 %v3046_v37  ;;  %2326 = vmatprep.mubr.msk.bf16.mxu0 %vm2619_vm1, %v2618_v11 }
0x10cf   :  { %2324 = vmatprep.subr.bf16.mxu0 %v2618_v11 }
0x10d1   :  { %v1397_v14 = vld [vmem:[#allocation3 + $0x38] sm:$0xff] }
0x10d2   :  { %2325 = vmatpush3.bf16.msra.mxu0 %v3050_v40 }
0x10d3   :  { %2338 = vmatprep.subr.bf16.mxu0 %v2618_v11 }
0x1198   :  { %v1239_v12 = vpop.f32.mrb[28].mxu0 }
0x1199   :  { %v2296_v45 = vpop.f32.mrb[29].mxu0  ;;  %v1252_v46 = vadd.f32 %v1239_v12, %v2829_v39  ;;  %v1245_v55 = vadd.f32 %v1239_v12, %v1197_v54 }
0x119a   :  { %v1242_v17 = vpop.f32.mrb[30].mxu0 }
0x119b   :  { %1254 = vrot.lane.b32.xlu1 %v1252_v46, %s2614_s2  ;;  %v2297_v47 = vpop.f32.mrb[31].mxu0  ;;  %v2172_v58 = vmul.f32 -1.442695, %v1245_v55  ;;  %v1278_v46 = vsub.f32 1.0, %v2170_v44  ;;  %v2173_v17 = vsel %vm1293_vm10, 1.0, %v2618_v11 }
0x119d   :  { %2432 = vpow2.f32 %v2172_v58 }
0x11a0   :  { %v1444_v0 = vpop.f32.mrb[32].mxu0 }
0x11a1   :  { %v1465_v48 = vadd.f32 %v3044_v32, %v1444_v0  ;;  %v2312_v49 = vpop.f32.mrb[33].mxu0  ;;  %v1450_v1 = vadd.f32 %v1444_v0, %v1397_v14 }
0x11a2   :  { %v1447_v50 = vpop.f32.mrb[34].mxu0 }
0x11a3   :  { %1467 = vrot.lane.b32.xlu0 %v1465_v48, %s2614_s2  ;;  %v2313_v51 = vpop.f32.mrb[35].mxu0  ;;  %v2178_v5 = vmul.f32 -1.442695, %v1450_v1 }
0x11a4   :  { %v1377_v51 = vsub.f32 1.0, %v2173_v17 }
0x11a5   :  { %2434 = vpow2.f32 %v2178_v5 }
0x11a7   :  { %v2433_v13 = vpop.eup %2432 }
0x11a8   :  { %v1249_v22 = vadd.f32 1.0, %v2433_v13 }
0x11aa   :  { %2436 = vrcp.f32 %v1249_v22 }
0x11af   :  { %v2435_v16 = vpop.eup %2434 }
0x11b0   :  { %v1454_v28 = vadd.f32 1.0, %v2435_v16 }
0x11b2   :  { %2438 = vrcp.f32 %v1454_v28 }
0x11b4   :  { %v2437_v43 = vpop.eup %2436 }
0x11b5   :  { %v1264_v1 = vsub.f32 1.0, %v2437_v43 }
0x11bc   :  { %v2439_v42 = vpop.eup %2438 }
0x120d   :  { %v1255_v10 = vpop.permute.xlu1 %1254 }
0x120e   :  { %v1257_v41 = vmul.f32 %v2437_v43, %v1255_v10 }
0x1210   :  { %1259 = vrot.lane.b32.xlu1 %v1257_v41, %s2614_s2  ;;  %v1477_v41 = vsub.f32 1.0, %v2439_v42 }
0x1214   :  { %1274 = vperm.xlu1 %2384, %v2170_v44  }
0x1215   :  { %v1468_v12 = vpop.permute.xlu0 %1467 }
0x1216   :  { %v1470_v45 = vmul.f32 %v2439_v42, %v1468_v12 }
0x1218   :  { %1472 = vrot.lane.b32.xlu0 %v1470_v45, %s2614_s2 }
0x121c   :  { %1281 = vperm.xlu0 %2385, %v1278_v46  }
0x1220   :  { %1373 = vperm.xlu0 %2385, %v2173_v17  }
0x1282   :  { %v1260_v47 = vpop.permute.xlu1 %1259 }
0x1283   :  { %v1262_v0 = vadd.f32 %v1260_v47, %v1197_v54  ;;  %v1270_v54 = vmul.f32 %v2437_v43, %v3037_v31  ;;  %v1483_v43 = vmul.f32 0.0, %v2439_v42  ;;  %v511_v42 = vadd.f32 %v2820_v35, %v3023_v56 }
0x1285   :  { %2440 = vtanh.f32 %v1262_v0 }
0x128a   :  { %v1473_v48 = vpop.permute.xlu0 %1472 }
0x128b   :  { %v1475_v49 = vadd.f32 %v1473_v48, %v1397_v14 }
0x128d   :  { %2442 = vtanh.f32 %v1475_v49 }
0x128f   :  { %v2441_v50 = vpop.eup %2440 }
0x1290   :  { %1266 = vrot.lane.b32.xlu1 %v2441_v50, %s2620_s1 }
0x1293   :  { %v3078_v58 = vpop.permute.xlu1 %1274 }
0x1294   :  { %1380 = vperm.xlu1 %2384, %v1377_v51  }
0x1297   :  { %v2443_v55 = vpop.eup %2442 }
0x1298   :  { %1479 = vrot.lane.b32.xlu0 %v2443_v55, %s2620_s1 }
0x129b   :  { %v3080_v38 = vpop.permute.xlu0 %1281 }
0x129c   :  { %v1284_v16 = vmul.f32 %v3080_v38, %v3037_v31 }
0x129f   :  { %v3083_v14 = vpop.permute.xlu0 %1373 }
0x1302   :  { %v1267_v5 = vpop.permute.xlu1 %1266 }
0x1303   :  { %v1269_v13 = vmul.f32 %v1267_v5, %v1264_v1 }
0x1305   :  { %v1271_v22 = vadd.f32 %v1270_v54, %v1269_v13 }
0x1307   :  { %v1277_v28 = vmul.f32 %v3078_v58, %v1271_v22 }
0x1309   :  { %v3088_v10 = vadd.f32 %v1284_v16, %v1277_v28 }
0x130a   :  { %v1480_v44 = vpop.permute.xlu0 %1479 }
0x130b   :  { %v1297_v12 = vpack.c.bf16 %v3088_v10, %v3088_v10  ;;  %v1482_v45 = vmul.f32 %v1480_v44, %v1477_v41 }
0x130d   :  { %1299 = vrot.lane.b32.xlu1 %v1297_v12, %s2620_s1  ;;  %v1484_v46 = vadd.f32 %v1483_v43, %v1482_v45 }
0x130f   :  { %v1485_v47 = vmul.f32 %v1484_v46, %v3083_v14 }
0x1311   :  { %519 = vrot.lane.b32.xlu1 %v2818_v34, %s2621_s15 }
0x1313   :  { %v3095_v17 = vpop.permute.xlu1 %1380 }
0x1314   :  { %v1486_v0 = vmul.f32 0.0, %v3095_v17 }
0x1316   :  { %v3099_v48 = vadd.f32 %v1486_v0, %v1485_v47 }
0x1318   :  { %v1497_v49 = vpack.c.bf16 %v3099_v48, %v3099_v48 }
0x131a   :  { %1499 = vrot.lane.b32.xlu0 %v1497_v49, %s2620_s1 }
0x131e   :  { %521 = vrot.lane.b32.xlu0 %v511_v42, %s2621_s15 }
0x137f   :  { %v1300_v50 = vpop.permute.xlu1 %1299 }
0x1380   :  { %2303 = vmatmul.mubr.msk.bf16.vlgmr.msra.gmra.mrb[28].mxu1 %vm123_vm0, %v1300_v50 }
0x1381   :  { %2315 = vmatpush3.bf16.msra.mxu1 %v3046_v37  ;;  %2318 = vmatprep.mubr.msk.bf16.mxu1 %vm2619_vm1, %v2618_v11 }
0x1382   :  { %2316 = vmatprep.subr.bf16.mxu1 %v2618_v11 }
0x1383   :  { %v520_v35 = vpop.permute.xlu1 %519 }
0x1385   :  { %2317 = vmatpush3.bf16.msra.mxu1 %v3050_v40 }
0x1386   :  { %2330 = vmatprep.subr.bf16.mxu1 %v2618_v11 }
0x138c   :  { %v1500_v34 = vpop.permute.xlu0 %1499 }
0x138d   :  { %2319 = vmatmul.mubr.msk.bf16.vlgmr.msra.gmra.mrb[32].mxu1 %vm123_vm0, %v1500_v34 }
0x138e   :  { %2331 = vmatpush3.bf16.msra.mxu1 %v3046_v37  ;;  %2334 = vmatprep.mubr.msk.bf16.mxu1 %vm2619_vm1, %v2618_v11 }
0x138f   :  { %2332 = vmatprep.subr.bf16.mxu1 %v2618_v11 }
0x1390   :  { %v522_v51 = vpop.permute.xlu0 %521 }
0x1391   :  { %v523_v55 = vsel %vm123_vm0, %v520_v35, %v522_v51 }
0x1392   :  { %526 = vst.msk [vmem:[#allocation3 + $0x30] sm:$0xff] %vm168_vm2, %v523_v55  ;;  %2333 = vmatpush3.bf16.msra.mxu1 %v3050_v40 }
0x1393   :  { %2346 = vmatprep.subr.bf16.mxu1 %v2618_v11 }
0x1399   :  { %v1496_v12 = vld [vmem:[#allocation3 + $0x30] sm:$0xff] }
0x1453   :  { %v3123_v1 = vpop.f32.mrb[28].mxu1 }
0x1454   :  { %v2304_v5 = vpop.f32.mrb[29].mxu1 }
0x1455   :  { %v1341_v54 = vpop.f32.mrb[30].mxu1 }
0x1456   :  { %v2305_v13 = vpop.f32.mrb[31].mxu1 }
0x1460   :  { %v1538_v22 = vpop.f32.mrb[32].mxu1 }
0x1461   :  { %v2320_v16 = vpop.f32.mrb[33].mxu1  ;;  %v1551_v28 = vadd.f32 %v1538_v22, %v3044_v32  ;;  %v1544_v45 = vadd.f32 %v1538_v22, %v1496_v12  ;;  %v1572_v22 = vmul.f32 %v3099_v48, %v3080_v38 }
0x1462   :  { %v1541_v41 = vpop.f32.mrb[34].mxu1 }
0x1463   :  { %1553 = vrot.lane.b32.xlu1 %v1551_v28, %s2614_s2  ;;  %v2321_v44 = vpop.f32.mrb[35].mxu1  ;;  %v2181_v43 = vmul.f32 -1.442695, %v1544_v45 }
0x1465   :  { %2444 = vpow2.f32 %v2181_v43 }
0x146f   :  { %v2445_v46 = vpop.eup %2444 }
0x1470   :  { %v1548_v47 = vadd.f32 1.0, %v2445_v46 }
0x1472   :  { %2446 = vrcp.f32 %v1548_v47 }
0x147c   :  { %v2447_v0 = vpop.eup %2446 }
0x147d   :  { %v1563_v51 = vsub.f32 1.0, %v2447_v0  ;;  %v1569_v5 = vmul.f32 %v2447_v0, %v3099_v48 }
0x14d5   :  { %v1554_v49 = vpop.permute.xlu1 %1553 }
0x14d6   :  { %v1556_v42 = vmul.f32 %v2447_v0, %v1554_v49 }
0x14d8   :  { %1558 = vrot.lane.b32.xlu0 %v1556_v42, %s2614_s2 }
0x154a   :  { %v1559_v50 = vpop.permute.xlu0 %1558 }
0x154b   :  { %v1561_v34 = vadd.f32 %v1559_v50, %v1496_v12 }
0x154d   :  { %2448 = vtanh.f32 %v1561_v34 }
0x1557   :  { %v2449_v35 = vpop.eup %2448 }
0x1558   :  { %1565 = vrot.lane.b32.xlu1 %v2449_v35, %s2620_s1 }
0x155c   :  { %461 = vrot.lane.b32.xlu1 %v2888_v33, %s2621_s15  ;;  %v453_v33 = vadd.f32 %v2890_v36, %v3023_v56 }
0x15ca   :  { %v1566_v55 = vpop.permute.xlu1 %1565 }
0x15cb   :  { %v1568_v54 = vmul.f32 %v1566_v55, %v1563_v51 }
0x15cd   :  { %v1570_v13 = vadd.f32 %v1569_v5, %v1568_v54 }
0x15ce   :  { %v462_v38 = vpop.permute.xlu1 %461 }
0x15cf   :  { %v1571_v16 = vmul.f32 %v1570_v13, %v3078_v58 }
0x15d1   :  { %v3135_v28 = vadd.f32 %v1572_v22, %v1571_v16 }
0x15d3   :  { %v1583_v41 = vpack.c.bf16 %v3135_v28, %v3135_v28 }
0x15d5   :  { %1585 = vrot.lane.b32.xlu0 %v1583_v41, %s2620_s1 }
0x15d9   :  { %463 = vrot.lane.b32.xlu0 %v453_v33, %s2621_s15 }
0x1647   :  { %v1586_v44 = vpop.permute.xlu0 %1585 }
0x1648   :  { %2327 = vmatmul.mubr.msk.bf16.vlgmr.msra.gmra.mrb[36].mxu0 %vm123_vm0, %v1586_v44 }
0x1649   :  { %2339 = vmatpush3.bf16.msra.mxu0 %v3046_v37  ;;  %2342 = vmatprep.mubr.msk.bf16.mxu0 %vm2619_vm1, %v2618_v11 }
0x164a   :  { %2340 = vmatprep.subr.bf16.mxu0 %v2618_v11 }
0x164b   :  { %v464_v12 = vpop.permute.xlu0 %463 }
0x164c   :  { %v465_v45 = vsel %vm123_vm0, %v462_v38, %v464_v12  ;;  %v1658_v12 = vmul.f32 %v3135_v28, %v3032_v21 }
0x164d   :  { %468 = vst.msk [vmem:[#allocation3 + $0x28] sm:$0xff] %vm168_vm2, %v465_v45  ;;  %2341 = vmatpush3.bf16.msra.mxu0 %v3050_v40 }
0x164e   :  { %2354 = vmatprep.subr.bf16.mxu0 %v2618_v11 }
0x1654   :  { %v1582_v49 = vld [vmem:[#allocation3 + $0x28] sm:$0xff] }
0x171b   :  { %v1624_v36 = vpop.f32.mrb[36].mxu0 }
0x171c   :  { %v2328_v43 = vpop.f32.mrb[37].mxu0  ;;  %v1637_v46 = vadd.f32 %v1624_v36, %v3044_v32  ;;  %v1630_v42 = vadd.f32 %v1624_v36, %v1582_v49 }
0x171d   :  { %v1627_v47 = vpop.f32.mrb[38].mxu0 }
0x171e   :  { %1639 = vrot.lane.b32.xlu1 %v1637_v46, %s2614_s2  ;;  %v2329_v0 = vpop.f32.mrb[39].mxu0  ;;  %v2183_v50 = vmul.f32 -1.442695, %v1630_v42 }
0x1720   :  { %2450 = vpow2.f32 %v2183_v50 }
0x172a   :  { %v2451_v34 = vpop.eup %2450 }
0x172b   :  { %v1634_v35 = vadd.f32 1.0, %v2451_v34 }
0x172d   :  { %2452 = vrcp.f32 %v1634_v35 }
0x1737   :  { %v2453_v51 = vpop.eup %2452 }
0x1738   :  { %v1649_v16 = vsub.f32 1.0, %v2453_v51  ;;  %v1655_v33 = vmul.f32 %v2453_v51, %v3135_v28 }
0x1790   :  { %v1640_v55 = vpop.permute.xlu1 %1639 }
0x1791   :  { %v1642_v5 = vmul.f32 %v2453_v51, %v1640_v55 }
0x1793   :  { %1644 = vrot.lane.b32.xlu0 %v1642_v5, %s2614_s2 }
0x1805   :  { %v1645_v54 = vpop.permute.xlu0 %1644 }
0x1806   :  { %v1647_v13 = vadd.f32 %v1645_v54, %v1582_v49 }
0x1808   :  { %2454 = vtanh.f32 %v1647_v13 }
0x1812   :  { %v2455_v22 = vpop.eup %2454 }
0x1813   :  { %1651 = vrot.lane.b32.xlu1 %v2455_v22, %s2620_s1 }
0x1817   :  { %403 = vrot.lane.b32.xlu1 %v2811_v29, %s2621_s15  ;;  %v395_v29 = vadd.f32 %v2813_v30, %v3023_v56 }
0x1885   :  { %v1652_v41 = vpop.permute.xlu1 %1651 }
0x1886   :  { %v1654_v44 = vmul.f32 %v1652_v41, %v1649_v16 }
0x1888   :  { %v1656_v38 = vadd.f32 %v1655_v33, %v1654_v44 }
0x1889   :  { %v404_v21 = vpop.permute.xlu1 %403 }
0x188a   :  { %v1657_v45 = vmul.f32 %v1656_v38, %v3029_v61 }
0x188c   :  { %v3162_v36 = vadd.f32 %v1658_v12, %v1657_v45 }
0x188e   :  { %v1669_v43 = vpack.c.bf16 %v3162_v36, %v3162_v36 }
0x1890   :  { %1671 = vrot.lane.b32.xlu0 %v1669_v43, %s2620_s1 }
0x1894   :  { %405 = vrot.lane.b32.xlu0 %v395_v29, %s2621_s15 }
0x1902   :  { %v1672_v46 = vpop.permute.xlu0 %1671 }
0x1903   :  { %2335 = vmatmul.mubr.msk.bf16.vlgmr.msra.gmra.mrb[36].mxu1 %vm123_vm0, %v1672_v46  ;;  %v1744_v46 = vmul.f32 %v3162_v36, %v2995_v60 }
0x1904   :  { %2347 = vmatpush3.bf16.msra.mxu1 %v3046_v37  ;;  %2350 = vmatprep.mubr.msk.bf16.mxu1 %vm2619_vm1, %v2618_v11 }
0x1905   :  { %2348 = vmatprep.subr.bf16.mxu1 %v2618_v11 }
0x1906   :  { %v406_v47 = vpop.permute.xlu0 %405 }
0x1907   :  { %v407_v0 = vsel %vm123_vm0, %v404_v21, %v406_v47 }
0x1908   :  { %410 = vst.msk [vmem:[#allocation3 + $0x20] sm:$0xff] %vm168_vm2, %v407_v0  ;;  %2349 = vmatpush3.bf16.msra.mxu1 %v3050_v40 }
0x1909   :  { %2362 = vmatprep.subr.bf16.mxu1 %v2618_v11 }
0x190f   :  { %v1668_v35 = vld [vmem:[#allocation3 + $0x20] sm:$0xff] }
0x19d6   :  { %v1710_v30 = vpop.f32.mrb[36].mxu1 }
0x19d7   :  { %v2336_v49 = vpop.f32.mrb[37].mxu1  ;;  %v1723_v42 = vadd.f32 %v1710_v30, %v3044_v32  ;;  %v1716_v51 = vadd.f32 %v1710_v30, %v1668_v35 }
0x19d8   :  { %v1713_v50 = vpop.f32.mrb[38].mxu1 }
0x19d9   :  { %1725 = vrot.lane.b32.xlu1 %v1723_v42, %s2614_s2  ;;  %v2337_v34 = vpop.f32.mrb[39].mxu1  ;;  %v2185_v55 = vmul.f32 -1.442695, %v1716_v51 }
0x19db   :  { %2456 = vpow2.f32 %v2185_v55 }
0x19e5   :  { %v2457_v5 = vpop.eup %2456 }
0x19e6   :  { %v1720_v54 = vadd.f32 1.0, %v2457_v5 }
0x19e8   :  { %2458 = vrcp.f32 %v1720_v54 }
0x19f2   :  { %v2459_v13 = vpop.eup %2458 }
0x19f3   :  { %v1735_v38 = vsub.f32 1.0, %v2459_v13  ;;  %v1741_v45 = vmul.f32 %v2459_v13, %v3162_v36 }
0x1a4b   :  { %v1726_v22 = vpop.permute.xlu1 %1725 }
0x1a4c   :  { %v1728_v16 = vmul.f32 %v2459_v13, %v1726_v22 }
0x1a4e   :  { %1730 = vrot.lane.b32.xlu0 %v1728_v16, %s2614_s2 }
0x1ac0   :  { %v1731_v41 = vpop.permute.xlu0 %1730 }
0x1ac1   :  { %v1733_v33 = vadd.f32 %v1731_v41, %v1668_v35 }
0x1ac3   :  { %2460 = vtanh.f32 %v1733_v33 }
0x1acd   :  { %v2461_v44 = vpop.eup %2460 }
0x1ace   :  { %1737 = vrot.lane.b32.xlu1 %v2461_v44, %s2620_s1 }
0x1ad2   :  { %345 = vrot.lane.b32.xlu1 %v2881_v26, %s2621_s15  ;;  %v337_v26 = vadd.f32 %v2883_v27, %v3023_v56 }
0x1b40   :  { %v1738_v12 = vpop.permute.xlu1 %1737 }
0x1b41   :  { %v1740_v43 = vmul.f32 %v1738_v12, %v1735_v38 }
0x1b43   :  { %v1742_v29 = vadd.f32 %v1741_v45, %v1740_v43 }
0x1b44   :  { %v346_v60 = vpop.permute.xlu1 %345 }
0x1b45   :  { %v1743_v21 = vmul.f32 %v1742_v29, %v2992_v52 }
0x1b47   :  { %v3189_v47 = vadd.f32 %v1744_v46, %v1743_v21 }
0x1b49   :  { %v1755_v0 = vpack.c.bf16 %v3189_v47, %v3189_v47 }
0x1b4b   :  { %1757 = vrot.lane.b32.xlu0 %v1755_v0, %s2620_s1  ;;  %v1830_v0 = vmul.f32 %v3189_v47, %v2969_v59 }
0x1b4f   :  { %347 = vrot.lane.b32.xlu0 %v337_v26, %s2621_s15 }
0x1bbd   :  { %v1758_v30 = vpop.permute.xlu0 %1757 }
0x1bbe   :  { %2343 = vmatmul.mubr.msk.bf16.vlgmr.msra.gmra.mrb[40].mxu0 %vm123_vm0, %v1758_v30 }
0x1bbf   :  { %2355 = vmatpush3.bf16.msra.mxu0 %v3046_v37  ;;  %2358 = vmatprep.mubr.msk.bf16.mxu0 %vm2619_vm1, %v2618_v11 }
0x1bc0   :  { %2356 = vmatprep.subr.bf16.mxu0 %v2618_v11 }
0x1bc1   :  { %v348_v49 = vpop.permute.xlu0 %347 }
0x1bc2   :  { %v349_v42 = vsel %vm123_vm0, %v346_v60, %v348_v49 }
0x1bc3   :  { %352 = vst.msk [vmem:[#allocation3 + $0x18] sm:$0xff] %vm168_vm2, %v349_v42  ;;  %2357 = vmatpush3.bf16.msra.mxu0 %v3050_v40 }
0x1bca   :  { %v1754_v55 = vld [vmem:[#allocation3 + $0x18] sm:$0xff] }
0x1c91   :  { %v1796_v27 = vpop.f32.mrb[40].mxu0 }
0x1c92   :  { %v2344_v50 = vpop.f32.mrb[41].mxu0  ;;  %v1809_v34 = vadd.f32 %v1796_v27, %v3044_v32  ;;  %v1802_v5 = vadd.f32 %v1796_v27, %v1754_v55 }
0x1c93   :  { %v1799_v35 = vpop.f32.mrb[42].mxu0 }
0x1c94   :  { %1811 = vrot.lane.b32.xlu1 %v1809_v34, %s2614_s2  ;;  %v2345_v51 = vpop.f32.mrb[43].mxu0  ;;  %v2187_v54 = vmul.f32 -1.442695, %v1802_v5 }
0x1c96   :  { %2462 = vpow2.f32 %v2187_v54 }
0x1ca0   :  { %v2463_v13 = vpop.eup %2462 }
0x1ca1   :  { %v1806_v22 = vadd.f32 1.0, %v2463_v13 }
0x1ca3   :  { %2464 = vrcp.f32 %v1806_v22 }
0x1cad   :  { %v2465_v16 = vpop.eup %2464 }
0x1cae   :  { %v1821_v45 = vsub.f32 1.0, %v2465_v16  ;;  %v1827_v29 = vmul.f32 %v2465_v16, %v3189_v47 }
0x1d06   :  { %v1812_v41 = vpop.permute.xlu1 %1811 }
0x1d07   :  { %v1814_v33 = vmul.f32 %v2465_v16, %v1812_v41 }
0x1d09   :  { %1816 = vrot.lane.b32.xlu0 %v1814_v33, %s2614_s2 }
0x1d7b   :  { %v1817_v44 = vpop.permute.xlu0 %1816 }
0x1d7c   :  { %v1819_v38 = vadd.f32 %v1817_v44, %v1754_v55 }
0x1d7e   :  { %2466 = vtanh.f32 %v1819_v38 }
0x1d88   :  { %v2467_v12 = vpop.eup %2466 }
0x1d89   :  { %1823 = vrot.lane.b32.xlu1 %v2467_v12, %s2620_s1 }
0x1d8d   :  { %287 = vrot.lane.b32.xlu1 %v2804_v24, %s2621_s15  ;;  %v279_v24 = vadd.f32 %v2806_v25, %v3023_v56 }
0x1dfb   :  { %v1824_v43 = vpop.permute.xlu1 %1823 }
0x1dfc   :  { %v1826_v46 = vmul.f32 %v1824_v43, %v1821_v45 }
0x1dfe   :  { %v1828_v21 = vadd.f32 %v1827_v29, %v1826_v46 }
0x1dff   :  { %v288_v59 = vpop.permute.xlu1 %287 }
0x1e00   :  { %v1829_v26 = vmul.f32 %v1828_v21, %v2966_v53 }
0x1e02   :  { %v3215_v30 = vadd.f32 %v1830_v0, %v1829_v26 }
0x1e04   :  { %v1841_v60 = vpack.c.bf16 %v3215_v30, %v3215_v30  ;;  %v1916_v29 = vmul.f32 %v3215_v30, %v2943_v63 }
0x1e06   :  { %1843 = vrot.lane.b32.xlu0 %v1841_v60, %s2620_s1 }
0x1e0a   :  { %289 = vrot.lane.b32.xlu0 %v279_v24, %s2621_s15 }
0x1e78   :  { %v1844_v49 = vpop.permute.xlu0 %1843 }
0x1e79   :  { %2351 = vmatmul.mubr.msk.bf16.vlgmr.msra.gmra.mrb[40].mxu1 %vm123_vm0, %v1844_v49 }
0x1e7a   :  { %2363 = vmatpush3.bf16.msra.mxu1 %v3046_v37  ;;  %2366 = vmatprep.mubr.msk.bf16.mxu1 %vm2619_vm1, %v2618_v11 }
0x1e7b   :  { %2364 = vmatprep.subr.bf16.mxu1 %v2618_v11 }
0x1e7c   :  { %v290_v42 = vpop.permute.xlu0 %289 }
0x1e7d   :  { %v291_v27 = vsel %vm123_vm0, %v288_v59, %v290_v42 }
0x1e7e   :  { %294 = vst.msk [vmem:[#allocation3 + $0x10] sm:$0xff] %vm168_vm2, %v291_v27  ;;  %2365 = vmatpush3.bf16.msra.mxu1 %v3050_v40 }
0x1e85   :  { %v1840_v51 = vld [vmem:[#allocation3 + $0x10] sm:$0xff] }
0x1f4c   :  { %v1882_v25 = vpop.f32.mrb[40].mxu1 }
0x1f4d   :  { %v2352_v50 = vpop.f32.mrb[41].mxu1  ;;  %v1895_v34 = vadd.f32 %v1882_v25, %v3044_v32  ;;  %v1888_v55 = vadd.f32 %v1882_v25, %v1840_v51 }
0x1f4e   :  { %v1885_v35 = vpop.f32.mrb[42].mxu1 }
0x1f4f   :  { %1897 = vrot.lane.b32.xlu1 %v1895_v34, %s2614_s2  ;;  %v2353_v37 = vpop.f32.mrb[43].mxu1  ;;  %v2189_v5 = vmul.f32 -1.442695, %v1888_v55 }
0x1f51   :  { %2468 = vpow2.f32 %v2189_v5 }
0x1f5b   :  { %v2469_v11 = vpop.eup %2468 }
0x1f5c   :  { %v1892_v54 = vadd.f32 1.0, %v2469_v11 }
0x1f5e   :  { %2470 = vrcp.f32 %v1892_v54 }
0x1f68   :  { %v2471_v13 = vpop.eup %2470 }
0x1f69   :  { %v1907_v44 = vsub.f32 1.0, %v2471_v13  ;;  %v1913_v12 = vmul.f32 %v2471_v13, %v3215_v30 }
0x1fc1   :  { %v1898_v22 = vpop.permute.xlu1 %1897 }
0x1fc2   :  { %v1900_v16 = vmul.f32 %v2471_v13, %v1898_v22  ;;  %v1351_v22 = vadd.f32 %v3123_v1, %v2829_v39 }
0x1fc4   :  { %1902 = vrot.lane.b32.xlu0 %v1900_v16, %s2614_s2  ;;  %v1296_v16 = vld [vmem:[#allocation2 + $0x38] sm:$0xff] }
0x2036   :  { %v1903_v40 = vpop.permute.xlu0 %1902 }
0x2037   :  { %v1905_v41 = vadd.f32 %v1903_v40, %v1840_v51  ;;  %v1344_v40 = vadd.f32 %v3123_v1, %v1296_v16 }
0x2039   :  { %2472 = vtanh.f32 %v1905_v41  ;;  %v2175_v41 = vmul.f32 -1.442695, %v1344_v40 }
0x2043   :  { %v2473_v33 = vpop.eup %2472 }
0x2044   :  { %1909 = vrot.lane.b32.xlu1 %v2473_v33, %s2620_s1 }
0x2048   :  { %229 = vrot.lane.b32.xlu1 %v2874_v15, %s2621_s15  ;;  %v221_v15 = vadd.f32 %v2876_v18, %v3023_v56 }
0x20b6   :  { %v1910_v38 = vpop.permute.xlu1 %1909 }
0x20b7   :  { %v1912_v45 = vmul.f32 %v1910_v38, %v1907_v44 }
0x20b9   :  { %v1914_v43 = vadd.f32 %v1913_v12, %v1912_v45 }
0x20ba   :  { %v230_v60 = vpop.permute.xlu1 %229 }
0x20bb   :  { %v1915_v46 = vmul.f32 %v1914_v43, %v2940_v57 }
0x20bd   :  { %v3241_v21 = vadd.f32 %v1916_v29, %v1915_v46 }
0x20bf   :  { %v1927_v0 = vpack.c.bf16 %v3241_v21, %v3241_v21  ;;  %v2002_v39 = vmul.f32 %v3241_v21, %v2917_v9 }
0x20c1   :  { %1929 = vrot.lane.b32.xlu0 %v1927_v0, %s2620_s1 }
0x20c5   :  { %231 = vrot.lane.b32.xlu0 %v221_v15, %s2621_s15 }
0x2133   :  { %v1930_v26 = vpop.permute.xlu0 %1929 }
0x2134   :  { %2359 = vmatmul.mubr.msk.bf16.vlgmr.msra.gmra.mrb[44].mxu0 %vm123_vm0, %v1930_v26 }
0x2137   :  { %v232_v24 = vpop.permute.xlu0 %231 }
0x2138   :  { %v233_v63 = vsel %vm123_vm0, %v230_v60, %v232_v24  ;;  %v164_v24 = vadd.f32 %v2799_v20, %v3023_v56  ;;  %v890_v20 = vmul.f32 %v2948_v6, %v2940_v57  ;;  %v1088_v56 = vmul.f32 %v3000_v7, %v2992_v52 }
0x2139   :  { %236 = vst.msk [vmem:[#allocation3 + $0x8] sm:$0xff] %vm168_vm2, %v233_v63  ;;  %v1661_v6 = vmul.f32 %v3162_v36, %v3029_v61  ;;  %v1833_v7 = vmul.f32 %v3215_v30, %v2966_v53  ;;  %v1383_v36 = vmul.f32 %v3095_v17, %v3088_v10 }
0x2140   :  { %v1926_v18 = vld [vmem:[#allocation3 + $0x8] sm:$0xff] }
0x2207   :  { %v1968_v49 = vpop.f32.mrb[44].mxu0 }
0x2208   :  { %v2360_v59 = vpop.f32.mrb[45].mxu0  ;;  %v1981_v42 = vadd.f32 %v1968_v49, %v3044_v32  ;;  %v1974_v50 = vadd.f32 %v1968_v49, %v1926_v18 }
0x2209   :  { %v1971_v27 = vpop.f32.mrb[46].mxu0 }
0x220a   :  { %1983 = vrot.lane.b32.xlu1 %v1981_v42, %s2614_s2  ;;  %v2361_v25 = vpop.f32.mrb[47].mxu0  ;;  %v2191_v34 = vmul.f32 -1.442695, %v1974_v50 }
0x220b   :  { %v693_v25 = vmul.f32 %v2868_v8, %v2862_v62  ;;  %v1489_v8 = vmul.f32 %v3099_v48, %v3083_v14 }
0x220c   :  { %2474 = vpow2.f32 %v2191_v34 }
0x2216   :  { %v2475_v35 = vpop.eup %2474 }
0x2217   :  { %v1978_v37 = vadd.f32 1.0, %v2475_v35 }
0x2219   :  { %2476 = vrcp.f32 %v1978_v37 }
0x2223   :  { %v2477_v51 = vpop.eup %2476 }
0x2224   :  { %v1993_v38 = vsub.f32 1.0, %v2477_v51  ;;  %v1999_v45 = vmul.f32 %v2477_v51, %v3241_v21 }
0x227c   :  { %v1984_v55 = vpop.permute.xlu1 %1983 }
0x227d   :  { %v1986_v5 = vmul.f32 %v2477_v51, %v1984_v55 }
0x227f   :  { %1988 = vrot.lane.b32.xlu0 %v1986_v5, %s2614_s2 }
0x22f1   :  { %v1989_v11 = vpop.permute.xlu0 %1988 }
0x22f2   :  { %v1991_v54 = vadd.f32 %v1989_v11, %v1926_v18  ;;  %v1286_v18 = vmul.f32 %v3088_v10, %v3078_v58 }
0x22f4   :  { %2478 = vtanh.f32 %v1991_v54 }
0x22f5   :  { %2480 = vpow2.f32 %v2175_v41 }
0x22fe   :  { %v2479_v13 = vpop.eup %2478 }
0x22ff   :  { %1995 = vrot.lane.b32.xlu1 %v2479_v13, %s2620_s1  ;;  %v2481_v33 = vpop.eup %2480 }
0x2300   :  { %v1348_v44 = vadd.f32 1.0, %v2481_v33 }
0x2302   :  { %2482 = vrcp.f32 %v1348_v44 }
0x2303   :  { %172 = vrot.lane.b32.xlu1 %v2797_v19, %s2621_s15 }
0x2307   :  { %1353 = vrot.lane.b32.xlu1 %v1351_v22, %s2614_s2 }
0x230c   :  { %v2483_v1 = vpop.eup %2482 }
0x230d   :  { %v1363_v34 = vsub.f32 1.0, %v2483_v1  ;;  %v1369_v48 = vmul.f32 %v2483_v1, %v3088_v10 }
0x2371   :  { %v1996_v12 = vpop.permute.xlu1 %1995 }
0x2372   :  { %v1998_v43 = vmul.f32 %v1996_v12, %v1993_v38 }
0x2374   :  { %v2000_v29 = vadd.f32 %v1999_v45, %v1998_v43 }
0x2375   :  { %v173_v19 = vpop.permute.xlu1 %172 }
0x2376   :  { %v2001_v46 = vmul.f32 %v2000_v29, %v2914_v3 }
0x2378   :  { %v3266_v0 = vadd.f32 %v2002_v39, %v2001_v46 }
0x2379   :  { %v1354_v15 = vpop.permute.xlu1 %1353 }
0x237a   :  { %v1356_v26 = vmul.f32 %v2483_v1, %v1354_v15  ;;  %v2013_v60 = vpack.c.bf16 %v3266_v0, %v3266_v0  ;;  %v2005_v50 = vmul.f32 %v3266_v0, %v2914_v3 }
0x237c   :  { %2015 = vrot.lane.b32.xlu0 %v2013_v60, %s2620_s1  ;;  %1358 = vrot.lane.b32.xlu1 %v1356_v26, %s2614_s2 }
0x2380   :  { %174 = vrot.lane.b32.xlu0 %v164_v24, %s2621_s15  ;;  %v791_v24 = vmul.f32 %v2922_v23, %v2914_v3  ;;  %v1747_v3 = vmul.f32 %v3189_v47, %v2992_v52  ;;  %v1919_v23 = vmul.f32 %v3241_v21, %v2940_v57 }
0x23ee   :  { %v2016_v9 = vpop.permute.xlu0 %2015  ;;  %v1359_v63 = vpop.permute.xlu1 %1358 }
0x23ef   :  { %v1361_v49 = vadd.f32 %v1359_v63, %v1296_v16  ;;  %2367 = vmatmul.mubr.msk.bf16.vlgmr.msra.gmra.mrb[44].mxu1 %vm123_vm0, %v2016_v9  ;;  %v989_v9 = vmul.f32 %v2974_v4, %v2966_v53  ;;  %v1187_v63 = vmul.f32 %v3037_v31, %v3029_v61 }
0x23f1   :  { %2484 = vtanh.f32 %v1361_v49 }
0x23f2   :  { %v175_v59 = vpop.permute.xlu0 %174 }
0x23f3   :  { %v176_v42 = vsel %vm123_vm0, %v173_v19, %v175_v59  ;;  %v1575_v59 = vmul.f32 %v3135_v28, %v3078_v58  ;;  %v2088_v58 = vmul.f32 %v3266_v0, %v2864_v2 }
0x23f4   :  { %178 = vst.msk [vmem:[#allocation3] sm:$0xff] %vm168_vm2, %v176_v42 }
0x23fb   :  { %v2485_v27 = vpop.eup %2484  ;;  %v2012_v45 = vld [vmem:[#allocation3] sm:$0xff] }
0x23fc   :  { %1365 = vrot.lane.b32.xlu1 %v2485_v27, %s2620_s1 }
0x2400   :  { %695 = vrot.lane.b32.xlu1 %v693_v25, %s2620_s1 }
0x2404   :  { %892 = vrot.lane.b32.xlu1 %v890_v20, %s2620_s1 }
0x2408   :  { %1090 = vrot.lane.b32.xlu1 %v1088_v56, %s2620_s1 }
0x240c   :  { %1288 = vrot.lane.b32.xlu1 %v1286_v18, %s2620_s1 }
0x2410   :  { %1491 = vrot.lane.b32.xlu1 %v1489_v8, %s2620_s1 }
0x2414   :  { %1663 = vrot.lane.b32.xlu1 %v1661_v6, %s2620_s1 }
0x2418   :  { %1835 = vrot.lane.b32.xlu1 %v1833_v7, %s2620_s1 }
0x241c   :  { %2007 = vrot.lane.b32.xlu1 %v2005_v50, %s2620_s1 }
0x246e   :  { %v1366_v35 = vpop.permute.xlu1 %1365 }
0x246f   :  { %v1368_v37 = vmul.f32 %v1366_v35, %v1363_v34 }
0x2471   :  { %v1370_v51 = vadd.f32 %v1369_v48, %v1368_v37 }
0x2472   :  { %v696_v55 = vpop.permute.xlu1 %695 }
0x2473   :  { %v1376_v5 = vmul.f32 %v3083_v14, %v1370_v51  ;;  %698 = vst.msk [vmem:[#allocation10] sm:$0xff] %vm123_vm0, %v696_v55 }
0x2475   :  { %v1384_v30 = vadd.f32 %v1383_v36, %v1376_v5 }
0x2476   :  { %v893_v11 = vpop.permute.xlu1 %892 }
0x2477   :  { %896 = vst.msk [vmem:[#allocation10 + $0x10] sm:$0xff] %vm123_vm0, %v893_v11  ;;  %1393 = vrot.lane.b32.xlu1 %v1384_v30, %s2620_s1  ;;  %v1385_v49 = vmul.f32 %v1384_v30, %v3083_v14 }
0x247a   :  { %v1091_v54 = vpop.permute.xlu1 %1090  ;;  %v2090_v5 = vld [vmem:[#allocation10] sm:$0xff] }
0x247b   :  { %1094 = vst.msk [vmem:[#allocation10 + $0x20] sm:$0xff] %vm123_vm0, %v1091_v54 }
0x247e   :  { %v1289_v13 = vpop.permute.xlu1 %1288  ;;  %v1918_v51 = vld [vmem:[#allocation10 + $0x10] sm:$0xff] }
0x247f   :  { %1292 = vst.msk [vmem:[#allocation10 + $0x30] sm:$0xff] %vm123_vm0, %v1289_v13 }
0x2482   :  { %v3314_v41 = vpop.permute.xlu1 %1491  ;;  %v1746_v34 = vld [vmem:[#allocation10 + $0x20] sm:$0xff] }
0x2486   :  { %v3316_v33 = vpop.permute.xlu1 %1663  ;;  %v1574_v18 = vld [vmem:[#allocation10 + $0x30] sm:$0xff] }
0x248a   :  { %v1836_v44 = vpop.permute.xlu1 %1835 }
0x248e   :  { %v2008_v38 = vpop.permute.xlu1 %2007 }
0x24c2   :  { %v2054_v22 = vpop.f32.mrb[44].mxu1 }
0x24c3   :  { %v2368_v16 = vpop.f32.mrb[45].mxu1  ;;  %v2067_v10 = vadd.f32 %v2054_v22, %v3044_v32  ;;  %v2060_v43 = vadd.f32 %v2054_v22, %v2012_v45 }
0x24c4   :  { %v2057_v17 = vpop.f32.mrb[46].mxu1 }
0x24c5   :  { %2069 = vrot.lane.b32.xlu0 %v2067_v10, %s2614_s2  ;;  %v2369_v40 = vpop.f32.mrb[47].mxu1  ;;  %v2193_v29 = vmul.f32 -1.442695, %v2060_v43 }
0x24c7   :  { %2486 = vpow2.f32 %v2193_v29 }
0x24d1   :  { %v2487_v19 = vpop.eup %2486 }
0x24d2   :  { %v2064_v39 = vadd.f32 1.0, %v2487_v19 }
0x24d4   :  { %2488 = vrcp.f32 %v2064_v39 }
0x24de   :  { %v2489_v32 = vpop.eup %2488 }
0x24df   :  { %v2079_v53 = vsub.f32 1.0, %v2489_v32  ;;  %v2085_v61 = vmul.f32 %v2489_v32, %v3266_v0 }
0x24e9   :  { %v1394_v12 = vpop.permute.xlu1 %1393 }
0x24ea   :  { %1396 = vst.msk [vmem:[#allocation11] sm:$0xff] %vm123_vm0, %v1394_v12 }
0x2537   :  { %v2070_v46 = vpop.permute.xlu0 %2069 }
0x2538   :  { %v2072_v1 = vmul.f32 %v2489_v32, %v2070_v46 }
0x253a   :  { %2074 = vrot.lane.b32.xlu0 %v2072_v1, %s2614_s2  ;;  %s2109_s2 = sshll.u32 %s2622_s7, 4  ;;  %s2110_s2 = int_to_ptr.vmem [resolvable:$true] %s2109_s2 }
0x253b   :  { %s2558_s18 = scalar_lea.vmem %s2110_s2, 1024  ;;  %p2563_p11 = scmp.lt.s32.totalorder %s2110_s2, %s2110_s2 }
0x253c   :  { %p2559_p10 = scmp.ne.s32.totalorder %s2110_s2, %s2558_s18  ;;  %p2564_p12 = scmp.lt.s32.totalorder %s2558_s18, %s2558_s18 }
0x253e   :  { %p2565_p13 = por %p2564_p12, %p2563_p11 }
0x2540   :  { %p2566_p0 = pnand %p2565_p13, %p2559_p10 }
0x25ac   :  { %v2075_v15 = vpop.permute.xlu0 %2074 }
0x25ad   :  { %v2077_v26 = vadd.f32 %v2075_v15, %v2012_v45 }
0x25af   :  { %2490 = vtanh.f32 %v2077_v26 }
0x25b9   :  { %v2491_v60 = vpop.eup %2490 }
0x25ba   :  { %2081 = vrot.lane.b32.xlu0 %v2491_v60, %s2620_s1 }
0x25be   :  { %793 = vrot.lane.b32.xlu0 %v791_v24, %s2620_s1 }
0x25c2   :  { %991 = vrot.lane.b32.xlu0 %v989_v9, %s2620_s1 }
0x25c6   :  { %1189 = vrot.lane.b32.xlu0 %v1187_v63, %s2620_s1 }
0x25ca   :  { %1387 = vrot.lane.b32.xlu0 %v1385_v49, %s2620_s1 }
0x25ce   :  { %1577 = vrot.lane.b32.xlu0 %v1575_v59, %s2620_s1 }
0x25d2   :  { %1749 = vrot.lane.b32.xlu0 %v1747_v3, %s2620_s1 }
0x25d6   :  { %1921 = vrot.lane.b32.xlu0 %v1919_v23, %s2620_s1 }
0x262c   :  { %v2082_v4 = vpop.permute.xlu0 %2081 }
0x262d   :  { %v2084_v31 = vmul.f32 %v2082_v4, %v2079_v53 }
0x262f   :  { %v2086_v14 = vadd.f32 %v2085_v61, %v2084_v31 }
0x2630   :  { %v794_v42 = vpop.permute.xlu0 %793 }
0x2631   :  { %v2087_v28 = vmul.f32 %v2086_v14, %v2862_v62  ;;  %797 = vst.msk [vmem:[#allocation10 + $0x8] sm:$0xff] %vm123_vm0, %v794_v42 }
0x2633   :  { %v2089_v52 = vadd.f32 %v2088_v58, %v2087_v28 }
0x2634   :  { %v992_v47 = vpop.permute.xlu0 %991 }
0x2635   :  { %995 = vst.msk [vmem:[#allocation10 + $0x18] sm:$0xff] %vm123_vm0, %v992_v47  ;;  %v2091_v57 = vmul.f32 %v2089_v52, %v2862_v62 }
0x2637   :  { %2093 = vrot.lane.b32.xlu0 %v2091_v57, %s2620_s1 }
0x2638   :  { %v2004_v21 = vld [vmem:[#allocation10 + $0x8] sm:$0xff]  ;;  %v1190_v27 = vpop.permute.xlu0 %1189 }
0x2639   :  { %v2010_v25 = vadd.f32 %v2008_v38, %v2004_v21  ;;  %1193 = vst.msk [vmem:[#allocation10 + $0x28] sm:$0xff] %vm123_vm0, %v1190_v27 }
0x263b   :  { %2011 = vst.msk [vmem:[#allocation10 + $0x8] sm:$0xff] %vm123_vm0, %v2010_v25  ;;  %2099 = vrot.lane.b32.xlu0 %v2089_v52, %s2620_s1 }
0x263c   :  { %v1832_v2 = vld [vmem:[#allocation10 + $0x18] sm:$0xff]  ;;  %v1388_v0 = vpop.permute.xlu0 %1387 }
0x263d   :  { %v1838_v20 = vadd.f32 %v1836_v44, %v1832_v2  ;;  %1391 = vst.msk [vmem:[#allocation10 + $0x38] sm:$0xff] %vm123_vm0, %v1388_v0 }
0x263f   :  { %1839 = vst.msk [vmem:[#allocation10 + $0x18] sm:$0xff] %vm123_vm0, %v1838_v20 }
0x2640   :  { %v1660_v56 = vld [vmem:[#allocation10 + $0x28] sm:$0xff]  ;;  %v1578_v62 = vpop.permute.xlu0 %1577 }
0x2641   :  { %v1666_v8 = vadd.f32 %v3316_v33, %v1660_v56  ;;  %v1580_v6 = vadd.f32 %v1578_v62, %v1574_v18 }
0x2643   :  { %1667 = vst.msk [vmem:[#allocation10 + $0x28] sm:$0xff] %vm123_vm0, %v1666_v8  ;;  %1581 = vst.msk [vmem:[#allocation10 + $0x30] sm:$0xff] %vm123_vm0, %v1580_v6 }
0x2644   :  { %v1488_v7 = vld [vmem:[#allocation10 + $0x38] sm:$0xff]  ;;  %v1750_v50 = vpop.permute.xlu0 %1749 }
0x2645   :  { %v1494_v35 = vadd.f32 %v3314_v41, %v1488_v7  ;;  %v1752_v48 = vadd.f32 %v1750_v50, %v1746_v34 }
0x2647   :  { %1495 = vst.msk [vmem:[#allocation10 + $0x38] sm:$0xff] %vm123_vm0, %v1494_v35  ;;  %1753 = vst.msk [vmem:[#allocation10 + $0x20] sm:$0xff] %vm123_vm0, %v1752_v48 }
0x2648   :  { %v1922_v37 = vpop.permute.xlu0 %1921 }
0x2649   :  { %v1924_v55 = vadd.f32 %v1922_v37, %v1918_v51 }
0x264b   :  { %1925 = vst.msk [vmem:[#allocation10 + $0x10] sm:$0xff] %vm123_vm0, %v1924_v55 }
0x26a9   :  { %v2094_v36 = vpop.permute.xlu0 %2093 }
0x26aa   :  { %v2096_v30 = vadd.f32 %v2094_v36, %v2090_v5 }
0x26ac   :  { %2097 = vst.msk [vmem:[#allocation10] sm:$0xff] %vm123_vm0, %v2096_v30 }
0x26ad   :  { %v2100_v11 = vpop.permute.xlu0 %2099 }
0x26ae   :  { %2569 = shalt.err (!%p2566_p0)
}
0x26af   :  { %s2570_s23 = scalar_lea.hbm %s3408_s8, 1024 }
0x26b0   :  { %p2571_p1 = scmp.ne.s32.totalorder %s3408_s8, %s2570_s23  ;;  %p2574_p2 = scmp.lt.u32.totalorder %s2570_s23, %s3408_s8 }
0x26b2   :  { %p2576_p3 = pnand %p2574_p2, %p2571_p1 }
0x26b4   :  { %2579 = shalt.err (!%p2576_p3)
}
0x26b5   :  { %2115 = dma.vmem_to_hbm [thread:$0]  %s2110_s2, 1024, %s3408_s8, [#allocation6], %s2611_s19, %s2611_s19, %s2612_s20   ;;  %2103 = vst.msk [vmem:[#allocation11 + $0x8] sm:$0xff] %vm123_vm0, %v2100_v11 }
0x26b6   :  { %s2580_s28 = scalar_lea.vmem %s3362_s17, 256  ;;  %p2585_p5 = scmp.lt.s32.totalorder %s3362_s17, %s3362_s17 }
0x26b7   :  { %p2581_p4 = scmp.ne.s32.totalorder %s3362_s17, %s2580_s28  ;;  %p2586_p6 = scmp.lt.s32.totalorder %s2580_s28, %s2580_s28 }
0x26b9   :  { %p2587_p7 = por %p2586_p6, %p2585_p5 }
0x26bb   :  { %p2588_p8 = pnand %p2587_p7, %p2581_p4 }
0x26bd   :  { %2591 = shalt.err (!%p2588_p8)
}
0x26be   :  { %s2592_s30 = scalar_lea.hbm %s3409_s9, 256 }
0x26bf   :  { %p2593_p9 = scmp.ne.s32.totalorder %s3409_s9, %s2592_s30  ;;  %p2596_p10 = scmp.lt.u32.totalorder %s2592_s30, %s3409_s9 }
0x26c1   :  { %p2598_p11 = pnand %p2596_p10, %p2593_p9 }
0x26c3   :  { %2601 = shalt.err (!%p2598_p11)
}
0x26c4   :  { %2127 = dma.vmem_to_hbm [thread:$0]  %s3362_s17, 256, %s3409_s9, [#allocation12], %s2611_s19, %s2611_s19, %s2612_s20  }
0x26c5   :  { %2606 = dma.done.wait [#allocation6], 1024  }
0x26c6   :  { %2607 = vsyncadd [#allocation6], 4294966272 }
0x26c7   :  { %2608 = dma.done.wait [#allocation12], 256  }
0x26c8   :  { %2609 = vsyncadd [#allocation12], 4294967040 }
0x26c9   :  { %2134 = vsyncpa [#allocation5], 1 }
0x26ca   :  { %2135 = vsyncpa [#allocation8], 1 }
0x26cb   :  { %2136 = vsyncpa [#allocation6], 1 }
0x26cc   :  { %2137 = vsyncpa [#allocation12], 1 }

</bundles_post_ra>
